<compile_context>
chip_gen: v7x
topology: tpu7x:2x2x1
jax: 0.10.0
libtpu: 0.0.40
codegen_flags: <defaults>
</compile_context>

<pallas_src>
import numpy as np

import jax
import jax.numpy as jnp
from jax.experimental import pallas as pl
from jax.experimental.pallas import tpu as pltpu

CPAD = 128          # every channel-like dim is padded to one full lane width
NUM_CLASSES = 10


# ----------------------------------------------------------------------------
# In-kernel activation helpers (match PyTorch Hardswish / Hardsigmoid / ReLU).
# ----------------------------------------------------------------------------
def _act(x, act):
    if act == "linear":
        return x
    if act == "relu":
        return jnp.maximum(x, 0.0)
    if act == "hardswish":
        return x * jnp.clip(x + 3.0, 0.0, 6.0) * (1.0 / 6.0)
    if act == "hardsigmoid":
        return jnp.clip(x + 3.0, 0.0, 6.0) * (1.0 / 6.0)
    raise ValueError(f"unknown act {act}")


# ----------------------------------------------------------------------------
# The single fused kernel: stem -> 3 MobileNet blocks -> efficient head.
# ----------------------------------------------------------------------------
def _mobilenetv3_kernel(xs_ref, w_ref, dww_ref, b_ref,
                        s1_ref, s2_ref, s3_ref,
                        p1_ref, g1_ref, p23_ref, g23_ref,
                        o_ref):
    bf16 = jnp.bfloat16

    def mat(i):                                   # (128,128) bf16 weight tile
        return w_ref[pl.ds(128 * i, 128), :]

    b_all = b_ref[...]                            # (24,128) f32, loaded once
    dww = dww_ref[...]                            # (32,128) f32, loaded once

    def bias(r):
        return b_all[r:r + 1, :]                  # (1,128) f32

    def dwrow(r):
        return dww[r:r + 1, :]                    # (1,128) f32

    def dot(a, b):
        return jnp.dot(a, b, preferred_element_type=jnp.float32)

    # ---- conv_stem (3x3 s2, BN folded) + hardswish ------------------------
    x1 = _act(dot(xs_ref[...], mat(0)) + bias(0), "hardswish")   # (N*64,128) f32
    x1_bf = x1.astype(bf16)

    # ---- generic fused MobileNet block ------------------------------------
    def mb_block(x_bf, *, s_ref, dw_base, exp_i, se_r_i, se_e_i, pw_i,
                 b_exp, b_dw, b_ser, b_see, b_pw, act_name,
                 p_ref, g_ref, residual):
        # optional 1x1 expansion GEMM (+folded BN) + act, fused in
        if exp_i is None:
            y_bf = x_bf
        else:
            y_bf = _act(dot(x_bf, mat(exp_i)) + bias(b_exp),
                        act_name).astype(bf16)
        # depthwise 3x3: 9 taps as constant 0/1 selection matmuls
        acc = dot(s_ref[0], y_bf) * dwrow(dw_base)
        for k in range(1, 9):                     # static unroll
            acc = acc + dot(s_ref[k], y_bf) * dwrow(dw_base + k)
        y = _act(acc + bias(b_dw), act_name)      # (rows,128) f32
        y_bf2 = y.astype(bf16)
        # squeeze-excite: per-sample mean is a block-diagonal pooling matmul
        pooled = dot(p_ref[...], y_bf2)                               # (N,128)
        r = _act(dot(pooled.astype(bf16), mat(se_r_i)) + bias(b_ser), "relu")
        g = _act(dot(r.astype(bf16), mat(se_e_i)) + bias(b_see), "hardsigmoid")
        gate = dot(g_ref[...], g.astype(bf16))                        # (rows,128)
        y = y * gate
        # 1x1 projection (+folded BN) + residual, while the tile is in vregs
        out = dot(y.astype(bf16), mat(pw_i)) + bias(b_pw)
        if residual is not None:
            out = out + residual
        return out

    # block 1: DepthwiseSeparable (dw s1 relu, SE, pw) + residual
    x2 = mb_block(x1_bf, s_ref=s1_ref, dw_base=0, exp_i=None,
                  se_r_i=1, se_e_i=2, pw_i=3,
                  b_exp=None, b_dw=1, b_ser=2, b_see=3, b_pw=4,
                  act_name="relu", p_ref=p1_ref, g_ref=g1_ref, residual=x1)
    x2_bf = x2.astype(bf16)

    # block 2: InvertedResidual (exp hswish, dw s2 hswish, SE, proj)
    x3 = mb_block(x2_bf, s_ref=s2_ref, dw_base=9, exp_i=4,
                  se_r_i=5, se_e_i=6, pw_i=7,
                  b_exp=5, b_dw=6, b_ser=7, b_see=8, b_pw=9,
                  act_name="hardswish", p_ref=p23_ref, g_ref=g23_ref,
                  residual=None)
    x3_bf = x3.astype(bf16)

    # block 3: InvertedResidual (exp hswish, dw s1 hswish, SE, proj) + residual
    x4 = mb_block(x3_bf, s_ref=s3_ref, dw_base=18, exp_i=8,
                  se_r_i=9, se_e_i=10, pw_i=11,
                  b_exp=10, b_dw=11, b_ser=12, b_see=13, b_pw=14,
                  act_name="hardswish", p_ref=p23_ref, g_ref=g23_ref,
                  residual=x3)

    # efficient head: global avg pool -> conv_head(+bias) -> hardswish -> cls
    pooled = dot(p23_ref[...], x4.astype(bf16))                       # (N,128)
    feat = _act(dot(pooled.astype(bf16), mat(12)) + bias(15), "hardswish")
    logits = dot(feat.astype(bf16), mat(13)) + bias(16)
    o_ref[...] = logits.astype(o_ref.dtype)


# ----------------------------------------------------------------------------
# pallas_call wrapper: one launch for the whole network.
# ----------------------------------------------------------------------------
def fused_net(xs, pp):
    args = (xs, pp["wslab"], pp["dww"], pp["bias"],
            pp["s1"], pp["s2"], pp["s3"],
            pp["p1"], pp["g1"], pp["p23"], pp["g23"])

    def full_spec(a):
        nd = a.ndim
        return pl.BlockSpec(a.shape, lambda i: (0,) * nd)

    n = pp["p1"].shape[0]
    return pl.pallas_call(
        _mobilenetv3_kernel,
        out_shape=jax.ShapeDtypeStruct((n, CPAD), jnp.float32),
        grid=(1,),
        in_specs=[full_spec(a) for a in args],
        out_specs=pl.BlockSpec((n, CPAD), lambda i: (0, 0)),
        compiler_params=pltpu.CompilerParams(
            dimension_semantics=("arbitrary",)),
    )(*args)


# ----------------------------------------------------------------------------
# Plain-JAX glue: stem im2col (tiny: 4 input channels, done once in XLA).
# ----------------------------------------------------------------------------
def _im2col_gemm(x_nhwc, kh, kw, stride, pad):
    """Regular conv as GEMM: returns (N*Ho*Wo, kh*kw*C), Ho, Wo."""
    N, H, W, C = x_nhwc.shape
    xp = jnp.pad(x_nhwc, ((0, 0), (pad, pad), (pad, pad), (0, 0)))
    Ho = (H + 2 * pad - kh) // stride + 1
    Wo = (W + 2 * pad - kw) // stride + 1
    cols = []
    for i in range(kh):
        for j in range(kw):
            cols.append(xp[:, i:i + Ho * stride:stride, j:j + Wo * stride:stride, :])
    p = jnp.stack(cols, axis=3)                       # (N, Ho, Wo, KT, C)
    return p.reshape(N * Ho * Wo, kh * kw * C), Ho, Wo


# ----------------------------------------------------------------------------
# Constant matrices: depthwise tap selectors, SE pooling / gate broadcast.
# Built with numpy at trace time; exact in bf16 (0/1 and power-of-two means).
# ----------------------------------------------------------------------------
def _dw_tap_selectors(H, W, stride, n):
    """9 x (n*Ho*Wo, n*H*W) 0/1 matrices for a 3x3, pad=1 depthwise conv."""
    Ho = (H + 2 - 3) // stride + 1
    Wo = (W + 2 - 3) // stride + 1
    taps = []
    for di in range(3):
        for dj in range(3):
            S = np.zeros((Ho * Wo, H * W), np.float32)
            for ho in range(Ho):
                hi = stride * ho + di - 1
                if not (0 <= hi < H):
                    continue
                for wo in range(Wo):
                    wi = stride * wo + dj - 1
                    if 0 <= wi < W:
                        S[ho * Wo + wo, hi * W + wi] = 1.0
            taps.append(np.kron(np.eye(n, dtype=np.float32), S))
    return np.stack(taps)                              # (9, n*Ho*Wo, n*H*W)


def _pool_bcast(n, hw):
    P = np.kron(np.eye(n, dtype=np.float32),
                np.full((1, hw), 1.0 / hw, np.float32))   # (n, n*hw)
    G = np.kron(np.eye(n, dtype=np.float32),
                np.ones((hw, 1), np.float32))             # (n*hw, n)
    return P, G


def build_constants(n=2, h=16, w=16):
    h1 = (h + 2 - 3) // 2 + 1                 # stem output spatial (8)
    w1 = (w + 2 - 3) // 2 + 1
    h2 = (h1 + 2 - 3) // 2 + 1                # after block-2 stride 2 (4)
    w2 = (w1 + 2 - 3) // 2 + 1
    s1 = _dw_tap_selectors(h1, w1, 1, n)      # (9, n*64, n*64)
    s2 = _dw_tap_selectors(h1, w1, 2, n)      # (9, n*16, n*64)
    s3 = _dw_tap_selectors(h2, w2, 1, n)      # (9, n*16, n*16)
    p1, g1 = _pool_bcast(n, h1 * w1)
    p23, g23 = _pool_bcast(n, h2 * w2)
    bf = lambda a: jnp.asarray(a, dtype=jnp.bfloat16)
    return {"s1": bf(s1), "s2": bf(s2), "s3": bf(s3),
            "p1": bf(p1), "g1": bf(g1), "p23": bf(p23), "g23": bf(g23)}


# ----------------------------------------------------------------------------
# Parameter construction (deterministic, synthetic) + trace-time preparation
# (BN folding into weights, padding to 128 lanes, packing into slabs, bf16).
# ----------------------------------------------------------------------------
def build_params(key):
    state = {"key": key}

    def nrm(shape, scale=0.1):
        state["key"], sub = jax.random.split(state["key"])
        return scale * jax.random.normal(sub, shape, dtype=jnp.float32)

    def bn_fold(c):
        gamma = 1.0 + nrm((c,), 0.05)
        beta = nrm((c,), 0.05)
        mean = nrm((c,), 0.05)
        var = 1.0 + jnp.abs(nrm((c,), 0.1))
        inv = gamma / jnp.sqrt(var + 1e-5)
        return inv, beta - mean * inv

    p = {}
    # stem: 3x3 s2 conv, in=4 -> 16
    p["stem_w"] = nrm((3, 3, 4, 16))
    p["stem_s"], p["stem_b"] = bn_fold(16)

    # block 1: depthwise-separable (dw3x3 s1 relu, SE, pw 16->16), residual
    p["b1_dw_w"] = nrm((3, 3, 16))
    p["b1_dw_s"], p["b1_dw_b"] = bn_fold(16)
    p["b1_se_wr"], p["b1_se_br"] = nrm((16, 8)), nrm((8,), 0.05)
    p["b1_se_we"], p["b1_se_be"] = nrm((8, 16)), nrm((16,), 0.05)
    p["b1_pw_w"] = nrm((16, 16))
    p["b1_pw_s"], p["b1_pw_b"] = bn_fold(16)

    # block 2: inverted residual (exp 16->64 hswish, dw3x3 s2 hswish, SE, proj 64->24)
    p["b2_exp_w"] = nrm((16, 64))
    p["b2_exp_s"], p["b2_exp_b"] = bn_fold(64)
    p["b2_dw_w"] = nrm((3, 3, 64))
    p["b2_dw_s"], p["b2_dw_b"] = bn_fold(64)
    p["b2_se_wr"], p["b2_se_br"] = nrm((64, 16)), nrm((16,), 0.05)
    p["b2_se_we"], p["b2_se_be"] = nrm((16, 64)), nrm((64,), 0.05)
    p["b2_pw_w"] = nrm((64, 24))
    p["b2_pw_s"], p["b2_pw_b"] = bn_fold(24)

    # block 3: inverted residual (exp 24->72, dw3x3 s1, SE, proj 72->24), residual
    p["b3_exp_w"] = nrm((24, 72))
    p["b3_exp_s"], p["b3_exp_b"] = bn_fold(72)
    p["b3_dw_w"] = nrm((3, 3, 72))
    p["b3_dw_s"], p["b3_dw_b"] = bn_fold(72)
    p["b3_se_wr"], p["b3_se_br"] = nrm((72, 24)), nrm((24,), 0.05)
    p["b3_se_we"], p["b3_se_be"] = nrm((24, 72)), nrm((72,), 0.05)
    p["b3_pw_w"] = nrm((72, 24))
    p["b3_pw_s"], p["b3_pw_b"] = bn_fold(24)

    # efficient head: conv_head 1x1 (24 -> 64, bias), classifier (64 -> 10)
    p["head_w"], p["head_b"] = nrm((24, 64)), nrm((64,), 0.05)
    p["cls_w"], p["cls_b"] = nrm((64, 10)), nrm((10,), 0.05)
    return p


def prepare_params(p):
    """BN-fold, pad to 128 lanes, pack everything into three slabs."""
    def pad_mat(w):
        r, c = w.shape
        return jnp.pad(w, ((0, CPAD - r), (0, CPAD - c)))

    def pad_vec(b):
        return jnp.pad(b, (0, CPAD - b.shape[0]))

    # 14 x (128,128) weight tiles (order must match _mobilenetv3_kernel.mat).
    stem_w = (p["stem_w"] * p["stem_s"][None, None, None, :]).reshape(36, 16)
    tiles = [
        pad_mat(stem_w),                                     # 0  stem (folded)
        pad_mat(p["b1_se_wr"]), pad_mat(p["b1_se_we"]),      # 1,2
        pad_mat(p["b1_pw_w"] * p["b1_pw_s"][None, :]),       # 3  (folded)
        pad_mat(p["b2_exp_w"] * p["b2_exp_s"][None, :]),     # 4  (folded)
        pad_mat(p["b2_se_wr"]), pad_mat(p["b2_se_we"]),      # 5,6
        pad_mat(p["b2_pw_w"] * p["b2_pw_s"][None, :]),       # 7  (folded)
        pad_mat(p["b3_exp_w"] * p["b3_exp_s"][None, :]),     # 8  (folded)
        pad_mat(p["b3_se_wr"]), pad_mat(p["b3_se_we"]),      # 9,10
        pad_mat(p["b3_pw_w"] * p["b3_pw_s"][None, :]),       # 11 (folded)
        pad_mat(p["head_w"]), pad_mat(p["cls_w"]),           # 12,13
    ]
    wslab = jnp.concatenate(tiles, axis=0).astype(jnp.bfloat16)   # (1792,128)

    # depthwise weights (BN-folded), one f32 slab: rows 0-8 / 9-17 / 18-26
    def dw_rows(wdw, s):
        kh, kw, c = wdw.shape
        wf = (wdw * s[None, None, :]).reshape(kh * kw, c)
        return jnp.pad(wf, ((0, 0), (0, CPAD - c)))
    dww = jnp.concatenate(
        [dw_rows(p["b1_dw_w"], p["b1_dw_s"]),
         dw_rows(p["b2_dw_w"], p["b2_dw_s"]),
         dw_rows(p["b3_dw_w"], p["b3_dw_s"]),
         jnp.zeros((5, CPAD), jnp.float32)], axis=0).astype(jnp.float32)

    # bias slab, one row per op (order must match _mobilenetv3_kernel.bias)
    rows = [p["stem_b"],
            p["b1_dw_b"], p["b1_se_br"], p["b1_se_be"], p["b1_pw_b"],
            p["b2_exp_b"], p["b2_dw_b"], p["b2_se_br"], p["b2_se_be"], p["b2_pw_b"],
            p["b3_exp_b"], p["b3_dw_b"], p["b3_se_br"], p["b3_se_be"], p["b3_pw_b"],
            p["head_b"], p["cls_b"]]
    bias = jnp.stack([pad_vec(b) for b in rows], axis=0)
    bias = jnp.pad(bias, ((0, 24 - bias.shape[0]), (0, 0))).astype(jnp.float32)

    return {"wslab": wslab, "dww": dww, "bias": bias}


# ----------------------------------------------------------------------------
# Full forward pass (ONE pallas_call)
# ----------------------------------------------------------------------------
def mobilenetv3_forward(x_nchw, pp):
    # NCHW (PyTorch) -> NHWC, bf16 activations
    x = jnp.transpose(x_nchw, (0, 2, 3, 1)).astype(jnp.bfloat16)
    # Stem im2col in XLA (input has only 4 channels -> 32 KB; the depthwise
    # im2cols are handled in-kernel via constant tap-selection matmuls).
    xm, _, _ = _im2col_gemm(x, 3, 3, 2, 1)            # (N*Ho*Wo, 36)
    xm = jnp.pad(xm, ((0, 0), (0, CPAD - xm.shape[1])))
    logits = fused_net(xm, pp)                        # (N, 128) f32
    return logits[:, :NUM_CLASSES]


if __name__ == "__main__":
    key = jax.random.PRNGKey(0)
    k_params, k_x = jax.random.split(key)
    params = prepare_params(build_params(k_params))
    params.update(build_constants(n=2, h=16, w=16))
    x = jax.random.normal(k_x, (2, 4, 16, 16), dtype=jnp.float32)  # NCHW like PyTorch

    fwd = jax.jit(lambda inp: mobilenetv3_forward(inp, params))
    logits = fwd(x)
    jax.block_until_ready(logits)
    assert logits.shape == (2, NUM_CLASSES), logits.shape
    assert bool(jnp.all(jnp.isfinite(logits)))
    print("KERNEL_OK")
</pallas_src>

<mosaic_0001>
module attributes {stable_mosaic.version = 11 : i64} {
  func.func @_mobilenetv3_kernel(%arg0: i32, %arg1: memref<128x128xbf16, #tpu.memory_space<vmem>>, %arg2: memref<1792x128xbf16, #tpu.memory_space<vmem>>, %arg3: memref<32x128xf32, #tpu.memory_space<vmem>>, %arg4: memref<24x128xf32, #tpu.memory_space<vmem>>, %arg5: memref<9x128x128xbf16, #tpu.memory_space<vmem>>, %arg6: memref<9x32x128xbf16, #tpu.memory_space<vmem>>, %arg7: memref<9x32x32xbf16, #tpu.memory_space<vmem>>, %arg8: memref<2x128xbf16, #tpu.memory_space<vmem>>, %arg9: memref<128x2xbf16, #tpu.memory_space<vmem>>, %arg10: memref<2x32xbf16, #tpu.memory_space<vmem>>, %arg11: memref<32x2xbf16, #tpu.memory_space<vmem>>, %arg12: memref<2x128xf32, #tpu.memory_space<vmem>>) attributes {dimension_semantics = [#tpu.dimension_semantics<arbitrary>], iteration_bounds = array<i64: 1>, scalar_prefetch = 0 : i64, scratch_operands = 0 : i64, tpu.core_type = #tpu.core_type<tc>, window_params = [{pipeline_mode = #tpu.pipeline_mode<synchronous>, transform_indices = @transform_0, window_bounds = array<i64: 128, 128>}, {pipeline_mode = #tpu.pipeline_mode<synchronous>, transform_indices = @transform_1, window_bounds = array<i64: 1792, 128>}, {pipeline_mode = #tpu.pipeline_mode<synchronous>, transform_indices = @transform_2, window_bounds = array<i64: 32, 128>}, {pipeline_mode = #tpu.pipeline_mode<synchronous>, transform_indices = @transform_3, window_bounds = array<i64: 24, 128>}, {pipeline_mode = #tpu.pipeline_mode<synchronous>, transform_indices = @transform_4, window_bounds = array<i64: 9, 128, 128>}, {pipeline_mode = #tpu.pipeline_mode<synchronous>, transform_indices = @transform_5, window_bounds = array<i64: 9, 32, 128>}, {pipeline_mode = #tpu.pipeline_mode<synchronous>, transform_indices = @transform_6, window_bounds = array<i64: 9, 32, 32>}, {pipeline_mode = #tpu.pipeline_mode<synchronous>, transform_indices = @transform_7, window_bounds = array<i64: 2, 128>}, {pipeline_mode = #tpu.pipeline_mode<synchronous>, transform_indices = @transform_8, window_bounds = array<i64: 128, 2>}, {pipeline_mode = #tpu.pipeline_mode<synchronous>, transform_indices = @transform_9, window_bounds = array<i64: 2, 32>}, {pipeline_mode = #tpu.pipeline_mode<synchronous>, transform_indices = @transform_10, window_bounds = array<i64: 32, 2>}, {pipeline_mode = #tpu.pipeline_mode<synchronous>, transform_indices = @transform_11, window_bounds = array<i64: 2, 128>}]} {
    %c0 = arith.constant 0 : index
    %c0_0 = arith.constant 0 : index
    %0 = vector.load %arg4[%c0, %c0_0] : memref<24x128xf32, #tpu.memory_space<vmem>>, vector<24x128xf32>
    %c0_1 = arith.constant 0 : index
    %c0_2 = arith.constant 0 : index
    %1 = vector.load %arg3[%c0_1, %c0_2] : memref<32x128xf32, #tpu.memory_space<vmem>>, vector<32x128xf32>
    %c0_3 = arith.constant 0 : index
    %c0_4 = arith.constant 0 : index
    %2 = vector.load %arg1[%c0_3, %c0_4] : memref<128x128xbf16, #tpu.memory_space<vmem>>, vector<128x128xbf16>
    %c0_5 = arith.constant 0 : index
    %c0_6 = arith.constant 0 : index
    %3 = vector.load %arg2[%c0_5, %c0_6] : memref<1792x128xbf16, #tpu.memory_space<vmem>>, vector<128x128xbf16>
    %cst = arith.constant dense<0.000000e+00> : vector<128x128xf32>
    %4 = tpu.matmul %2, %3, %cst {dimension_numbers = #tpu.dot_dimension_numbers<[1], [0], [0], [1], [0, 0, 1, 1], [], []>} : vector<128x128xbf16>, vector<128x128xbf16>, vector<128x128xf32> -> vector<128x128xf32>
    %5 = vector.extract_strided_slice %0 {offsets = [0, 0], sizes = [1, 128], strides = [1, 1]} : vector<24x128xf32> to vector<1x128xf32>
    %6 = vector.broadcast %5 : vector<1x128xf32> to vector<128x128xf32>
    %7 = arith.addf %4, %6 : vector<128x128xf32>
    %cst_7 = arith.constant 3.000000e+00 : f32
    %8 = vector.broadcast %cst_7 : f32 to vector<128x128xf32>
    %9 = arith.addf %7, %8 : vector<128x128xf32>
    %cst_8 = arith.constant 0.000000e+00 : f32
    %cst_9 = arith.constant 6.000000e+00 : f32
    %10 = vector.broadcast %cst_8 : f32 to vector<128x128xf32>
    %11 = arith.maximumf %10, %9 : vector<128x128xf32>
    %12 = vector.broadcast %cst_9 : f32 to vector<128x128xf32>
    %13 = arith.minimumf %12, %11 : vector<128x128xf32>
    %14 = arith.mulf %7, %13 : vector<128x128xf32>
    %cst_10 = arith.constant 0.166666672 : f32
    %15 = vector.broadcast %cst_10 : f32 to vector<128x128xf32>
    %16 = arith.mulf %14, %15 : vector<128x128xf32>
    %17 = arith.truncf %16 : vector<128x128xf32> to vector<128x128xbf16>
    %c0_11 = arith.constant 0 : index
    %c0_12 = arith.constant 0 : index
    %c0_13 = arith.constant 0 : index
    %18 = vector.load %arg5[%c0_11, %c0_12, %c0_13] : memref<9x128x128xbf16, #tpu.memory_space<vmem>>, vector<1x128x128xbf16>
    %19 = vector.shape_cast %18 : vector<1x128x128xbf16> to vector<128x128xbf16>
    %cst_14 = arith.constant dense<0.000000e+00> : vector<128x128xf32>
    %20 = tpu.matmul %19, %17, %cst_14 {dimension_numbers = #tpu.dot_dimension_numbers<[1], [0], [0], [1], [0, 0, 1, 1], [], []>} : vector<128x128xbf16>, vector<128x128xbf16>, vector<128x128xf32> -> vector<128x128xf32>
    %21 = vector.extract_strided_slice %1 {offsets = [0, 0], sizes = [1, 128], strides = [1, 1]} : vector<32x128xf32> to vector<1x128xf32>
    %22 = vector.broadcast %21 : vector<1x128xf32> to vector<128x128xf32>
    %23 = arith.mulf %20, %22 : vector<128x128xf32>
    %c1 = arith.constant 1 : index
    %c0_15 = arith.constant 0 : index
    %c0_16 = arith.constant 0 : index
    %24 = vector.load %arg5[%c1, %c0_15, %c0_16] : memref<9x128x128xbf16, #tpu.memory_space<vmem>>, vector<1x128x128xbf16>
    %25 = vector.shape_cast %24 : vector<1x128x128xbf16> to vector<128x128xbf16>
    %cst_17 = arith.constant dense<0.000000e+00> : vector<128x128xf32>
    %26 = tpu.matmul %25, %17, %cst_17 {dimension_numbers = #tpu.dot_dimension_numbers<[1], [0], [0], [1], [0, 0, 1, 1], [], []>} : vector<128x128xbf16>, vector<128x128xbf16>, vector<128x128xf32> -> vector<128x128xf32>
    %27 = vector.extract_strided_slice %1 {offsets = [1, 0], sizes = [1, 128], strides = [1, 1]} : vector<32x128xf32> to vector<1x128xf32>
    %28 = vector.broadcast %27 : vector<1x128xf32> to vector<128x128xf32>
    %29 = arith.mulf %26, %28 : vector<128x128xf32>
    %30 = arith.addf %23, %29 : vector<128x128xf32>
    %c2 = arith.constant 2 : index
    %c0_18 = arith.constant 0 : index
    %c0_19 = arith.constant 0 : index
    %31 = vector.load %arg5[%c2, %c0_18, %c0_19] : memref<9x128x128xbf16, #tpu.memory_space<vmem>>, vector<1x128x128xbf16>
    %32 = vector.shape_cast %31 : vector<1x128x128xbf16> to vector<128x128xbf16>
    %cst_20 = arith.constant dense<0.000000e+00> : vector<128x128xf32>
    %33 = tpu.matmul %32, %17, %cst_20 {dimension_numbers = #tpu.dot_dimension_numbers<[1], [0], [0], [1], [0, 0, 1, 1], [], []>} : vector<128x128xbf16>, vector<128x128xbf16>, vector<128x128xf32> -> vector<128x128xf32>
    %34 = vector.extract_strided_slice %1 {offsets = [2, 0], sizes = [1, 128], strides = [1, 1]} : vector<32x128xf32> to vector<1x128xf32>
    %35 = vector.broadcast %34 : vector<1x128xf32> to vector<128x128xf32>
    %36 = arith.mulf %33, %35 : vector<128x128xf32>
    %37 = arith.addf %30, %36 : vector<128x128xf32>
    %c3 = arith.constant 3 : index
    %c0_21 = arith.constant 0 : index
    %c0_22 = arith.constant 0 : index
    %38 = vector.load %arg5[%c3, %c0_21, %c0_22] : memref<9x128x128xbf16, #tpu.memory_space<vmem>>, vector<1x128x128xbf16>
    %39 = vector.shape_cast %38 : vector<1x128x128xbf16> to vector<128x128xbf16>
    %cst_23 = arith.constant dense<0.000000e+00> : vector<128x128xf32>
    %40 = tpu.matmul %39, %17, %cst_23 {dimension_numbers = #tpu.dot_dimension_numbers<[1], [0], [0], [1], [0, 0, 1, 1], [], []>} : vector<128x128xbf16>, vector<128x128xbf16>, vector<128x128xf32> -> vector<128x128xf32>
    %41 = vector.extract_strided_slice %1 {offsets = [3, 0], sizes = [1, 128], strides = [1, 1]} : vector<32x128xf32> to vector<1x128xf32>
    %42 = vector.broadcast %41 : vector<1x128xf32> to vector<128x128xf32>
    %43 = arith.mulf %40, %42 : vector<128x128xf32>
    %44 = arith.addf %37, %43 : vector<128x128xf32>
    %c4 = arith.constant 4 : index
    %c0_24 = arith.constant 0 : index
    %c0_25 = arith.constant 0 : index
    %45 = vector.load %arg5[%c4, %c0_24, %c0_25] : memref<9x128x128xbf16, #tpu.memory_space<vmem>>, vector<1x128x128xbf16>
    %46 = vector.shape_cast %45 : vector<1x128x128xbf16> to vector<128x128xbf16>
    %cst_26 = arith.constant dense<0.000000e+00> : vector<128x128xf32>
    %47 = tpu.matmul %46, %17, %cst_26 {dimension_numbers = #tpu.dot_dimension_numbers<[1], [0], [0], [1], [0, 0, 1, 1], [], []>} : vector<128x128xbf16>, vector<128x128xbf16>, vector<128x128xf32> -> vector<128x128xf32>
    %48 = vector.extract_strided_slice %1 {offsets = [4, 0], sizes = [1, 128], strides = [1, 1]} : vector<32x128xf32> to vector<1x128xf32>
    %49 = vector.broadcast %48 : vector<1x128xf32> to vector<128x128xf32>
    %50 = arith.mulf %47, %49 : vector<128x128xf32>
    %51 = arith.addf %44, %50 : vector<128x128xf32>
    %c5 = arith.constant 5 : index
    %c0_27 = arith.constant 0 : index
    %c0_28 = arith.constant 0 : index
    %52 = vector.load %arg5[%c5, %c0_27, %c0_28] : memref<9x128x128xbf16, #tpu.memory_space<vmem>>, vector<1x128x128xbf16>
    %53 = vector.shape_cast %52 : vector<1x128x128xbf16> to vector<128x128xbf16>
    %cst_29 = arith.constant dense<0.000000e+00> : vector<128x128xf32>
    %54 = tpu.matmul %53, %17, %cst_29 {dimension_numbers = #tpu.dot_dimension_numbers<[1], [0], [0], [1], [0, 0, 1, 1], [], []>} : vector<128x128xbf16>, vector<128x128xbf16>, vector<128x128xf32> -> vector<128x128xf32>
    %55 = vector.extract_strided_slice %1 {offsets = [5, 0], sizes = [1, 128], strides = [1, 1]} : vector<32x128xf32> to vector<1x128xf32>
    %56 = vector.broadcast %55 : vector<1x128xf32> to vector<128x128xf32>
    %57 = arith.mulf %54, %56 : vector<128x128xf32>
    %58 = arith.addf %51, %57 : vector<128x128xf32>
    %c6 = arith.constant 6 : index
    %c0_30 = arith.constant 0 : index
    %c0_31 = arith.constant 0 : index
    %59 = vector.load %arg5[%c6, %c0_30, %c0_31] : memref<9x128x128xbf16, #tpu.memory_space<vmem>>, vector<1x128x128xbf16>
    %60 = vector.shape_cast %59 : vector<1x128x128xbf16> to vector<128x128xbf16>
    %cst_32 = arith.constant dense<0.000000e+00> : vector<128x128xf32>
    %61 = tpu.matmul %60, %17, %cst_32 {dimension_numbers = #tpu.dot_dimension_numbers<[1], [0], [0], [1], [0, 0, 1, 1], [], []>} : vector<128x128xbf16>, vector<128x128xbf16>, vector<128x128xf32> -> vector<128x128xf32>
    %62 = vector.extract_strided_slice %1 {offsets = [6, 0], sizes = [1, 128], strides = [1, 1]} : vector<32x128xf32> to vector<1x128xf32>
    %63 = vector.broadcast %62 : vector<1x128xf32> to vector<128x128xf32>
    %64 = arith.mulf %61, %63 : vector<128x128xf32>
    %65 = arith.addf %58, %64 : vector<128x128xf32>
    %c7 = arith.constant 7 : index
    %c0_33 = arith.constant 0 : index
    %c0_34 = arith.constant 0 : index
    %66 = vector.load %arg5[%c7, %c0_33, %c0_34] : memref<9x128x128xbf16, #tpu.memory_space<vmem>>, vector<1x128x128xbf16>
    %67 = vector.shape_cast %66 : vector<1x128x128xbf16> to vector<128x128xbf16>
    %cst_35 = arith.constant dense<0.000000e+00> : vector<128x128xf32>
    %68 = tpu.matmul %67, %17, %cst_35 {dimension_numbers = #tpu.dot_dimension_numbers<[1], [0], [0], [1], [0, 0, 1, 1], [], []>} : vector<128x128xbf16>, vector<128x128xbf16>, vector<128x128xf32> -> vector<128x128xf32>
    %69 = vector.extract_strided_slice %1 {offsets = [7, 0], sizes = [1, 128], strides = [1, 1]} : vector<32x128xf32> to vector<1x128xf32>
    %70 = vector.broadcast %69 : vector<1x128xf32> to vector<128x128xf32>
    %71 = arith.mulf %68, %70 : vector<128x128xf32>
    %72 = arith.addf %65, %71 : vector<128x128xf32>
    %c8 = arith.constant 8 : index
    %c0_36 = arith.constant 0 : index
    %c0_37 = arith.constant 0 : index
    %73 = vector.load %arg5[%c8, %c0_36, %c0_37] : memref<9x128x128xbf16, #tpu.memory_space<vmem>>, vector<1x128x128xbf16>
    %74 = vector.shape_cast %73 : vector<1x128x128xbf16> to vector<128x128xbf16>
    %cst_38 = arith.constant dense<0.000000e+00> : vector<128x128xf32>
    %75 = tpu.matmul %74, %17, %cst_38 {dimension_numbers = #tpu.dot_dimension_numbers<[1], [0], [0], [1], [0, 0, 1, 1], [], []>} : vector<128x128xbf16>, vector<128x128xbf16>, vector<128x128xf32> -> vector<128x128xf32>
    %76 = vector.extract_strided_slice %1 {offsets = [8, 0], sizes = [1, 128], strides = [1, 1]} : vector<32x128xf32> to vector<1x128xf32>
    %77 = vector.broadcast %76 : vector<1x128xf32> to vector<128x128xf32>
    %78 = arith.mulf %75, %77 : vector<128x128xf32>
    %79 = arith.addf %72, %78 : vector<128x128xf32>
    %80 = vector.extract_strided_slice %0 {offsets = [1, 0], sizes = [1, 128], strides = [1, 1]} : vector<24x128xf32> to vector<1x128xf32>
    %81 = vector.broadcast %80 : vector<1x128xf32> to vector<128x128xf32>
    %82 = arith.addf %79, %81 : vector<128x128xf32>
    %cst_39 = arith.constant 0.000000e+00 : f32
    %83 = vector.broadcast %cst_39 : f32 to vector<128x128xf32>
    %84 = arith.maximumf %82, %83 : vector<128x128xf32>
    %85 = arith.truncf %84 : vector<128x128xf32> to vector<128x128xbf16>
    %c0_40 = arith.constant 0 : index
    %c0_41 = arith.constant 0 : index
    %86 = vector.load %arg8[%c0_40, %c0_41] : memref<2x128xbf16, #tpu.memory_space<vmem>>, vector<2x128xbf16>
    %cst_42 = arith.constant dense<0.000000e+00> : vector<2x128xf32>
    %87 = tpu.matmul %86, %85, %cst_42 {dimension_numbers = #tpu.dot_dimension_numbers<[1], [0], [0], [1], [0, 0, 1, 1], [], []>} : vector<2x128xbf16>, vector<128x128xbf16>, vector<2x128xf32> -> vector<2x128xf32>
    %88 = arith.truncf %87 : vector<2x128xf32> to vector<2x128xbf16>
    %c128 = arith.constant 128 : index
    %c0_43 = arith.constant 0 : index
    %89 = vector.load %arg2[%c128, %c0_43] : memref<1792x128xbf16, #tpu.memory_space<vmem>>, vector<128x128xbf16>
    %cst_44 = arith.constant dense<0.000000e+00> : vector<2x128xf32>
    %90 = tpu.matmul %88, %89, %cst_44 {dimension_numbers = #tpu.dot_dimension_numbers<[1], [0], [0], [1], [0, 0, 1, 1], [], []>} : vector<2x128xbf16>, vector<128x128xbf16>, vector<2x128xf32> -> vector<2x128xf32>
    %91 = vector.extract_strided_slice %0 {offsets = [2, 0], sizes = [1, 128], strides = [1, 1]} : vector<24x128xf32> to vector<1x128xf32>
    %92 = vector.broadcast %91 : vector<1x128xf32> to vector<2x128xf32>
    %93 = arith.addf %90, %92 : vector<2x128xf32>
    %cst_45 = arith.constant 0.000000e+00 : f32
    %94 = vector.broadcast %cst_45 : f32 to vector<2x128xf32>
    %95 = arith.maximumf %93, %94 : vector<2x128xf32>
    %96 = arith.truncf %95 : vector<2x128xf32> to vector<2x128xbf16>
    %c256 = arith.constant 256 : index
    %c0_46 = arith.constant 0 : index
    %97 = vector.load %arg2[%c256, %c0_46] : memref<1792x128xbf16, #tpu.memory_space<vmem>>, vector<128x128xbf16>
    %cst_47 = arith.constant dense<0.000000e+00> : vector<2x128xf32>
    %98 = tpu.matmul %96, %97, %cst_47 {dimension_numbers = #tpu.dot_dimension_numbers<[1], [0], [0], [1], [0, 0, 1, 1], [], []>} : vector<2x128xbf16>, vector<128x128xbf16>, vector<2x128xf32> -> vector<2x128xf32>
    %99 = vector.extract_strided_slice %0 {offsets = [3, 0], sizes = [1, 128], strides = [1, 1]} : vector<24x128xf32> to vector<1x128xf32>
    %100 = vector.broadcast %99 : vector<1x128xf32> to vector<2x128xf32>
    %101 = arith.addf %98, %100 : vector<2x128xf32>
    %cst_48 = arith.constant 3.000000e+00 : f32
    %102 = vector.broadcast %cst_48 : f32 to vector<2x128xf32>
    %103 = arith.addf %101, %102 : vector<2x128xf32>
    %cst_49 = arith.constant 0.000000e+00 : f32
    %cst_50 = arith.constant 6.000000e+00 : f32
    %104 = vector.broadcast %cst_49 : f32 to vector<2x128xf32>
    %105 = arith.maximumf %104, %103 : vector<2x128xf32>
    %106 = vector.broadcast %cst_50 : f32 to vector<2x128xf32>
    %107 = arith.minimumf %106, %105 : vector<2x128xf32>
    %cst_51 = arith.constant 0.166666672 : f32
    %108 = vector.broadcast %cst_51 : f32 to vector<2x128xf32>
    %109 = arith.mulf %107, %108 : vector<2x128xf32>
    %c0_52 = arith.constant 0 : index
    %c0_53 = arith.constant 0 : index
    %110 = vector.load %arg9[%c0_52, %c0_53] : memref<128x2xbf16, #tpu.memory_space<vmem>>, vector<128x2xbf16>
    %111 = arith.truncf %109 : vector<2x128xf32> to vector<2x128xbf16>
    %cst_54 = arith.constant dense<0.000000e+00> : vector<128x128xf32>
    %112 = tpu.matmul %110, %111, %cst_54 {dimension_numbers = #tpu.dot_dimension_numbers<[1], [0], [0], [1], [0, 0, 1, 1], [], []>} : vector<128x2xbf16>, vector<2x128xbf16>, vector<128x128xf32> -> vector<128x128xf32>
    %113 = arith.mulf %84, %112 : vector<128x128xf32>
    %114 = arith.truncf %113 : vector<128x128xf32> to vector<128x128xbf16>
    %c384 = arith.constant 384 : index
    %c0_55 = arith.constant 0 : index
    %115 = vector.load %arg2[%c384, %c0_55] : memref<1792x128xbf16, #tpu.memory_space<vmem>>, vector<128x128xbf16>
    %cst_56 = arith.constant dense<0.000000e+00> : vector<128x128xf32>
    %116 = tpu.matmul %114, %115, %cst_56 {dimension_numbers = #tpu.dot_dimension_numbers<[1], [0], [0], [1], [0, 0, 1, 1], [], []>} : vector<128x128xbf16>, vector<128x128xbf16>, vector<128x128xf32> -> vector<128x128xf32>
    %117 = vector.extract_strided_slice %0 {offsets = [4, 0], sizes = [1, 128], strides = [1, 1]} : vector<24x128xf32> to vector<1x128xf32>
    %118 = vector.broadcast %117 : vector<1x128xf32> to vector<128x128xf32>
    %119 = arith.addf %116, %118 : vector<128x128xf32>
    %120 = arith.addf %119, %16 : vector<128x128xf32>
    %121 = arith.truncf %120 : vector<128x128xf32> to vector<128x128xbf16>
    %c512 = arith.constant 512 : index
    %c0_57 = arith.constant 0 : index
    %122 = vector.load %arg2[%c512, %c0_57] : memref<1792x128xbf16, #tpu.memory_space<vmem>>, vector<128x128xbf16>
    %cst_58 = arith.constant dense<0.000000e+00> : vector<128x128xf32>
    %123 = tpu.matmul %121, %122, %cst_58 {dimension_numbers = #tpu.dot_dimension_numbers<[1], [0], [0], [1], [0, 0, 1, 1], [], []>} : vector<128x128xbf16>, vector<128x128xbf16>, vector<128x128xf32> -> vector<128x128xf32>
    %124 = vector.extract_strided_slice %0 {offsets = [5, 0], sizes = [1, 128], strides = [1, 1]} : vector<24x128xf32> to vector<1x128xf32>
    %125 = vector.broadcast %124 : vector<1x128xf32> to vector<128x128xf32>
    %126 = arith.addf %123, %125 : vector<128x128xf32>
    %cst_59 = arith.constant 3.000000e+00 : f32
    %127 = vector.broadcast %cst_59 : f32 to vector<128x128xf32>
    %128 = arith.addf %126, %127 : vector<128x128xf32>
    %cst_60 = arith.constant 0.000000e+00 : f32
    %cst_61 = arith.constant 6.000000e+00 : f32
    %129 = vector.broadcast %cst_60 : f32 to vector<128x128xf32>
    %130 = arith.maximumf %129, %128 : vector<128x128xf32>
    %131 = vector.broadcast %cst_61 : f32 to vector<128x128xf32>
    %132 = arith.minimumf %131, %130 : vector<128x128xf32>
    %133 = arith.mulf %126, %132 : vector<128x128xf32>
    %cst_62 = arith.constant 0.166666672 : f32
    %134 = vector.broadcast %cst_62 : f32 to vector<128x128xf32>
    %135 = arith.mulf %133, %134 : vector<128x128xf32>
    %136 = arith.truncf %135 : vector<128x128xf32> to vector<128x128xbf16>
    %c0_63 = arith.constant 0 : index
    %c0_64 = arith.constant 0 : index
    %c0_65 = arith.constant 0 : index
    %137 = vector.load %arg6[%c0_63, %c0_64, %c0_65] : memref<9x32x128xbf16, #tpu.memory_space<vmem>>, vector<1x32x128xbf16>
    %138 = vector.shape_cast %137 : vector<1x32x128xbf16> to vector<32x128xbf16>
    %cst_66 = arith.constant dense<0.000000e+00> : vector<32x128xf32>
    %139 = tpu.matmul %138, %136, %cst_66 {dimension_numbers = #tpu.dot_dimension_numbers<[1], [0], [0], [1], [0, 0, 1, 1], [], []>} : vector<32x128xbf16>, vector<128x128xbf16>, vector<32x128xf32> -> vector<32x128xf32>
    %140 = vector.extract_strided_slice %1 {offsets = [9, 0], sizes = [1, 128], strides = [1, 1]} : vector<32x128xf32> to vector<1x128xf32>
    %141 = vector.broadcast %140 : vector<1x128xf32> to vector<32x128xf32>
    %142 = arith.mulf %139, %141 : vector<32x128xf32>
    %c1_67 = arith.constant 1 : index
    %c0_68 = arith.constant 0 : index
    %c0_69 = arith.constant 0 : index
    %143 = vector.load %arg6[%c1_67, %c0_68, %c0_69] : memref<9x32x128xbf16, #tpu.memory_space<vmem>>, vector<1x32x128xbf16>
    %144 = vector.shape_cast %143 : vector<1x32x128xbf16> to vector<32x128xbf16>
    %cst_70 = arith.constant dense<0.000000e+00> : vector<32x128xf32>
    %145 = tpu.matmul %144, %136, %cst_70 {dimension_numbers = #tpu.dot_dimension_numbers<[1], [0], [0], [1], [0, 0, 1, 1], [], []>} : vector<32x128xbf16>, vector<128x128xbf16>, vector<32x128xf32> -> vector<32x128xf32>
    %146 = vector.extract_strided_slice %1 {offsets = [10, 0], sizes = [1, 128], strides = [1, 1]} : vector<32x128xf32> to vector<1x128xf32>
    %147 = vector.broadcast %146 : vector<1x128xf32> to vector<32x128xf32>
    %148 = arith.mulf %145, %147 : vector<32x128xf32>
    %149 = arith.addf %142, %148 : vector<32x128xf32>
    %c2_71 = arith.constant 2 : index
    %c0_72 = arith.constant 0 : index
    %c0_73 = arith.constant 0 : index
    %150 = vector.load %arg6[%c2_71, %c0_72, %c0_73] : memref<9x32x128xbf16, #tpu.memory_space<vmem>>, vector<1x32x128xbf16>
    %151 = vector.shape_cast %150 : vector<1x32x128xbf16> to vector<32x128xbf16>
    %cst_74 = arith.constant dense<0.000000e+00> : vector<32x128xf32>
    %152 = tpu.matmul %151, %136, %cst_74 {dimension_numbers = #tpu.dot_dimension_numbers<[1], [0], [0], [1], [0, 0, 1, 1], [], []>} : vector<32x128xbf16>, vector<128x128xbf16>, vector<32x128xf32> -> vector<32x128xf32>
    %153 = vector.extract_strided_slice %1 {offsets = [11, 0], sizes = [1, 128], strides = [1, 1]} : vector<32x128xf32> to vector<1x128xf32>
    %154 = vector.broadcast %153 : vector<1x128xf32> to vector<32x128xf32>
    %155 = arith.mulf %152, %154 : vector<32x128xf32>
    %156 = arith.addf %149, %155 : vector<32x128xf32>
    %c3_75 = arith.constant 3 : index
    %c0_76 = arith.constant 0 : index
    %c0_77 = arith.constant 0 : index
    %157 = vector.load %arg6[%c3_75, %c0_76, %c0_77] : memref<9x32x128xbf16, #tpu.memory_space<vmem>>, vector<1x32x128xbf16>
    %158 = vector.shape_cast %157 : vector<1x32x128xbf16> to vector<32x128xbf16>
    %cst_78 = arith.constant dense<0.000000e+00> : vector<32x128xf32>
    %159 = tpu.matmul %158, %136, %cst_78 {dimension_numbers = #tpu.dot_dimension_numbers<[1], [0], [0], [1], [0, 0, 1, 1], [], []>} : vector<32x128xbf16>, vector<128x128xbf16>, vector<32x128xf32> -> vector<32x128xf32>
    %160 = vector.extract_strided_slice %1 {offsets = [12, 0], sizes = [1, 128], strides = [1, 1]} : vector<32x128xf32> to vector<1x128xf32>
    %161 = vector.broadcast %160 : vector<1x128xf32> to vector<32x128xf32>
    %162 = arith.mulf %159, %161 : vector<32x128xf32>
    %163 = arith.addf %156, %162 : vector<32x128xf32>
    %c4_79 = arith.constant 4 : index
    %c0_80 = arith.constant 0 : index
    %c0_81 = arith.constant 0 : index
    %164 = vector.load %arg6[%c4_79, %c0_80, %c0_81] : memref<9x32x128xbf16, #tpu.memory_space<vmem>>, vector<1x32x128xbf16>
    %165 = vector.shape_cast %164 : vector<1x32x128xbf16> to vector<32x128xbf16>
    %cst_82 = arith.constant dense<0.000000e+00> : vector<32x128xf32>
    %166 = tpu.matmul %165, %136, %cst_82 {dimension_numbers = #tpu.dot_dimension_numbers<[1], [0], [0], [1], [0, 0, 1, 1], [], []>} : vector<32x128xbf16>, vector<128x128xbf16>, vector<32x128xf32> -> vector<32x128xf32>
    %167 = vector.extract_strided_slice %1 {offsets = [13, 0], sizes = [1, 128], strides = [1, 1]} : vector<32x128xf32> to vector<1x128xf32>
    %168 = vector.broadcast %167 : vector<1x128xf32> to vector<32x128xf32>
    %169 = arith.mulf %166, %168 : vector<32x128xf32>
    %170 = arith.addf %163, %169 : vector<32x128xf32>
    %c5_83 = arith.constant 5 : index
    %c0_84 = arith.constant 0 : index
    %c0_85 = arith.constant 0 : index
    %171 = vector.load %arg6[%c5_83, %c0_84, %c0_85] : memref<9x32x128xbf16, #tpu.memory_space<vmem>>, vector<1x32x128xbf16>
    %172 = vector.shape_cast %171 : vector<1x32x128xbf16> to vector<32x128xbf16>
    %cst_86 = arith.constant dense<0.000000e+00> : vector<32x128xf32>
    %173 = tpu.matmul %172, %136, %cst_86 {dimension_numbers = #tpu.dot_dimension_numbers<[1], [0], [0], [1], [0, 0, 1, 1], [], []>} : vector<32x128xbf16>, vector<128x128xbf16>, vector<32x128xf32> -> vector<32x128xf32>
    %174 = vector.extract_strided_slice %1 {offsets = [14, 0], sizes = [1, 128], strides = [1, 1]} : vector<32x128xf32> to vector<1x128xf32>
    %175 = vector.broadcast %174 : vector<1x128xf32> to vector<32x128xf32>
    %176 = arith.mulf %173, %175 : vector<32x128xf32>
    %177 = arith.addf %170, %176 : vector<32x128xf32>
    %c6_87 = arith.constant 6 : index
    %c0_88 = arith.constant 0 : index
    %c0_89 = arith.constant 0 : index
    %178 = vector.load %arg6[%c6_87, %c0_88, %c0_89] : memref<9x32x128xbf16, #tpu.memory_space<vmem>>, vector<1x32x128xbf16>
    %179 = vector.shape_cast %178 : vector<1x32x128xbf16> to vector<32x128xbf16>
    %cst_90 = arith.constant dense<0.000000e+00> : vector<32x128xf32>
    %180 = tpu.matmul %179, %136, %cst_90 {dimension_numbers = #tpu.dot_dimension_numbers<[1], [0], [0], [1], [0, 0, 1, 1], [], []>} : vector<32x128xbf16>, vector<128x128xbf16>, vector<32x128xf32> -> vector<32x128xf32>
    %181 = vector.extract_strided_slice %1 {offsets = [15, 0], sizes = [1, 128], strides = [1, 1]} : vector<32x128xf32> to vector<1x128xf32>
    %182 = vector.broadcast %181 : vector<1x128xf32> to vector<32x128xf32>
    %183 = arith.mulf %180, %182 : vector<32x128xf32>
    %184 = arith.addf %177, %183 : vector<32x128xf32>
    %c7_91 = arith.constant 7 : index
    %c0_92 = arith.constant 0 : index
    %c0_93 = arith.constant 0 : index
    %185 = vector.load %arg6[%c7_91, %c0_92, %c0_93] : memref<9x32x128xbf16, #tpu.memory_space<vmem>>, vector<1x32x128xbf16>
    %186 = vector.shape_cast %185 : vector<1x32x128xbf16> to vector<32x128xbf16>
    %cst_94 = arith.constant dense<0.000000e+00> : vector<32x128xf32>
    %187 = tpu.matmul %186, %136, %cst_94 {dimension_numbers = #tpu.dot_dimension_numbers<[1], [0], [0], [1], [0, 0, 1, 1], [], []>} : vector<32x128xbf16>, vector<128x128xbf16>, vector<32x128xf32> -> vector<32x128xf32>
    %188 = vector.extract_strided_slice %1 {offsets = [16, 0], sizes = [1, 128], strides = [1, 1]} : vector<32x128xf32> to vector<1x128xf32>
    %189 = vector.broadcast %188 : vector<1x128xf32> to vector<32x128xf32>
    %190 = arith.mulf %187, %189 : vector<32x128xf32>
    %191 = arith.addf %184, %190 : vector<32x128xf32>
    %c8_95 = arith.constant 8 : index
    %c0_96 = arith.constant 0 : index
    %c0_97 = arith.constant 0 : index
    %192 = vector.load %arg6[%c8_95, %c0_96, %c0_97] : memref<9x32x128xbf16, #tpu.memory_space<vmem>>, vector<1x32x128xbf16>
    %193 = vector.shape_cast %192 : vector<1x32x128xbf16> to vector<32x128xbf16>
    %cst_98 = arith.constant dense<0.000000e+00> : vector<32x128xf32>
    %194 = tpu.matmul %193, %136, %cst_98 {dimension_numbers = #tpu.dot_dimension_numbers<[1], [0], [0], [1], [0, 0, 1, 1], [], []>} : vector<32x128xbf16>, vector<128x128xbf16>, vector<32x128xf32> -> vector<32x128xf32>
    %195 = vector.extract_strided_slice %1 {offsets = [17, 0], sizes = [1, 128], strides = [1, 1]} : vector<32x128xf32> to vector<1x128xf32>
    %196 = vector.broadcast %195 : vector<1x128xf32> to vector<32x128xf32>
    %197 = arith.mulf %194, %196 : vector<32x128xf32>
    %198 = arith.addf %191, %197 : vector<32x128xf32>
    %199 = vector.extract_strided_slice %0 {offsets = [6, 0], sizes = [1, 128], strides = [1, 1]} : vector<24x128xf32> to vector<1x128xf32>
    %200 = vector.broadcast %199 : vector<1x128xf32> to vector<32x128xf32>
    %201 = arith.addf %198, %200 : vector<32x128xf32>
    %cst_99 = arith.constant 3.000000e+00 : f32
    %202 = vector.broadcast %cst_99 : f32 to vector<32x128xf32>
    %203 = arith.addf %201, %202 : vector<32x128xf32>
    %cst_100 = arith.constant 0.000000e+00 : f32
    %cst_101 = arith.constant 6.000000e+00 : f32
    %204 = vector.broadcast %cst_100 : f32 to vector<32x128xf32>
    %205 = arith.maximumf %204, %203 : vector<32x128xf32>
    %206 = vector.broadcast %cst_101 : f32 to vector<32x128xf32>
    %207 = arith.minimumf %206, %205 : vector<32x128xf32>
    %208 = arith.mulf %201, %207 : vector<32x128xf32>
    %cst_102 = arith.constant 0.166666672 : f32
    %209 = vector.broadcast %cst_102 : f32 to vector<32x128xf32>
    %210 = arith.mulf %208, %209 : vector<32x128xf32>
    %211 = arith.truncf %210 : vector<32x128xf32> to vector<32x128xbf16>
    %c0_103 = arith.constant 0 : index
    %c0_104 = arith.constant 0 : index
    %212 = vector.load %arg10[%c0_103, %c0_104] : memref<2x32xbf16, #tpu.memory_space<vmem>>, vector<2x32xbf16>
    %cst_105 = arith.constant dense<0.000000e+00> : vector<2x128xf32>
    %213 = tpu.matmul %212, %211, %cst_105 {dimension_numbers = #tpu.dot_dimension_numbers<[1], [0], [0], [1], [0, 0, 1, 1], [], []>} : vector<2x32xbf16>, vector<32x128xbf16>, vector<2x128xf32> -> vector<2x128xf32>
    %214 = arith.truncf %213 : vector<2x128xf32> to vector<2x128xbf16>
    %c640 = arith.constant 640 : index
    %c0_106 = arith.constant 0 : index
    %215 = vector.load %arg2[%c640, %c0_106] : memref<1792x128xbf16, #tpu.memory_space<vmem>>, vector<128x128xbf16>
    %cst_107 = arith.constant dense<0.000000e+00> : vector<2x128xf32>
    %216 = tpu.matmul %214, %215, %cst_107 {dimension_numbers = #tpu.dot_dimension_numbers<[1], [0], [0], [1], [0, 0, 1, 1], [], []>} : vector<2x128xbf16>, vector<128x128xbf16>, vector<2x128xf32> -> vector<2x128xf32>
    %217 = vector.extract_strided_slice %0 {offsets = [7, 0], sizes = [1, 128], strides = [1, 1]} : vector<24x128xf32> to vector<1x128xf32>
    %218 = vector.broadcast %217 : vector<1x128xf32> to vector<2x128xf32>
    %219 = arith.addf %216, %218 : vector<2x128xf32>
    %cst_108 = arith.constant 0.000000e+00 : f32
    %220 = vector.broadcast %cst_108 : f32 to vector<2x128xf32>
    %221 = arith.maximumf %219, %220 : vector<2x128xf32>
    %222 = arith.truncf %221 : vector<2x128xf32> to vector<2x128xbf16>
    %c768 = arith.constant 768 : index
    %c0_109 = arith.constant 0 : index
    %223 = vector.load %arg2[%c768, %c0_109] : memref<1792x128xbf16, #tpu.memory_space<vmem>>, vector<128x128xbf16>
    %cst_110 = arith.constant dense<0.000000e+00> : vector<2x128xf32>
    %224 = tpu.matmul %222, %223, %cst_110 {dimension_numbers = #tpu.dot_dimension_numbers<[1], [0], [0], [1], [0, 0, 1, 1], [], []>} : vector<2x128xbf16>, vector<128x128xbf16>, vector<2x128xf32> -> vector<2x128xf32>
    %225 = vector.extract_strided_slice %0 {offsets = [8, 0], sizes = [1, 128], strides = [1, 1]} : vector<24x128xf32> to vector<1x128xf32>
    %226 = vector.broadcast %225 : vector<1x128xf32> to vector<2x128xf32>
    %227 = arith.addf %224, %226 : vector<2x128xf32>
    %cst_111 = arith.constant 3.000000e+00 : f32
    %228 = vector.broadcast %cst_111 : f32 to vector<2x128xf32>
    %229 = arith.addf %227, %228 : vector<2x128xf32>
    %cst_112 = arith.constant 0.000000e+00 : f32
    %cst_113 = arith.constant 6.000000e+00 : f32
    %230 = vector.broadcast %cst_112 : f32 to vector<2x128xf32>
    %231 = arith.maximumf %230, %229 : vector<2x128xf32>
    %232 = vector.broadcast %cst_113 : f32 to vector<2x128xf32>
    %233 = arith.minimumf %232, %231 : vector<2x128xf32>
    %cst_114 = arith.constant 0.166666672 : f32
    %234 = vector.broadcast %cst_114 : f32 to vector<2x128xf32>
    %235 = arith.mulf %233, %234 : vector<2x128xf32>
    %c0_115 = arith.constant 0 : index
    %c0_116 = arith.constant 0 : index
    %236 = vector.load %arg11[%c0_115, %c0_116] : memref<32x2xbf16, #tpu.memory_space<vmem>>, vector<32x2xbf16>
    %237 = arith.truncf %235 : vector<2x128xf32> to vector<2x128xbf16>
    %cst_117 = arith.constant dense<0.000000e+00> : vector<32x128xf32>
    %238 = tpu.matmul %236, %237, %cst_117 {dimension_numbers = #tpu.dot_dimension_numbers<[1], [0], [0], [1], [0, 0, 1, 1], [], []>} : vector<32x2xbf16>, vector<2x128xbf16>, vector<32x128xf32> -> vector<32x128xf32>
    %239 = arith.mulf %210, %238 : vector<32x128xf32>
    %240 = arith.truncf %239 : vector<32x128xf32> to vector<32x128xbf16>
    %c896 = arith.constant 896 : index
    %c0_118 = arith.constant 0 : index
    %241 = vector.load %arg2[%c896, %c0_118] : memref<1792x128xbf16, #tpu.memory_space<vmem>>, vector<128x128xbf16>
    %cst_119 = arith.constant dense<0.000000e+00> : vector<32x128xf32>
    %242 = tpu.matmul %240, %241, %cst_119 {dimension_numbers = #tpu.dot_dimension_numbers<[1], [0], [0], [1], [0, 0, 1, 1], [], []>} : vector<32x128xbf16>, vector<128x128xbf16>, vector<32x128xf32> -> vector<32x128xf32>
    %243 = vector.extract_strided_slice %0 {offsets = [9, 0], sizes = [1, 128], strides = [1, 1]} : vector<24x128xf32> to vector<1x128xf32>
    %244 = vector.broadcast %243 : vector<1x128xf32> to vector<32x128xf32>
    %245 = arith.addf %242, %244 : vector<32x128xf32>
    %246 = arith.truncf %245 : vector<32x128xf32> to vector<32x128xbf16>
    %c1024 = arith.constant 1024 : index
    %c0_120 = arith.constant 0 : index
    %247 = vector.load %arg2[%c1024, %c0_120] : memref<1792x128xbf16, #tpu.memory_space<vmem>>, vector<128x128xbf16>
    %cst_121 = arith.constant dense<0.000000e+00> : vector<32x128xf32>
    %248 = tpu.matmul %246, %247, %cst_121 {dimension_numbers = #tpu.dot_dimension_numbers<[1], [0], [0], [1], [0, 0, 1, 1], [], []>} : vector<32x128xbf16>, vector<128x128xbf16>, vector<32x128xf32> -> vector<32x128xf32>
    %249 = vector.extract_strided_slice %0 {offsets = [10, 0], sizes = [1, 128], strides = [1, 1]} : vector<24x128xf32> to vector<1x128xf32>
    %250 = vector.broadcast %249 : vector<1x128xf32> to vector<32x128xf32>
    %251 = arith.addf %248, %250 : vector<32x128xf32>
    %cst_122 = arith.constant 3.000000e+00 : f32
    %252 = vector.broadcast %cst_122 : f32 to vector<32x128xf32>
    %253 = arith.addf %251, %252 : vector<32x128xf32>
    %cst_123 = arith.constant 0.000000e+00 : f32
    %cst_124 = arith.constant 6.000000e+00 : f32
    %254 = vector.broadcast %cst_123 : f32 to vector<32x128xf32>
    %255 = arith.maximumf %254, %253 : vector<32x128xf32>
    %256 = vector.broadcast %cst_124 : f32 to vector<32x128xf32>
    %257 = arith.minimumf %256, %255 : vector<32x128xf32>
    %258 = arith.mulf %251, %257 : vector<32x128xf32>
    %cst_125 = arith.constant 0.166666672 : f32
    %259 = vector.broadcast %cst_125 : f32 to vector<32x128xf32>
    %260 = arith.mulf %258, %259 : vector<32x128xf32>
    %261 = arith.truncf %260 : vector<32x128xf32> to vector<32x128xbf16>
    %c0_126 = arith.constant 0 : index
    %c0_127 = arith.constant 0 : index
    %c0_128 = arith.constant 0 : index
    %262 = vector.load %arg7[%c0_126, %c0_127, %c0_128] : memref<9x32x32xbf16, #tpu.memory_space<vmem>>, vector<1x32x32xbf16>
    %263 = vector.shape_cast %262 : vector<1x32x32xbf16> to vector<32x32xbf16>
    %cst_129 = arith.constant dense<0.000000e+00> : vector<32x128xf32>
    %264 = tpu.matmul %263, %261, %cst_129 {dimension_numbers = #tpu.dot_dimension_numbers<[1], [0], [0], [1], [0, 0, 1, 1], [], []>} : vector<32x32xbf16>, vector<32x128xbf16>, vector<32x128xf32> -> vector<32x128xf32>
    %265 = vector.extract_strided_slice %1 {offsets = [18, 0], sizes = [1, 128], strides = [1, 1]} : vector<32x128xf32> to vector<1x128xf32>
    %266 = vector.broadcast %265 : vector<1x128xf32> to vector<32x128xf32>
    %267 = arith.mulf %264, %266 : vector<32x128xf32>
    %c1_130 = arith.constant 1 : index
    %c0_131 = arith.constant 0 : index
    %c0_132 = arith.constant 0 : index
    %268 = vector.load %arg7[%c1_130, %c0_131, %c0_132] : memref<9x32x32xbf16, #tpu.memory_space<vmem>>, vector<1x32x32xbf16>
    %269 = vector.shape_cast %268 : vector<1x32x32xbf16> to vector<32x32xbf16>
    %cst_133 = arith.constant dense<0.000000e+00> : vector<32x128xf32>
    %270 = tpu.matmul %269, %261, %cst_133 {dimension_numbers = #tpu.dot_dimension_numbers<[1], [0], [0], [1], [0, 0, 1, 1], [], []>} : vector<32x32xbf16>, vector<32x128xbf16>, vector<32x128xf32> -> vector<32x128xf32>
    %271 = vector.extract_strided_slice %1 {offsets = [19, 0], sizes = [1, 128], strides = [1, 1]} : vector<32x128xf32> to vector<1x128xf32>
    %272 = vector.broadcast %271 : vector<1x128xf32> to vector<32x128xf32>
    %273 = arith.mulf %270, %272 : vector<32x128xf32>
    %274 = arith.addf %267, %273 : vector<32x128xf32>
    %c2_134 = arith.constant 2 : index
    %c0_135 = arith.constant 0 : index
    %c0_136 = arith.constant 0 : index
    %275 = vector.load %arg7[%c2_134, %c0_135, %c0_136] : memref<9x32x32xbf16, #tpu.memory_space<vmem>>, vector<1x32x32xbf16>
    %276 = vector.shape_cast %275 : vector<1x32x32xbf16> to vector<32x32xbf16>
    %cst_137 = arith.constant dense<0.000000e+00> : vector<32x128xf32>
    %277 = tpu.matmul %276, %261, %cst_137 {dimension_numbers = #tpu.dot_dimension_numbers<[1], [0], [0], [1], [0, 0, 1, 1], [], []>} : vector<32x32xbf16>, vector<32x128xbf16>, vector<32x128xf32> -> vector<32x128xf32>
    %278 = vector.extract_strided_slice %1 {offsets = [20, 0], sizes = [1, 128], strides = [1, 1]} : vector<32x128xf32> to vector<1x128xf32>
    %279 = vector.broadcast %278 : vector<1x128xf32> to vector<32x128xf32>
    %280 = arith.mulf %277, %279 : vector<32x128xf32>
    %281 = arith.addf %274, %280 : vector<32x128xf32>
    %c3_138 = arith.constant 3 : index
    %c0_139 = arith.constant 0 : index
    %c0_140 = arith.constant 0 : index
    %282 = vector.load %arg7[%c3_138, %c0_139, %c0_140] : memref<9x32x32xbf16, #tpu.memory_space<vmem>>, vector<1x32x32xbf16>
    %283 = vector.shape_cast %282 : vector<1x32x32xbf16> to vector<32x32xbf16>
    %cst_141 = arith.constant dense<0.000000e+00> : vector<32x128xf32>
    %284 = tpu.matmul %283, %261, %cst_141 {dimension_numbers = #tpu.dot_dimension_numbers<[1], [0], [0], [1], [0, 0, 1, 1], [], []>} : vector<32x32xbf16>, vector<32x128xbf16>, vector<32x128xf32> -> vector<32x128xf32>
    %285 = vector.extract_strided_slice %1 {offsets = [21, 0], sizes = [1, 128], strides = [1, 1]} : vector<32x128xf32> to vector<1x128xf32>
    %286 = vector.broadcast %285 : vector<1x128xf32> to vector<32x128xf32>
    %287 = arith.mulf %284, %286 : vector<32x128xf32>
    %288 = arith.addf %281, %287 : vector<32x128xf32>
    %c4_142 = arith.constant 4 : index
    %c0_143 = arith.constant 0 : index
    %c0_144 = arith.constant 0 : index
    %289 = vector.load %arg7[%c4_142, %c0_143, %c0_144] : memref<9x32x32xbf16, #tpu.memory_space<vmem>>, vector<1x32x32xbf16>
    %290 = vector.shape_cast %289 : vector<1x32x32xbf16> to vector<32x32xbf16>
    %cst_145 = arith.constant dense<0.000000e+00> : vector<32x128xf32>
    %291 = tpu.matmul %290, %261, %cst_145 {dimension_numbers = #tpu.dot_dimension_numbers<[1], [0], [0], [1], [0, 0, 1, 1], [], []>} : vector<32x32xbf16>, vector<32x128xbf16>, vector<32x128xf32> -> vector<32x128xf32>
    %292 = vector.extract_strided_slice %1 {offsets = [22, 0], sizes = [1, 128], strides = [1, 1]} : vector<32x128xf32> to vector<1x128xf32>
    %293 = vector.broadcast %292 : vector<1x128xf32> to vector<32x128xf32>
    %294 = arith.mulf %291, %293 : vector<32x128xf32>
    %295 = arith.addf %288, %294 : vector<32x128xf32>
    %c5_146 = arith.constant 5 : index
    %c0_147 = arith.constant 0 : index
    %c0_148 = arith.constant 0 : index
    %296 = vector.load %arg7[%c5_146, %c0_147, %c0_148] : memref<9x32x32xbf16, #tpu.memory_space<vmem>>, vector<1x32x32xbf16>
    %297 = vector.shape_cast %296 : vector<1x32x32xbf16> to vector<32x32xbf16>
    %cst_149 = arith.constant dense<0.000000e+00> : vector<32x128xf32>
    %298 = tpu.matmul %297, %261, %cst_149 {dimension_numbers = #tpu.dot_dimension_numbers<[1], [0], [0], [1], [0, 0, 1, 1], [], []>} : vector<32x32xbf16>, vector<32x128xbf16>, vector<32x128xf32> -> vector<32x128xf32>
    %299 = vector.extract_strided_slice %1 {offsets = [23, 0], sizes = [1, 128], strides = [1, 1]} : vector<32x128xf32> to vector<1x128xf32>
    %300 = vector.broadcast %299 : vector<1x128xf32> to vector<32x128xf32>
    %301 = arith.mulf %298, %300 : vector<32x128xf32>
    %302 = arith.addf %295, %301 : vector<32x128xf32>
    %c6_150 = arith.constant 6 : index
    %c0_151 = arith.constant 0 : index
    %c0_152 = arith.constant 0 : index
    %303 = vector.load %arg7[%c6_150, %c0_151, %c0_152] : memref<9x32x32xbf16, #tpu.memory_space<vmem>>, vector<1x32x32xbf16>
    %304 = vector.shape_cast %303 : vector<1x32x32xbf16> to vector<32x32xbf16>
    %cst_153 = arith.constant dense<0.000000e+00> : vector<32x128xf32>
    %305 = tpu.matmul %304, %261, %cst_153 {dimension_numbers = #tpu.dot_dimension_numbers<[1], [0], [0], [1], [0, 0, 1, 1], [], []>} : vector<32x32xbf16>, vector<32x128xbf16>, vector<32x128xf32> -> vector<32x128xf32>
    %306 = vector.extract_strided_slice %1 {offsets = [24, 0], sizes = [1, 128], strides = [1, 1]} : vector<32x128xf32> to vector<1x128xf32>
    %307 = vector.broadcast %306 : vector<1x128xf32> to vector<32x128xf32>
    %308 = arith.mulf %305, %307 : vector<32x128xf32>
    %309 = arith.addf %302, %308 : vector<32x128xf32>
    %c7_154 = arith.constant 7 : index
    %c0_155 = arith.constant 0 : index
    %c0_156 = arith.constant 0 : index
    %310 = vector.load %arg7[%c7_154, %c0_155, %c0_156] : memref<9x32x32xbf16, #tpu.memory_space<vmem>>, vector<1x32x32xbf16>
    %311 = vector.shape_cast %310 : vector<1x32x32xbf16> to vector<32x32xbf16>
    %cst_157 = arith.constant dense<0.000000e+00> : vector<32x128xf32>
    %312 = tpu.matmul %311, %261, %cst_157 {dimension_numbers = #tpu.dot_dimension_numbers<[1], [0], [0], [1], [0, 0, 1, 1], [], []>} : vector<32x32xbf16>, vector<32x128xbf16>, vector<32x128xf32> -> vector<32x128xf32>
    %313 = vector.extract_strided_slice %1 {offsets = [25, 0], sizes = [1, 128], strides = [1, 1]} : vector<32x128xf32> to vector<1x128xf32>
    %314 = vector.broadcast %313 : vector<1x128xf32> to vector<32x128xf32>
    %315 = arith.mulf %312, %314 : vector<32x128xf32>
    %316 = arith.addf %309, %315 : vector<32x128xf32>
    %c8_158 = arith.constant 8 : index
    %c0_159 = arith.constant 0 : index
    %c0_160 = arith.constant 0 : index
    %317 = vector.load %arg7[%c8_158, %c0_159, %c0_160] : memref<9x32x32xbf16, #tpu.memory_space<vmem>>, vector<1x32x32xbf16>
    %318 = vector.shape_cast %317 : vector<1x32x32xbf16> to vector<32x32xbf16>
    %cst_161 = arith.constant dense<0.000000e+00> : vector<32x128xf32>
    %319 = tpu.matmul %318, %261, %cst_161 {dimension_numbers = #tpu.dot_dimension_numbers<[1], [0], [0], [1], [0, 0, 1, 1], [], []>} : vector<32x32xbf16>, vector<32x128xbf16>, vector<32x128xf32> -> vector<32x128xf32>
    %320 = vector.extract_strided_slice %1 {offsets = [26, 0], sizes = [1, 128], strides = [1, 1]} : vector<32x128xf32> to vector<1x128xf32>
    %321 = vector.broadcast %320 : vector<1x128xf32> to vector<32x128xf32>
    %322 = arith.mulf %319, %321 : vector<32x128xf32>
    %323 = arith.addf %316, %322 : vector<32x128xf32>
    %324 = vector.extract_strided_slice %0 {offsets = [11, 0], sizes = [1, 128], strides = [1, 1]} : vector<24x128xf32> to vector<1x128xf32>
    %325 = vector.broadcast %324 : vector<1x128xf32> to vector<32x128xf32>
    %326 = arith.addf %323, %325 : vector<32x128xf32>
    %cst_162 = arith.constant 3.000000e+00 : f32
    %327 = vector.broadcast %cst_162 : f32 to vector<32x128xf32>
    %328 = arith.addf %326, %327 : vector<32x128xf32>
    %cst_163 = arith.constant 0.000000e+00 : f32
    %cst_164 = arith.constant 6.000000e+00 : f32
    %329 = vector.broadcast %cst_163 : f32 to vector<32x128xf32>
    %330 = arith.maximumf %329, %328 : vector<32x128xf32>
    %331 = vector.broadcast %cst_164 : f32 to vector<32x128xf32>
    %332 = arith.minimumf %331, %330 : vector<32x128xf32>
    %333 = arith.mulf %326, %332 : vector<32x128xf32>
    %cst_165 = arith.constant 0.166666672 : f32
    %334 = vector.broadcast %cst_165 : f32 to vector<32x128xf32>
    %335 = arith.mulf %333, %334 : vector<32x128xf32>
    %336 = arith.truncf %335 : vector<32x128xf32> to vector<32x128xbf16>
    %c0_166 = arith.constant 0 : index
    %c0_167 = arith.constant 0 : index
    %337 = vector.load %arg10[%c0_166, %c0_167] : memref<2x32xbf16, #tpu.memory_space<vmem>>, vector<2x32xbf16>
    %cst_168 = arith.constant dense<0.000000e+00> : vector<2x128xf32>
    %338 = tpu.matmul %337, %336, %cst_168 {dimension_numbers = #tpu.dot_dimension_numbers<[1], [0], [0], [1], [0, 0, 1, 1], [], []>} : vector<2x32xbf16>, vector<32x128xbf16>, vector<2x128xf32> -> vector<2x128xf32>
    %339 = arith.truncf %338 : vector<2x128xf32> to vector<2x128xbf16>
    %c1152 = arith.constant 1152 : index
    %c0_169 = arith.constant 0 : index
    %340 = vector.load %arg2[%c1152, %c0_169] : memref<1792x128xbf16, #tpu.memory_space<vmem>>, vector<128x128xbf16>
    %cst_170 = arith.constant dense<0.000000e+00> : vector<2x128xf32>
    %341 = tpu.matmul %339, %340, %cst_170 {dimension_numbers = #tpu.dot_dimension_numbers<[1], [0], [0], [1], [0, 0, 1, 1], [], []>} : vector<2x128xbf16>, vector<128x128xbf16>, vector<2x128xf32> -> vector<2x128xf32>
    %342 = vector.extract_strided_slice %0 {offsets = [12, 0], sizes = [1, 128], strides = [1, 1]} : vector<24x128xf32> to vector<1x128xf32>
    %343 = vector.broadcast %342 : vector<1x128xf32> to vector<2x128xf32>
    %344 = arith.addf %341, %343 : vector<2x128xf32>
    %cst_171 = arith.constant 0.000000e+00 : f32
    %345 = vector.broadcast %cst_171 : f32 to vector<2x128xf32>
    %346 = arith.maximumf %344, %345 : vector<2x128xf32>
    %347 = arith.truncf %346 : vector<2x128xf32> to vector<2x128xbf16>
    %c1280 = arith.constant 1280 : index
    %c0_172 = arith.constant 0 : index
    %348 = vector.load %arg2[%c1280, %c0_172] : memref<1792x128xbf16, #tpu.memory_space<vmem>>, vector<128x128xbf16>
    %cst_173 = arith.constant dense<0.000000e+00> : vector<2x128xf32>
    %349 = tpu.matmul %347, %348, %cst_173 {dimension_numbers = #tpu.dot_dimension_numbers<[1], [0], [0], [1], [0, 0, 1, 1], [], []>} : vector<2x128xbf16>, vector<128x128xbf16>, vector<2x128xf32> -> vector<2x128xf32>
    %350 = vector.extract_strided_slice %0 {offsets = [13, 0], sizes = [1, 128], strides = [1, 1]} : vector<24x128xf32> to vector<1x128xf32>
    %351 = vector.broadcast %350 : vector<1x128xf32> to vector<2x128xf32>
    %352 = arith.addf %349, %351 : vector<2x128xf32>
    %cst_174 = arith.constant 3.000000e+00 : f32
    %353 = vector.broadcast %cst_174 : f32 to vector<2x128xf32>
    %354 = arith.addf %352, %353 : vector<2x128xf32>
    %cst_175 = arith.constant 0.000000e+00 : f32
    %cst_176 = arith.constant 6.000000e+00 : f32
    %355 = vector.broadcast %cst_175 : f32 to vector<2x128xf32>
    %356 = arith.maximumf %355, %354 : vector<2x128xf32>
    %357 = vector.broadcast %cst_176 : f32 to vector<2x128xf32>
    %358 = arith.minimumf %357, %356 : vector<2x128xf32>
    %cst_177 = arith.constant 0.166666672 : f32
    %359 = vector.broadcast %cst_177 : f32 to vector<2x128xf32>
    %360 = arith.mulf %358, %359 : vector<2x128xf32>
    %c0_178 = arith.constant 0 : index
    %c0_179 = arith.constant 0 : index
    %361 = vector.load %arg11[%c0_178, %c0_179] : memref<32x2xbf16, #tpu.memory_space<vmem>>, vector<32x2xbf16>
    %362 = arith.truncf %360 : vector<2x128xf32> to vector<2x128xbf16>
    %cst_180 = arith.constant dense<0.000000e+00> : vector<32x128xf32>
    %363 = tpu.matmul %361, %362, %cst_180 {dimension_numbers = #tpu.dot_dimension_numbers<[1], [0], [0], [1], [0, 0, 1, 1], [], []>} : vector<32x2xbf16>, vector<2x128xbf16>, vector<32x128xf32> -> vector<32x128xf32>
    %364 = arith.mulf %335, %363 : vector<32x128xf32>
    %365 = arith.truncf %364 : vector<32x128xf32> to vector<32x128xbf16>
    %c1408 = arith.constant 1408 : index
    %c0_181 = arith.constant 0 : index
    %366 = vector.load %arg2[%c1408, %c0_181] : memref<1792x128xbf16, #tpu.memory_space<vmem>>, vector<128x128xbf16>
    %cst_182 = arith.constant dense<0.000000e+00> : vector<32x128xf32>
    %367 = tpu.matmul %365, %366, %cst_182 {dimension_numbers = #tpu.dot_dimension_numbers<[1], [0], [0], [1], [0, 0, 1, 1], [], []>} : vector<32x128xbf16>, vector<128x128xbf16>, vector<32x128xf32> -> vector<32x128xf32>
    %368 = vector.extract_strided_slice %0 {offsets = [14, 0], sizes = [1, 128], strides = [1, 1]} : vector<24x128xf32> to vector<1x128xf32>
    %369 = vector.broadcast %368 : vector<1x128xf32> to vector<32x128xf32>
    %370 = arith.addf %367, %369 : vector<32x128xf32>
    %371 = arith.addf %370, %245 : vector<32x128xf32>
    %c0_183 = arith.constant 0 : index
    %c0_184 = arith.constant 0 : index
    %372 = vector.load %arg10[%c0_183, %c0_184] : memref<2x32xbf16, #tpu.memory_space<vmem>>, vector<2x32xbf16>
    %373 = arith.truncf %371 : vector<32x128xf32> to vector<32x128xbf16>
    %cst_185 = arith.constant dense<0.000000e+00> : vector<2x128xf32>
    %374 = tpu.matmul %372, %373, %cst_185 {dimension_numbers = #tpu.dot_dimension_numbers<[1], [0], [0], [1], [0, 0, 1, 1], [], []>} : vector<2x32xbf16>, vector<32x128xbf16>, vector<2x128xf32> -> vector<2x128xf32>
    %375 = arith.truncf %374 : vector<2x128xf32> to vector<2x128xbf16>
    %c1536 = arith.constant 1536 : index
    %c0_186 = arith.constant 0 : index
    %376 = vector.load %arg2[%c1536, %c0_186] : memref<1792x128xbf16, #tpu.memory_space<vmem>>, vector<128x128xbf16>
    %cst_187 = arith.constant dense<0.000000e+00> : vector<2x128xf32>
    %377 = tpu.matmul %375, %376, %cst_187 {dimension_numbers = #tpu.dot_dimension_numbers<[1], [0], [0], [1], [0, 0, 1, 1], [], []>} : vector<2x128xbf16>, vector<128x128xbf16>, vector<2x128xf32> -> vector<2x128xf32>
    %378 = vector.extract_strided_slice %0 {offsets = [15, 0], sizes = [1, 128], strides = [1, 1]} : vector<24x128xf32> to vector<1x128xf32>
    %379 = vector.broadcast %378 : vector<1x128xf32> to vector<2x128xf32>
    %380 = arith.addf %377, %379 : vector<2x128xf32>
    %cst_188 = arith.constant 3.000000e+00 : f32
    %381 = vector.broadcast %cst_188 : f32 to vector<2x128xf32>
    %382 = arith.addf %380, %381 : vector<2x128xf32>
    %cst_189 = arith.constant 0.000000e+00 : f32
    %cst_190 = arith.constant 6.000000e+00 : f32
    %383 = vector.broadcast %cst_189 : f32 to vector<2x128xf32>
    %384 = arith.maximumf %383, %382 : vector<2x128xf32>
    %385 = vector.broadcast %cst_190 : f32 to vector<2x128xf32>
    %386 = arith.minimumf %385, %384 : vector<2x128xf32>
    %387 = arith.mulf %380, %386 : vector<2x128xf32>
    %cst_191 = arith.constant 0.166666672 : f32
    %388 = vector.broadcast %cst_191 : f32 to vector<2x128xf32>
    %389 = arith.mulf %387, %388 : vector<2x128xf32>
    %390 = arith.truncf %389 : vector<2x128xf32> to vector<2x128xbf16>
    %c1664 = arith.constant 1664 : index
    %c0_192 = arith.constant 0 : index
    %391 = vector.load %arg2[%c1664, %c0_192] : memref<1792x128xbf16, #tpu.memory_space<vmem>>, vector<128x128xbf16>
    %cst_193 = arith.constant dense<0.000000e+00> : vector<2x128xf32>
    %392 = tpu.matmul %390, %391, %cst_193 {dimension_numbers = #tpu.dot_dimension_numbers<[1], [0], [0], [1], [0, 0, 1, 1], [], []>} : vector<2x128xbf16>, vector<128x128xbf16>, vector<2x128xf32> -> vector<2x128xf32>
    %393 = vector.extract_strided_slice %0 {offsets = [16, 0], sizes = [1, 128], strides = [1, 1]} : vector<24x128xf32> to vector<1x128xf32>
    %394 = vector.broadcast %393 : vector<1x128xf32> to vector<2x128xf32>
    %395 = arith.addf %392, %394 : vector<2x128xf32>
    %c0_194 = arith.constant 0 : index
    %c0_195 = arith.constant 0 : index
    %396 = vector.load %arg12[%c0_194, %c0_195] : memref<2x128xf32, #tpu.memory_space<vmem>>, vector<2x128xf32>
    tpu.vector_store %arg12[%c0_194, %c0_195], %395 {strides = array<i32>} : memref<2x128xf32, #tpu.memory_space<vmem>>, vector<2x128xf32>,
    return
  }
  func.func @transform_0(%arg0: i32) -> (i32, i32) {
    %c0_i32 = arith.constant 0 : i32
    %c0_i32_0 = arith.constant 0 : i32
    %c0_i32_1 = arith.constant 0 : i32
    return %c0_i32, %c0_i32_0 : i32, i32
  }
  func.func @transform_1(%arg0: i32) -> (i32, i32) {
    %c0_i32 = arith.constant 0 : i32
    %c0_i32_0 = arith.constant 0 : i32
    %c0_i32_1 = arith.constant 0 : i32
    return %c0_i32, %c0_i32_0 : i32, i32
  }
  func.func @transform_2(%arg0: i32) -> (i32, i32) {
    %c0_i32 = arith.constant 0 : i32
    %c0_i32_0 = arith.constant 0 : i32
    %c0_i32_1 = arith.constant 0 : i32
    return %c0_i32, %c0_i32_0 : i32, i32
  }
  func.func @transform_3(%arg0: i32) -> (i32, i32) {
    %c0_i32 = arith.constant 0 : i32
    %c0_i32_0 = arith.constant 0 : i32
    %c0_i32_1 = arith.constant 0 : i32
    return %c0_i32, %c0_i32_0 : i32, i32
  }
  func.func @transform_4(%arg0: i32) -> (i32, i32, i32) {
    %c0_i32 = arith.constant 0 : i32
    %c0_i32_0 = arith.constant 0 : i32
    %c0_i32_1 = arith.constant 0 : i32
    %c0_i32_2 = arith.constant 0 : i32
    return %c0_i32, %c0_i32_0, %c0_i32_1 : i32, i32, i32
  }
  func.func @transform_5(%arg0: i32) -> (i32, i32, i32) {
    %c0_i32 = arith.constant 0 : i32
    %c0_i32_0 = arith.constant 0 : i32
    %c0_i32_1 = arith.constant 0 : i32
    %c0_i32_2 = arith.constant 0 : i32
    return %c0_i32, %c0_i32_0, %c0_i32_1 : i32, i32, i32
  }
  func.func @transform_6(%arg0: i32) -> (i32, i32, i32) {
    %c0_i32 = arith.constant 0 : i32
    %c0_i32_0 = arith.constant 0 : i32
    %c0_i32_1 = arith.constant 0 : i32
    %c0_i32_2 = arith.constant 0 : i32
    return %c0_i32, %c0_i32_0, %c0_i32_1 : i32, i32, i32
  }
  func.func @transform_7(%arg0: i32) -> (i32, i32) {
    %c0_i32 = arith.constant 0 : i32
    %c0_i32_0 = arith.constant 0 : i32
    %c0_i32_1 = arith.constant 0 : i32
    return %c0_i32, %c0_i32_0 : i32, i32
  }
  func.func @transform_8(%arg0: i32) -> (i32, i32) {
    %c0_i32 = arith.constant 0 : i32
    %c0_i32_0 = arith.constant 0 : i32
    %c0_i32_1 = arith.constant 0 : i32
    return %c0_i32, %c0_i32_0 : i32, i32
  }
  func.func @transform_9(%arg0: i32) -> (i32, i32) {
    %c0_i32 = arith.constant 0 : i32
    %c0_i32_0 = arith.constant 0 : i32
    %c0_i32_1 = arith.constant 0 : i32
    return %c0_i32, %c0_i32_0 : i32, i32
  }
  func.func @transform_10(%arg0: i32) -> (i32, i32) {
    %c0_i32 = arith.constant 0 : i32
    %c0_i32_0 = arith.constant 0 : i32
    %c0_i32_1 = arith.constant 0 : i32
    return %c0_i32, %c0_i32_0 : i32, i32
  }
  func.func @transform_11(%arg0: i32) -> (i32, i32) {
    %c0_i32 = arith.constant 0 : i32
    %c0_i32_0 = arith.constant 0 : i32
    %c0_i32_1 = arith.constant 0 : i32
    return %c0_i32, %c0_i32_0 : i32, i32
  }
}

</mosaic_0001>

<bundles_post_ra>
// kernel: _lambda_.1
= control target key start
LH: loop header
LB: loop body
LE: loop exit
PB: predicated region body
PF: predicated region fallthrough
CT: control target
= control target key end

     0   :  { %s10118_s0 = inlined_call_operand.vmem [shape: bf16[128,128], index: 0, kind: input, shape index: {}]   ;;  %s10119_s1 = inlined_call_operand.vmem [shape: bf16[1792,128], index: 1, kind: input, shape index: {}]   ;;  %s10120_s2 = inlined_call_operand.vmem [shape: f32[32,128], index: 2, kind: input, shape index: {}]   ;;  %s10121_s3 = inlined_call_operand.vmem [shape: f32[24,128], index: 3, kind: input, shape index: {}]   ;;  %s10122_s4 = inlined_call_operand.vmem [shape: bf16[9,128,128], index: 4, kind: input, shape index: {}]   ;;  %s10123_s5 = inlined_call_operand.vmem [shape: bf16[9,32,128], index: 5, kind: input, shape index: {}]   ;;  %s10124_s6 = inlined_call_operand.vmem [shape: bf16[9,32,32], index: 6, kind: input, shape index: {}]   ;;  %s10125_s7 = inlined_call_operand.vmem [shape: bf16[2,128], index: 7, kind: input, shape index: {}]   ;;  %s10126_s8 = inlined_call_operand.vmem [shape: bf16[128,2], index: 8, kind: input, shape index: {}]   ;;  %s10127_s9 = inlined_call_operand.vmem [shape: bf16[2,32], index: 9, kind: input, shape index: {}]   ;;  %s10128_s10 = inlined_call_operand.vmem [shape: bf16[32,2], index: 10, kind: input, shape index: {}]   ;;  %s10129_s11 = inlined_call_operand.hbm [shape: f32[2,128], index: 11, kind: output, shape index: {}]  }
   0x1   :  { %v7756_v0 = vld [vmem:[%s10119_s1] sm:$0xff]   ;;  %v7757_v1 = vld [vmem:[%s10119_s1 + $0x8] sm:$0xff]   ;;  %v7758_v2 = vld [vmem:[%s10119_s1 + $0x10] sm:$0xff]  }
   0x2   :  { %6820 = vmatprep.subr.bf16.mxu0 %v7756_v0  ;;  %v7759_v3 = vld [vmem:[%s10119_s1 + $0x18] sm:$0xff]   ;;  %v7764_v4 = vld [vmem:[%s10118_s0] sm:$0xff]   ;;  %v7761_v6 = vld [vmem:[%s10119_s1 + $0x28] sm:$0xff]  }
   0x3   :  { %6821 = vmatpush3.bf16.msra.mxu0 %v7756_v0  ;;  %6836 = vmatprep.mubr.bf16.mxu0 %v7764_v4  ;;  %v7760_v5 = vld [vmem:[%s10119_s1 + $0x20] sm:$0xff]   ;;  %v7762_v7 = vld [vmem:[%s10119_s1 + $0x30] sm:$0xff]   ;;  %v7763_v8 = vld [vmem:[%s10119_s1 + $0x38] sm:$0xff]  }
   0x4   :  { %6822 = vmatprep.subr.bf16.mxu0 %v7757_v1  ;;  %v7765_v9 = vld [vmem:[%s10118_s0 + $0x8] sm:$0xff]   ;;  %v7766_v10 = vld [vmem:[%s10118_s0 + $0x10] sm:$0xff]   ;;  %v7767_v11 = vld [vmem:[%s10118_s0 + $0x18] sm:$0xff]  }
   0x5   :  { %v7768_v12 = vld [vmem:[%s10118_s0 + $0x20] sm:$0xff]   ;;  %v7769_v13 = vld [vmem:[%s10118_s0 + $0x28] sm:$0xff]   ;;  %v7770_v14 = vld [vmem:[%s10118_s0 + $0x30] sm:$0xff]  }
   0x6   :  { %v7771_v15 = vld [vmem:[%s10118_s0 + $0x38] sm:$0xff]   ;;  %v7772_v16 = vld [vmem:[%s10122_s4] sm:$0xff]  }
   0x7   :  { %6823 = vmatpush3.bf16.msra.mxu0 %v7757_v1  ;;  %v7773_v17 = vld [vmem:[%s10122_s4 + $0x40] sm:$0xff]  }
   0x8   :  { %6824 = vmatprep.subr.bf16.mxu0 %v7758_v2 }
   0xb   :  { %6825 = vmatpush3.bf16.msra.mxu0 %v7758_v2 }
   0xc   :  { %6826 = vmatprep.subr.bf16.mxu0 %v7759_v3 }
   0xf   :  { %6827 = vmatpush3.bf16.msra.mxu0 %v7759_v3 }
  0x10   :  { %6828 = vmatprep.subr.bf16.mxu0 %v7760_v5 }
  0x13   :  { %6829 = vmatpush3.bf16.msra.mxu0 %v7760_v5 }
  0x14   :  { %6830 = vmatprep.subr.bf16.mxu0 %v7761_v6 }
  0x17   :  { %6831 = vmatpush3.bf16.msra.mxu0 %v7761_v6 }
  0x18   :  { %6832 = vmatprep.subr.bf16.mxu0 %v7762_v7 }
  0x1b   :  { %6833 = vmatpush3.bf16.msra.mxu0 %v7762_v7 }
  0x1c   :  { %6834 = vmatprep.subr.bf16.mxu0 %v7763_v8 }
  0x1f   :  { %6835 = vmatpush3.bf16.msra.mxu0 %v7763_v8 }
  0x22   :  { %6837 = vmatmul.mubr.bf16.vlgmr.msra.gmra.mrb[0].mxu0 %v7765_v9 }
  0x23   :  { %6840 = vmatprep.mubr.bf16.mxu0 %v7766_v10 }
  0x2a   :  { %6841 = vmatmul.mubr.bf16.gmra.mrb[4].mxu0 %v7767_v11 }
  0x2b   :  { %6844 = vmatprep.mubr.bf16.mxu0 %v7768_v12 }
  0x32   :  { %6845 = vmatmul.mubr.bf16.gmra.mrb[8].mxu0 %v7769_v13 }
  0x33   :  { %6848 = vmatprep.mubr.bf16.mxu0 %v7770_v14 }
  0x3a   :  { %6849 = vmatmul.mubr.bf16.gmra.mrb[12].mxu0 %v7771_v15 }
  0x3b   :  { %16 = vsyncpa [#allocation3], 0  ;;  %6868 = vmatprep.mubr.bf16.mxu1 %v7772_v16  ;;  %6900 = vmatprep.mubr.bf16.mxu0 %v7773_v17  ;;  %v79_v18 = vlaneseq  ;;  %v40_v21 = vld [vmem:[%s10121_s3] sm:$0xff]  ;;  %vm8024_vm0 = vmmov 0   ;;  %vm2494_vm1 = vcmask 15360   ;;  %vm2519_vm2 = vcmask 1040384  }
  0x3c   :  { %vm3814_vm3 = vcmask 261120  }
  0x3d   :  { %v8140_v19 = vshrl.u32 %v79_v18, 7 }
  0x3f   :  { %v8143_v20 = vsub.s32 0, %v8140_v19 }
  0x41   :  { %v8149_v22 = vrot.slane %v40_v21, %v8143_v20 }
  0xf5   :  { %v6838_v23 = vpop.f32.mrb[0].mxu0 }
  0xf6   :  { %v222_v24 = vadd.f32 %v6838_v23, %v8149_v22  ;;  %v213_v25 = vpop.f32.mrb[1].mxu0 }
  0xf7   :  { %v214_v26 = vadd.f32 %v213_v25, %v8149_v22  ;;  %v6839_v27 = vpop.f32.mrb[2].mxu0 }
  0xf8   :  { %v278_v28 = vadd.f32 3.0, %v222_v24  ;;  %v225_v29 = vadd.f32 %v6839_v27, %v8149_v22  ;;  %v216_v30 = vpop.f32.mrb[3].mxu0 }
  0xf9   :  { %v276_v31 = vadd.f32 3.0, %v214_v26  ;;  %v217_v32 = vadd.f32 %v216_v30, %v8149_v22 }
  0xfa   :  { %v294_v33 = vmax.f32 %v278_v28, 0.0  ;;  %v279_v34 = vadd.f32 3.0, %v225_v29 }
  0xfb   :  { %v292_v35 = vmax.f32 %v276_v31, 0.0  ;;  %v277_v36 = vadd.f32 3.0, %v217_v32 }
  0xfc   :  { %v310_v37 = vmin.f32 %v294_v33, 6.0  ;;  %v295_v38 = vmax.f32 %v279_v34, 0.0 }
  0xfd   :  { %v308_v39 = vmin.f32 %v292_v35, 6.0  ;;  %v293_v40 = vmax.f32 %v277_v36, 0.0  ;;  %v6842_v41 = vpop.f32.mrb[4].mxu0 }
  0xfe   :  { %v311_v42 = vmin.f32 %v295_v38, 6.0  ;;  %v238_v43 = vadd.f32 %v6842_v41, %v8149_v22  ;;  %v229_v44 = vpop.f32.mrb[5].mxu0  ;;  %v326_v49 = vmul.f32 %v310_v37, %v222_v24 }
  0xff   :  { %v324_v45 = vmul.f32 %v308_v39, %v214_v26  ;;  %v309_v46 = vmin.f32 %v293_v40, 6.0  ;;  %v230_v47 = vadd.f32 %v229_v44, %v8149_v22  ;;  %v6843_v48 = vpop.f32.mrb[6].mxu0 }
 0x100   :  { %v327_v50 = vmul.f32 %v311_v42, %v225_v29  ;;  %v282_v51 = vadd.f32 3.0, %v238_v43  ;;  %v241_v52 = vadd.f32 %v6843_v48, %v8149_v22  ;;  %v232_v53 = vpop.f32.mrb[7].mxu0  ;;  %v8165_v0 = vmul.f32 0.16666667, %v326_v49 }
 0x101   :  { %v325_v54 = vmul.f32 %v309_v46, %v217_v32  ;;  %v280_v55 = vadd.f32 3.0, %v230_v47  ;;  %v233_v56 = vadd.f32 %v232_v53, %v8149_v22  ;;  %v8159_v57 = vmul.f32 0.16666667, %v324_v45 }
 0x102   :  { %v298_v58 = vmax.f32 %v282_v51, 0.0  ;;  %v283_v59 = vadd.f32 3.0, %v241_v52  ;;  %v8161_v60 = vmul.f32 0.16666667, %v327_v50 }
 0x103   :  { %v8163_v61 = vmul.f32 0.16666667, %v325_v54  ;;  %v296_v62 = vmax.f32 %v280_v55, 0.0  ;;  %v281_v63 = vadd.f32 3.0, %v233_v56 }
 0x104   :  { %v299_v1 = vmax.f32 %v283_v59, 0.0  ;;  %v314_v3 = vmin.f32 %v298_v58, 6.0  ;;  %v8174_v10 = vpack.c.bf16 %v8161_v60, %v8165_v0 }
 0x105   :  { %v8169_v2 = vpack.c.bf16 %v8163_v61, %v8159_v57  ;;  %v312_v4 = vmin.f32 %v296_v62, 6.0  ;;  %v297_v5 = vmax.f32 %v281_v63, 0.0  ;;  %v6846_v6 = vpop.f32.mrb[8].mxu0 }
 0x106   :  { %v315_v7 = vmin.f32 %v299_v1, 6.0  ;;  %v254_v8 = vadd.f32 %v6846_v6, %v8149_v22  ;;  %v245_v9 = vpop.f32.mrb[9].mxu0  ;;  %v330_v21 = vmul.f32 %v314_v3, %v238_v43 }
 0x107   :  { %v328_v11 = vmul.f32 %v312_v4, %v230_v47  ;;  %v313_v12 = vmin.f32 %v297_v5, 6.0  ;;  %v246_v13 = vadd.f32 %v245_v9, %v8149_v22  ;;  %v6847_v14 = vpop.f32.mrb[10].mxu0  ;;  %6852 = vmatprep.subr.bf16.mxu1 %v8169_v2  ;;  %6884 = vmatprep.subr.bf16.mxu0 %v8169_v2 }
 0x108   :  { %v331_v15 = vmul.f32 %v315_v7, %v241_v52  ;;  %v286_v16 = vadd.f32 3.0, %v254_v8  ;;  %v257_v17 = vadd.f32 %v6847_v14, %v8149_v22  ;;  %v248_v18 = vpop.f32.mrb[11].mxu0  ;;  %6853 = vmatpush3.bf16.msra.mxu1 %v8169_v2  ;;  %6885 = vmatpush3.bf16.msra.mxu0 %v8169_v2  ;;  %v8193_v35 = vmul.f32 0.16666667, %v330_v21 }
 0x109   :  { %v329_v23 = vmul.f32 %v313_v12, %v233_v56  ;;  %v284_v24 = vadd.f32 3.0, %v246_v13  ;;  %v249_v25 = vadd.f32 %v248_v18, %v8149_v22  ;;  %6854 = vmatprep.subr.bf16.mxu1 %v8174_v10  ;;  %6886 = vmatprep.subr.bf16.mxu0 %v8174_v10  ;;  %v8185_v26 = vmul.f32 0.16666667, %v328_v11 }
 0x10a   :  { %v302_v27 = vmax.f32 %v286_v16, 0.0  ;;  %v287_v28 = vadd.f32 3.0, %v257_v17  ;;  %v8187_v29 = vmul.f32 0.16666667, %v331_v15 }
 0x10b   :  { %v8189_v30 = vmul.f32 0.16666667, %v329_v23  ;;  %v300_v31 = vmax.f32 %v284_v24, 0.0  ;;  %v285_v32 = vadd.f32 3.0, %v249_v25 }
 0x10c   :  { %v318_v33 = vmin.f32 %v302_v27, 6.0  ;;  %v303_v34 = vmax.f32 %v287_v28, 0.0  ;;  %6855 = vmatpush3.bf16.msra.mxu1 %v8174_v10  ;;  %6887 = vmatpush3.bf16.msra.mxu0 %v8174_v10  ;;  %v8202_v43 = vpack.c.bf16 %v8187_v29, %v8193_v35  ;;  %v7774_v27 = vld [vmem:[%s10122_s4 + $0x8] sm:$0xff]  }
 0x10d   :  { %v8197_v36 = vpack.c.bf16 %v8189_v30, %v8185_v26  ;;  %v316_v37 = vmin.f32 %v300_v31, 6.0  ;;  %v301_v38 = vmax.f32 %v285_v32, 0.0  ;;  %v6850_v39 = vpop.f32.mrb[12].mxu0  ;;  %v7775_v28 = vld [vmem:[%s10122_s4 + $0x48] sm:$0xff]   ;;  %v7776_v31 = vld [vmem:[%s10122_s4 + $0x10] sm:$0xff]  }
 0x10e   :  { %v319_v40 = vmin.f32 %v303_v34, 6.0  ;;  %v270_v41 = vadd.f32 %v6850_v39, %v8149_v22  ;;  %v261_v42 = vpop.f32.mrb[13].mxu0  ;;  %v334_v48 = vmul.f32 %v318_v33, %v254_v8  ;;  %v7777_v32 = vld [vmem:[%s10122_s4 + $0x50] sm:$0xff]   ;;  %v7778_v33 = vld [vmem:[%s10122_s4 + $0x18] sm:$0xff]   ;;  %v7782_v39 = vld [vmem:[%s10122_s4 + $0x28] sm:$0xff]  }
 0x10f   :  { %v332_v44 = vmul.f32 %v316_v37, %v246_v13  ;;  %v317_v45 = vmin.f32 %v301_v38, 6.0  ;;  %v262_v46 = vadd.f32 %v261_v42, %v8149_v22  ;;  %v6851_v47 = vpop.f32.mrb[14].mxu0  ;;  %6856 = vmatprep.subr.bf16.mxu1 %v8197_v36  ;;  %6888 = vmatprep.subr.bf16.mxu0 %v8197_v36  ;;  %v7779_v34 = vld [vmem:[%s10122_s4 + $0x58] sm:$0xff]   ;;  %v7780_v37 = vld [vmem:[%s10122_s4 + $0x20] sm:$0xff]   ;;  %v7785_v42 = vld [vmem:[%s10122_s4 + $0x70] sm:$0xff]  }
 0x110   :  { %v335_v49 = vmul.f32 %v319_v40, %v257_v17  ;;  %v290_v50 = vadd.f32 3.0, %v270_v41  ;;  %v273_v51 = vadd.f32 %v6851_v47, %v8149_v22  ;;  %v264_v52 = vpop.f32.mrb[15].mxu0  ;;  %6857 = vmatpush3.bf16.msra.mxu1 %v8197_v36  ;;  %6889 = vmatpush3.bf16.msra.mxu0 %v8197_v36  ;;  %v8219_v4 = vmul.f32 0.16666667, %v334_v48  ;;  %v7781_v38 = vld [vmem:[%s10122_s4 + $0x60] sm:$0xff]   ;;  %v7783_v40 = vld [vmem:[%s10122_s4 + $0x68] sm:$0xff]  }
 0x111   :  { %v333_v53 = vmul.f32 %v317_v45, %v249_v25  ;;  %v288_v54 = vadd.f32 3.0, %v262_v46  ;;  %v265_v55 = vadd.f32 %v264_v52, %v8149_v22  ;;  %6858 = vmatprep.subr.bf16.mxu1 %v8202_v43  ;;  %6890 = vmatprep.subr.bf16.mxu0 %v8202_v43  ;;  %v8213_v56 = vmul.f32 0.16666667, %v332_v44  ;;  %v7786_v44 = vld [vmem:[%s10122_s4 + $0x38] sm:$0xff]   ;;  %v7790_v47 = vld [vmem:[%s10122_s4 + $0xc0] sm:$0xff]   ;;  %v7789_v48 = vld [vmem:[%s10122_s4 + $0x88] sm:$0xff]  }
 0x112   :  { %v306_v58 = vmax.f32 %v290_v50, 0.0  ;;  %v291_v59 = vadd.f32 3.0, %v273_v51  ;;  %v8215_v62 = vmul.f32 0.16666667, %v335_v49  ;;  %v7787_v45 = vld [vmem:[%s10122_s4 + $0x78] sm:$0xff]   ;;  %v7791_v49 = vld [vmem:[%s10122_s4 + $0xc8] sm:$0xff]  }
 0x113   :  { %v8217_v63 = vmul.f32 0.16666667, %v333_v53  ;;  %v304_v1 = vmax.f32 %v288_v54, 0.0  ;;  %v289_v3 = vadd.f32 3.0, %v265_v55  ;;  %v7792_v50 = vld [vmem:[%s10122_s4 + $0x90] sm:$0xff]   ;;  %v7793_v52 = vld [vmem:[%s10122_s4 + $0x98] sm:$0xff]  }
 0x114   :  { %v307_v5 = vmax.f32 %v291_v59, 0.0  ;;  %6859 = vmatpush3.bf16.msra.mxu1 %v8202_v43  ;;  %6891 = vmatpush3.bf16.msra.mxu0 %v8202_v43  ;;  %v322_v6 = vmin.f32 %v306_v58, 6.0  ;;  %v8229_v11 = vpack.c.bf16 %v8215_v62, %v8219_v4  ;;  %v7795_v53 = vld [vmem:[%s10122_s4 + $0xd8] sm:$0xff]   ;;  %v7796_v54 = vld [vmem:[%s10122_s4 + $0xa0] sm:$0xff]   ;;  %v7797_v58 = vld [vmem:[%s10122_s4 + $0xa8] sm:$0xff]  }
 0x115   :  { %v8225_v22 = vpack.c.bf16 %v8217_v63, %v8213_v56  ;;  %v320_v7 = vmin.f32 %v304_v1, 6.0  ;;  %v305_v8 = vmax.f32 %v289_v3, 0.0  ;;  %v7799_v59 = vld [vmem:[%s10122_s4 + $0xe8] sm:$0xff]   ;;  %v7800_v1 = vld [vmem:[%s10122_s4 + $0xb0] sm:$0xff]  }
 0x116   :  { %v323_v9 = vmin.f32 %v307_v5, 6.0  ;;  %v338_v15 = vmul.f32 %v322_v6, %v270_v41  ;;  %v7784_v41 = vld [vmem:[%s10122_s4 + $0x30] sm:$0xff]   ;;  %v7801_v5 = vld [vmem:[%s10122_s4 + $0xb8] sm:$0xff]  }
 0x117   :  { %v336_v12 = vmul.f32 %v320_v7, %v262_v46  ;;  %v321_v13 = vmin.f32 %v305_v8, 6.0  ;;  %6860 = vmatprep.subr.bf16.mxu1 %v8225_v22  ;;  %6892 = vmatprep.subr.bf16.mxu0 %v8225_v22  ;;  %v7788_v46 = vld [vmem:[%s10122_s4 + $0x80] sm:$0xff]   ;;  %v7802_v3 = vld [vmem:[%s10122_s4 + $0xf0] sm:$0xff]   ;;  %v7803_v6 = vld [vmem:[%s10122_s4 + $0xf8] sm:$0xff]  }
 0x118   :  { %v339_v14 = vmul.f32 %v323_v9, %v273_v51  ;;  %6861 = vmatpush3.bf16.msra.mxu1 %v8225_v22  ;;  %6893 = vmatpush3.bf16.msra.mxu0 %v8225_v22  ;;  %v8245_v23 = vmul.f32 0.16666667, %v338_v15  ;;  %v7794_v51 = vld [vmem:[%s10122_s4 + $0xd0] sm:$0xff]   ;;  %v7804_v7 = vld [vmem:[%s10122_s4 + $0x100] sm:$0xff]   ;;  %v7805_v9 = vld [vmem:[%s10122_s4 + $0x108] sm:$0xff]  }
 0x119   :  { %v337_v16 = vmul.f32 %v321_v13, %v265_v55  ;;  %6862 = vmatprep.subr.bf16.mxu1 %v8229_v11  ;;  %6894 = vmatprep.subr.bf16.mxu0 %v8229_v11  ;;  %v8237_v17 = vmul.f32 0.16666667, %v336_v12  ;;  %v7798_v55 = vld [vmem:[%s10122_s4 + $0xe0] sm:$0xff]   ;;  %v7807_v12 = vld [vmem:[%s10122_s4 + $0x148] sm:$0xff]   ;;  %v7808_v13 = vld [vmem:[%s10122_s4 + $0x110] sm:$0xff]  }
 0x11a   :  { %v8239_v18 = vmul.f32 0.16666667, %v339_v14  ;;  %v7806_v8 = vld [vmem:[%s10122_s4 + $0x140] sm:$0xff]   ;;  %v7810_v14 = vld [vmem:[%s10122_s4 + $0x150] sm:$0xff]   ;;  %v7809_v15 = vld [vmem:[%s10122_s4 + $0x118] sm:$0xff]  }
 0x11b   :  { %v8241_v21 = vmul.f32 0.16666667, %v337_v16  ;;  %v7811_v16 = vld [vmem:[%s10122_s4 + $0x158] sm:$0xff]  }
 0x11c   :  { %6863 = vmatpush3.bf16.msra.mxu1 %v8229_v11  ;;  %6895 = vmatpush3.bf16.msra.mxu0 %v8229_v11  ;;  %v8253_v25 = vpack.c.bf16 %v8239_v18, %v8245_v23 }
 0x11d   :  { %v8249_v24 = vpack.c.bf16 %v8241_v21, %v8237_v17 }
 0x11f   :  { %6864 = vmatprep.subr.bf16.mxu1 %v8249_v24  ;;  %6896 = vmatprep.subr.bf16.mxu0 %v8249_v24 }
 0x120   :  { %6865 = vmatpush3.bf16.msra.mxu1 %v8249_v24  ;;  %6897 = vmatpush3.bf16.msra.mxu0 %v8249_v24 }
 0x121   :  { %6866 = vmatprep.subr.bf16.mxu1 %v8253_v25  ;;  %6898 = vmatprep.subr.bf16.mxu0 %v8253_v25 }
 0x124   :  { %6867 = vmatpush3.bf16.msra.mxu1 %v8253_v25  ;;  %6899 = vmatpush3.bf16.msra.mxu0 %v8253_v25 }
 0x125   :  { %6916 = vmatprep.subr.bf16.mxu1 %v8169_v2  ;;  %6948 = vmatprep.subr.bf16.mxu0 %v8169_v2 }
 0x127   :  { %6869 = vmatmul.mubr.bf16.vlgmr.msra.gmra.mrb[0].mxu1 %v7774_v27  ;;  %6901 = vmatmul.mubr.bf16.vlgmr.msra.gmra.mrb[16].mxu0 %v7775_v28  ;;  %v7812_v27 = vld [vmem:[%s10122_s4 + $0x120] sm:$0xff]  }
 0x128   :  { %6917 = vmatpush3.bf16.msra.mxu1 %v8169_v2  ;;  %6949 = vmatpush3.bf16.msra.mxu0 %v8169_v2  ;;  %v7814_v28 = vld [vmem:[%s10122_s4 + $0x160] sm:$0xff]  }
 0x129   :  { %6918 = vmatprep.subr.bf16.mxu1 %v8174_v10  ;;  %6950 = vmatprep.subr.bf16.mxu0 %v8174_v10 }
 0x12a   :  { %6872 = vmatprep.mubr.bf16.mxu1 %v7776_v31  ;;  %6904 = vmatprep.mubr.bf16.mxu0 %v7777_v32  ;;  %v7813_v31 = vld [vmem:[%s10122_s4 + $0x128] sm:$0xff]  }
 0x12b   :  { %v7815_v32 = vld [vmem:[%s10122_s4 + $0x168] sm:$0xff]  }
 0x12c   :  { %6919 = vmatpush3.bf16.msra.mxu1 %v8174_v10  ;;  %6951 = vmatpush3.bf16.msra.mxu0 %v8174_v10 }
 0x12d   :  { %6920 = vmatprep.subr.bf16.mxu1 %v8197_v36  ;;  %6952 = vmatprep.subr.bf16.mxu0 %v8197_v36 }
 0x12f   :  { %6873 = vmatmul.mubr.bf16.gmra.mrb[4].mxu1 %v7778_v33  ;;  %6905 = vmatmul.mubr.bf16.gmra.mrb[20].mxu0 %v7779_v34  ;;  %v7816_v33 = vld [vmem:[%s10122_s4 + $0x130] sm:$0xff]  }
 0x130   :  { %6921 = vmatpush3.bf16.msra.mxu1 %v8197_v36  ;;  %6953 = vmatpush3.bf16.msra.mxu0 %v8197_v36  ;;  %v7818_v34 = vld [vmem:[%s10122_s4 + $0x170] sm:$0xff]  }
 0x131   :  { %6922 = vmatprep.subr.bf16.mxu1 %v8202_v43  ;;  %6954 = vmatprep.subr.bf16.mxu0 %v8202_v43 }
 0x132   :  { %6876 = vmatprep.mubr.bf16.mxu1 %v7780_v37  ;;  %6908 = vmatprep.mubr.bf16.mxu0 %v7781_v38  ;;  %v7817_v37 = vld [vmem:[%s10122_s4 + $0x138] sm:$0xff]  }
 0x133   :  { %v7819_v38 = vld [vmem:[%s10122_s4 + $0x178] sm:$0xff]  }
 0x134   :  { %6923 = vmatpush3.bf16.msra.mxu1 %v8202_v43  ;;  %6955 = vmatpush3.bf16.msra.mxu0 %v8202_v43 }
 0x135   :  { %6924 = vmatprep.subr.bf16.mxu1 %v8225_v22  ;;  %6956 = vmatprep.subr.bf16.mxu0 %v8225_v22 }
 0x137   :  { %6877 = vmatmul.mubr.bf16.gmra.mrb[8].mxu1 %v7782_v39  ;;  %6909 = vmatmul.mubr.bf16.gmra.mrb[24].mxu0 %v7783_v40  ;;  %v7820_v39 = vld [vmem:[%s10122_s4 + $0x180] sm:$0xff]  }
 0x138   :  { %6925 = vmatpush3.bf16.msra.mxu1 %v8225_v22  ;;  %6957 = vmatpush3.bf16.msra.mxu0 %v8225_v22  ;;  %v7822_v40 = vld [vmem:[%s10122_s4 + $0x1c0] sm:$0xff]  }
 0x139   :  { %6926 = vmatprep.subr.bf16.mxu1 %v8229_v11  ;;  %6958 = vmatprep.subr.bf16.mxu0 %v8229_v11 }
 0x13a   :  { %6880 = vmatprep.mubr.bf16.mxu1 %v7784_v41  ;;  %6912 = vmatprep.mubr.bf16.mxu0 %v7785_v42  ;;  %v7821_v41 = vld [vmem:[%s10122_s4 + $0x188] sm:$0xff]  }
 0x13b   :  { %v7823_v42 = vld [vmem:[%s10122_s4 + $0x1c8] sm:$0xff]  }
 0x13c   :  { %6927 = vmatpush3.bf16.msra.mxu1 %v8229_v11  ;;  %6959 = vmatpush3.bf16.msra.mxu0 %v8229_v11 }
 0x13d   :  { %6928 = vmatprep.subr.bf16.mxu1 %v8249_v24  ;;  %6960 = vmatprep.subr.bf16.mxu0 %v8249_v24 }
 0x13f   :  { %6881 = vmatmul.mubr.bf16.gmra.mrb[12].mxu1 %v7786_v44  ;;  %6913 = vmatmul.mubr.bf16.gmra.mrb[28].mxu0 %v7787_v45  ;;  %v7824_v44 = vld [vmem:[%s10122_s4 + $0x190] sm:$0xff]  }
 0x140   :  { %6929 = vmatpush3.bf16.msra.mxu1 %v8249_v24  ;;  %6961 = vmatpush3.bf16.msra.mxu0 %v8249_v24  ;;  %v7826_v45 = vld [vmem:[%s10122_s4 + $0x1d0] sm:$0xff]  }
 0x141   :  { %6930 = vmatprep.subr.bf16.mxu1 %v8253_v25  ;;  %6962 = vmatprep.subr.bf16.mxu0 %v8253_v25 }
 0x142   :  { %6932 = vmatprep.mubr.bf16.mxu1 %v7788_v46  ;;  %6964 = vmatprep.mubr.bf16.mxu0 %v7790_v47  ;;  %v7825_v46 = vld [vmem:[%s10122_s4 + $0x198] sm:$0xff]  }
 0x143   :  { %v7827_v47 = vld [vmem:[%s10122_s4 + $0x1d8] sm:$0xff]  }
 0x144   :  { %6931 = vmatpush3.bf16.msra.mxu1 %v8253_v25  ;;  %6963 = vmatpush3.bf16.msra.mxu0 %v8253_v25 }
 0x145   :  { %6980 = vmatprep.subr.bf16.mxu1 %v8169_v2  ;;  %7012 = vmatprep.subr.bf16.mxu0 %v8169_v2 }
 0x147   :  { %6933 = vmatmul.mubr.bf16.vlgmr.msra.gmra.mrb[16].mxu1 %v7789_v48  ;;  %6965 = vmatmul.mubr.bf16.vlgmr.msra.gmra.mrb[32].mxu0 %v7791_v49  ;;  %v7828_v48 = vld [vmem:[%s10122_s4 + $0x1a0] sm:$0xff]   ;;  %v7831_v49 = vld [vmem:[%s10122_s4 + $0x1e8] sm:$0xff]  }
 0x148   :  { %6981 = vmatpush3.bf16.msra.mxu1 %v8169_v2  ;;  %7013 = vmatpush3.bf16.msra.mxu0 %v8169_v2 }
 0x149   :  { %6982 = vmatprep.subr.bf16.mxu1 %v8174_v10  ;;  %7014 = vmatprep.subr.bf16.mxu0 %v8174_v10 }
 0x14a   :  { %6936 = vmatprep.mubr.bf16.mxu1 %v7792_v50  ;;  %6968 = vmatprep.mubr.bf16.mxu0 %v7794_v51  ;;  %v7832_v50 = vld [vmem:[%s10122_s4 + $0x1b0] sm:$0xff]   ;;  %v7835_v51 = vld [vmem:[%s10122_s4 + $0x1f8] sm:$0xff]  }
 0x14c   :  { %6983 = vmatpush3.bf16.msra.mxu1 %v8174_v10  ;;  %7015 = vmatpush3.bf16.msra.mxu0 %v8174_v10 }
 0x14d   :  { %6984 = vmatprep.subr.bf16.mxu1 %v8197_v36  ;;  %7016 = vmatprep.subr.bf16.mxu0 %v8197_v36 }
 0x14f   :  { %6937 = vmatmul.mubr.bf16.gmra.mrb[20].mxu1 %v7793_v52  ;;  %6969 = vmatmul.mubr.bf16.gmra.mrb[36].mxu0 %v7795_v53  ;;  %v7836_v52 = vld [vmem:[%s10122_s4 + $0x200] sm:$0xff]   ;;  %v7839_v53 = vld [vmem:[%s10122_s4 + $0x218] sm:$0xff]  }
 0x150   :  { %6985 = vmatpush3.bf16.msra.mxu1 %v8197_v36  ;;  %7017 = vmatpush3.bf16.msra.mxu0 %v8197_v36 }
 0x151   :  { %6986 = vmatprep.subr.bf16.mxu1 %v8202_v43  ;;  %7018 = vmatprep.subr.bf16.mxu0 %v8202_v43 }
 0x152   :  { %6940 = vmatprep.mubr.bf16.mxu1 %v7796_v54  ;;  %6972 = vmatprep.mubr.bf16.mxu0 %v7798_v55  ;;  %v7842_v54 = vld [vmem:[%s10122_s4 + $0x230] sm:$0xff]   ;;  %v7843_v55 = vld [vmem:[%s10122_s4 + $0x238] sm:$0xff]  }
 0x154   :  { %6987 = vmatpush3.bf16.msra.mxu1 %v8202_v43  ;;  %7019 = vmatpush3.bf16.msra.mxu0 %v8202_v43 }
 0x155   :  { %6988 = vmatprep.subr.bf16.mxu1 %v8225_v22  ;;  %7020 = vmatprep.subr.bf16.mxu0 %v8225_v22 }
 0x157   :  { %6941 = vmatmul.mubr.bf16.gmra.mrb[24].mxu1 %v7797_v58  ;;  %6973 = vmatmul.mubr.bf16.gmra.mrb[40].mxu0 %v7799_v59  ;;  %v8586_v58 = vsub.s32 1, %v8140_v19  ;;  %v8591_v59 = vld [vmem:[%s10120_s2] sm:$0xff] }
 0x158   :  { %6989 = vmatpush3.bf16.msra.mxu1 %v8225_v22  ;;  %7021 = vmatpush3.bf16.msra.mxu0 %v8225_v22 }
 0x159   :  { %6990 = vmatprep.subr.bf16.mxu1 %v8229_v11  ;;  %7022 = vmatprep.subr.bf16.mxu0 %v8229_v11 }
 0x15a   :  { %6944 = vmatprep.mubr.bf16.mxu1 %v7800_v1  ;;  %6976 = vmatprep.mubr.bf16.mxu0 %v7802_v3  ;;  %v8595_v1 = vrot.slane %v8591_v59, %v8143_v20  ;;  %v8599_v3 = vrot.slane %v8591_v59, %v8586_v58 }
 0x15c   :  { %6991 = vmatpush3.bf16.msra.mxu1 %v8229_v11  ;;  %7023 = vmatpush3.bf16.msra.mxu0 %v8229_v11 }
 0x15d   :  { %6992 = vmatprep.subr.bf16.mxu1 %v8249_v24  ;;  %7024 = vmatprep.subr.bf16.mxu0 %v8249_v24 }
 0x15f   :  { %6945 = vmatmul.mubr.bf16.gmra.mrb[28].mxu1 %v7801_v5  ;;  %6977 = vmatmul.mubr.bf16.gmra.mrb[44].mxu0 %v7803_v6 }
 0x160   :  { %6993 = vmatpush3.bf16.msra.mxu1 %v8249_v24  ;;  %7025 = vmatpush3.bf16.msra.mxu0 %v8249_v24 }
 0x161   :  { %6994 = vmatprep.subr.bf16.mxu1 %v8253_v25  ;;  %7026 = vmatprep.subr.bf16.mxu0 %v8253_v25 }
 0x162   :  { %6996 = vmatprep.mubr.bf16.mxu1 %v7804_v7  ;;  %7028 = vmatprep.mubr.bf16.mxu0 %v7806_v8 }
 0x164   :  { %6995 = vmatpush3.bf16.msra.mxu1 %v8253_v25  ;;  %7027 = vmatpush3.bf16.msra.mxu0 %v8253_v25 }
 0x165   :  { %7044 = vmatprep.subr.bf16.mxu1 %v8169_v2  ;;  %7076 = vmatprep.subr.bf16.mxu0 %v8169_v2 }
 0x167   :  { %6997 = vmatmul.mubr.bf16.vlgmr.msra.gmra.mrb[32].mxu1 %v7805_v9  ;;  %7029 = vmatmul.mubr.bf16.vlgmr.msra.gmra.mrb[48].mxu0 %v7807_v12 }
 0x168   :  { %7045 = vmatpush3.bf16.msra.mxu1 %v8169_v2  ;;  %7077 = vmatpush3.bf16.msra.mxu0 %v8169_v2 }
 0x169   :  { %7046 = vmatprep.subr.bf16.mxu1 %v8174_v10  ;;  %7078 = vmatprep.subr.bf16.mxu0 %v8174_v10 }
 0x16a   :  { %7000 = vmatprep.mubr.bf16.mxu1 %v7808_v13  ;;  %7032 = vmatprep.mubr.bf16.mxu0 %v7810_v14 }
 0x16c   :  { %7047 = vmatpush3.bf16.msra.mxu1 %v8174_v10  ;;  %7079 = vmatpush3.bf16.msra.mxu0 %v8174_v10 }
 0x16d   :  { %7048 = vmatprep.subr.bf16.mxu1 %v8197_v36  ;;  %7080 = vmatprep.subr.bf16.mxu0 %v8197_v36 }
 0x16f   :  { %7001 = vmatmul.mubr.bf16.gmra.mrb[36].mxu1 %v7809_v15  ;;  %7033 = vmatmul.mubr.bf16.gmra.mrb[52].mxu0 %v7811_v16 }
 0x170   :  { %7049 = vmatpush3.bf16.msra.mxu1 %v8197_v36  ;;  %7081 = vmatpush3.bf16.msra.mxu0 %v8197_v36 }
 0x171   :  { %7050 = vmatprep.subr.bf16.mxu1 %v8202_v43  ;;  %7082 = vmatprep.subr.bf16.mxu0 %v8202_v43 }
 0x172   :  { %7004 = vmatprep.mubr.bf16.mxu1 %v7812_v27  ;;  %7036 = vmatprep.mubr.bf16.mxu0 %v7814_v28 }
 0x174   :  { %7051 = vmatpush3.bf16.msra.mxu1 %v8202_v43  ;;  %7083 = vmatpush3.bf16.msra.mxu0 %v8202_v43 }
 0x175   :  { %7052 = vmatprep.subr.bf16.mxu1 %v8225_v22  ;;  %7084 = vmatprep.subr.bf16.mxu0 %v8225_v22 }
 0x177   :  { %7005 = vmatmul.mubr.bf16.gmra.mrb[40].mxu1 %v7813_v31  ;;  %7037 = vmatmul.mubr.bf16.gmra.mrb[56].mxu0 %v7815_v32 }
 0x178   :  { %7053 = vmatpush3.bf16.msra.mxu1 %v8225_v22  ;;  %7085 = vmatpush3.bf16.msra.mxu0 %v8225_v22 }
 0x179   :  { %7054 = vmatprep.subr.bf16.mxu1 %v8229_v11  ;;  %7086 = vmatprep.subr.bf16.mxu0 %v8229_v11 }
 0x17a   :  { %7008 = vmatprep.mubr.bf16.mxu1 %v7816_v33  ;;  %7040 = vmatprep.mubr.bf16.mxu0 %v7818_v34 }
 0x17c   :  { %7055 = vmatpush3.bf16.msra.mxu1 %v8229_v11  ;;  %7087 = vmatpush3.bf16.msra.mxu0 %v8229_v11 }
 0x17d   :  { %7056 = vmatprep.subr.bf16.mxu1 %v8249_v24  ;;  %7088 = vmatprep.subr.bf16.mxu0 %v8249_v24 }
 0x17f   :  { %7009 = vmatmul.mubr.bf16.gmra.mrb[44].mxu1 %v7817_v37  ;;  %7041 = vmatmul.mubr.bf16.gmra.mrb[60].mxu0 %v7819_v38 }
 0x180   :  { %7057 = vmatpush3.bf16.msra.mxu1 %v8249_v24  ;;  %7089 = vmatpush3.bf16.msra.mxu0 %v8249_v24 }
 0x181   :  { %7058 = vmatprep.subr.bf16.mxu1 %v8253_v25  ;;  %7090 = vmatprep.subr.bf16.mxu0 %v8253_v25 }
 0x182   :  { %7060 = vmatprep.mubr.bf16.mxu1 %v7820_v39  ;;  %7092 = vmatprep.mubr.bf16.mxu0 %v7822_v40 }
 0x184   :  { %7059 = vmatpush3.bf16.msra.mxu1 %v8253_v25  ;;  %7091 = vmatpush3.bf16.msra.mxu0 %v8253_v25 }
 0x185   :  { %7108 = vmatprep.subr.bf16.mxu1 %v8169_v2 }
 0x187   :  { %7061 = vmatmul.mubr.bf16.vlgmr.msra.gmra.mrb[48].mxu1 %v7821_v41  ;;  %7093 = vmatmul.mubr.bf16.vlgmr.msra.gmra.mrb[64].mxu0 %v7823_v42 }
 0x188   :  { %7109 = vmatpush3.bf16.msra.mxu1 %v8169_v2  ;;  %7064 = vmatprep.mubr.bf16.mxu1 %v7824_v44  ;;  %v7830_v2 = vld [vmem:[%s10122_s4 + $0x1e0] sm:$0xff]  }
 0x189   :  { %7110 = vmatprep.subr.bf16.mxu1 %v8174_v10  ;;  %7096 = vmatprep.mubr.bf16.mxu0 %v7826_v45 }
 0x18c   :  { %7111 = vmatpush3.bf16.msra.mxu1 %v8174_v10  ;;  %v7829_v10 = vld [vmem:[%s10122_s4 + $0x1a8] sm:$0xff]  }
 0x18d   :  { %7112 = vmatprep.subr.bf16.mxu1 %v8197_v36 }
 0x18f   :  { %7065 = vmatmul.mubr.bf16.gmra.mrb[52].mxu1 %v7825_v46  ;;  %7097 = vmatmul.mubr.bf16.gmra.mrb[68].mxu0 %v7827_v47 }
 0x190   :  { %7113 = vmatpush3.bf16.msra.mxu1 %v8197_v36  ;;  %7068 = vmatprep.mubr.bf16.mxu1 %v7828_v48  ;;  %v7834_v36 = vld [vmem:[%s10122_s4 + $0x1f0] sm:$0xff]  }
 0x191   :  { %7114 = vmatprep.subr.bf16.mxu1 %v8202_v43  ;;  %7100 = vmatprep.mubr.bf16.mxu0 %v7830_v2 }
 0x194   :  { %7115 = vmatpush3.bf16.msra.mxu1 %v8202_v43  ;;  %v7833_v43 = vld [vmem:[%s10122_s4 + $0x1b8] sm:$0xff]  }
 0x195   :  { %7116 = vmatprep.subr.bf16.mxu1 %v8225_v22 }
 0x197   :  { %7069 = vmatmul.mubr.bf16.gmra.mrb[56].mxu1 %v7829_v10  ;;  %7101 = vmatmul.mubr.bf16.gmra.mrb[72].mxu0 %v7831_v49 }
 0x198   :  { %7117 = vmatpush3.bf16.msra.mxu1 %v8225_v22  ;;  %7072 = vmatprep.mubr.bf16.mxu1 %v7832_v50  ;;  %v7837_v22 = vld [vmem:[%s10122_s4 + $0x208] sm:$0xff]  }
 0x199   :  { %7118 = vmatprep.subr.bf16.mxu1 %v8229_v11  ;;  %7104 = vmatprep.mubr.bf16.mxu0 %v7834_v36 }
 0x19c   :  { %7119 = vmatpush3.bf16.msra.mxu1 %v8229_v11  ;;  %v7838_v11 = vld [vmem:[%s10122_s4 + $0x210] sm:$0xff]  }
 0x19d   :  { %7120 = vmatprep.subr.bf16.mxu1 %v8249_v24 }
 0x19f   :  { %7073 = vmatmul.mubr.bf16.gmra.mrb[60].mxu1 %v7833_v43  ;;  %7105 = vmatmul.mubr.bf16.gmra.mrb[76].mxu0 %v7835_v51 }
 0x1a0   :  { %7121 = vmatpush3.bf16.msra.mxu1 %v8249_v24  ;;  %7124 = vmatprep.mubr.bf16.mxu1 %v7836_v52  ;;  %v7840_v24 = vld [vmem:[%s10122_s4 + $0x220] sm:$0xff]  }
 0x1a1   :  { %7122 = vmatprep.subr.bf16.mxu1 %v8253_v25 }
 0x1a4   :  { %7123 = vmatpush3.bf16.msra.mxu1 %v8253_v25  ;;  %v7841_v25 = vld [vmem:[%s10122_s4 + $0x228] sm:$0xff]  }
 0x1a7   :  { %7125 = vmatmul.mubr.bf16.vlgmr.msra.gmra.mrb[64].mxu1 %v7837_v22 }
 0x1a8   :  { %7128 = vmatprep.mubr.bf16.mxu1 %v7838_v11 }
 0x1af   :  { %7129 = vmatmul.mubr.bf16.gmra.mrb[68].mxu1 %v7839_v53 }
 0x1b0   :  { %7132 = vmatprep.mubr.bf16.mxu1 %v7840_v24 }
 0x1b7   :  { %7133 = vmatmul.mubr.bf16.gmra.mrb[72].mxu1 %v7841_v25  ;;  %v10134_v25 = vmov 0.0  }
 0x1b8   :  { %7136 = vmatprep.mubr.bf16.mxu1 %v7842_v54  ;;  %7140 = vmatprep.subr.bf16.mxu0 %v10134_v25 }
 0x1b9   :  { %7160 = vmatprep.subr.bf16.mxu1 %v10134_v25  ;;  %7156 = vmatprep.mubr.msk.bf16.mxu0 %vm8024_vm0, %v10134_v25 }
 0x1bf   :  { %7137 = vmatmul.mubr.bf16.gmra.mrb[76].mxu1 %v7843_v55 }
 0x1c0   :  { %7176 = vmatprep.mubr.msk.bf16.mxu1 %vm8024_vm0, %v10134_v25 }
 0x1fa   :  { %v6870_v5 = vpop.f32.mrb[0].mxu1  ;;  %v6902_v6 = vpop.f32.mrb[16].mxu0 }
 0x1fb   :  { %v531_v7 = vmul.f32 %v6870_v5, %v8595_v1  ;;  %v713_v8 = vmul.f32 %v6902_v6, %v8599_v3  ;;  %v462_v9 = vpop.f32.mrb[1].mxu1  ;;  %v644_v12 = vpop.f32.mrb[17].mxu0 }
 0x1fc   :  { %v529_v13 = vmul.f32 %v8595_v1, %v462_v9  ;;  %v711_v14 = vmul.f32 %v8599_v3, %v644_v12  ;;  %v6871_v15 = vpop.f32.mrb[2].mxu1  ;;  %v6903_v16 = vpop.f32.mrb[18].mxu0 }
 0x1fd   :  { %v8605_v27 = vadd.f32 %v713_v8, %v531_v7  ;;  %v532_v28 = vmul.f32 %v6871_v15, %v8595_v1  ;;  %v714_v31 = vmul.f32 %v6903_v16, %v8599_v3  ;;  %v465_v32 = vpop.f32.mrb[3].mxu1  ;;  %v647_v33 = vpop.f32.mrb[19].mxu0 }
 0x1fe   :  { %v8609_v34 = vadd.f32 %v711_v14, %v529_v13  ;;  %v530_v37 = vmul.f32 %v8595_v1, %v465_v32  ;;  %v712_v38 = vmul.f32 %v8599_v3, %v647_v33 }
 0x1ff   :  { %v8613_v39 = vadd.f32 %v714_v31, %v532_v28 }
 0x200   :  { %v8615_v40 = vadd.f32 %v712_v38, %v530_v37 }
 0x202   :  { %v6874_v41 = vpop.f32.mrb[4].mxu1  ;;  %v6906_v42 = vpop.f32.mrb[20].mxu0 }
 0x203   :  { %v535_v44 = vmul.f32 %v6874_v41, %v8595_v1  ;;  %v717_v45 = vmul.f32 %v6906_v42, %v8599_v3  ;;  %v478_v46 = vpop.f32.mrb[5].mxu1  ;;  %v660_v47 = vpop.f32.mrb[21].mxu0 }
 0x204   :  { %v533_v48 = vmul.f32 %v8595_v1, %v478_v46  ;;  %v715_v2 = vmul.f32 %v8599_v3, %v660_v47  ;;  %v6875_v10 = vpop.f32.mrb[6].mxu1  ;;  %v6907_v49 = vpop.f32.mrb[22].mxu0 }
 0x205   :  { %v8621_v50 = vadd.f32 %v717_v45, %v535_v44  ;;  %v536_v36 = vmul.f32 %v6875_v10, %v8595_v1  ;;  %v718_v43 = vmul.f32 %v6907_v49, %v8599_v3  ;;  %v481_v51 = vpop.f32.mrb[7].mxu1  ;;  %v663_v52 = vpop.f32.mrb[23].mxu0  ;;  %v8654_v49 = vsub.s32 2, %v8140_v19 }
 0x206   :  { %v8625_v22 = vadd.f32 %v715_v2, %v533_v48  ;;  %v534_v11 = vmul.f32 %v8595_v1, %v481_v51  ;;  %v716_v53 = vmul.f32 %v8599_v3, %v663_v52 }
 0x207   :  { %v8629_v24 = vadd.f32 %v718_v43, %v536_v36  ;;  %v8657_v36 = vsub.s32 3, %v8140_v19 }
 0x208   :  { %v8633_v54 = vadd.f32 %v716_v53, %v534_v11 }
 0x20a   :  { %v6878_v55 = vpop.f32.mrb[8].mxu1  ;;  %v6910_v5 = vpop.f32.mrb[24].mxu0 }
 0x20b   :  { %v539_v6 = vmul.f32 %v6878_v55, %v8595_v1  ;;  %v721_v7 = vmul.f32 %v6910_v5, %v8599_v3  ;;  %v494_v8 = vpop.f32.mrb[9].mxu1  ;;  %v676_v9 = vpop.f32.mrb[25].mxu0 }
 0x20c   :  { %v537_v12 = vmul.f32 %v8595_v1, %v494_v8  ;;  %v719_v13 = vmul.f32 %v8599_v3, %v676_v9  ;;  %v6879_v14 = vpop.f32.mrb[10].mxu1  ;;  %v6911_v15 = vpop.f32.mrb[26].mxu0 }
 0x20d   :  { %v8639_v16 = vadd.f32 %v721_v7, %v539_v6  ;;  %v540_v28 = vmul.f32 %v6879_v14, %v8595_v1  ;;  %v722_v31 = vmul.f32 %v6911_v15, %v8599_v3  ;;  %v497_v32 = vpop.f32.mrb[11].mxu1  ;;  %v679_v33 = vpop.f32.mrb[27].mxu0  ;;  %v8673_v14 = vrot.slane %v8591_v59, %v8654_v49 }
 0x20e   :  { %v8643_v37 = vadd.f32 %v719_v13, %v537_v12  ;;  %v538_v38 = vmul.f32 %v8595_v1, %v497_v32  ;;  %v720_v41 = vmul.f32 %v8599_v3, %v679_v33  ;;  %v8677_v15 = vrot.slane %v8591_v59, %v8657_v36 }
 0x20f   :  { %v8647_v42 = vadd.f32 %v722_v31, %v540_v28 }
 0x210   :  { %v8649_v44 = vadd.f32 %v720_v41, %v538_v38 }
 0x212   :  { %v6882_v45 = vpop.f32.mrb[12].mxu1  ;;  %v6914_v46 = vpop.f32.mrb[28].mxu0 }
 0x213   :  { %v543_v47 = vmul.f32 %v6882_v45, %v8595_v1  ;;  %v725_v48 = vmul.f32 %v6914_v46, %v8599_v3  ;;  %v510_v2 = vpop.f32.mrb[13].mxu1  ;;  %v692_v10 = vpop.f32.mrb[29].mxu0 }
 0x214   :  { %v541_v43 = vmul.f32 %v8595_v1, %v510_v2  ;;  %v723_v51 = vmul.f32 %v8599_v3, %v692_v10  ;;  %v6883_v52 = vpop.f32.mrb[14].mxu1  ;;  %v6915_v11 = vpop.f32.mrb[30].mxu0 }
 0x215   :  { %v8661_v53 = vadd.f32 %v725_v48, %v543_v47  ;;  %v544_v55 = vmul.f32 %v6883_v52, %v8595_v1  ;;  %v726_v5 = vmul.f32 %v6915_v11, %v8599_v3  ;;  %v513_v6 = vpop.f32.mrb[15].mxu1  ;;  %v695_v7 = vpop.f32.mrb[31].mxu0 }
 0x216   :  { %v8665_v8 = vadd.f32 %v723_v51, %v541_v43  ;;  %v542_v9 = vmul.f32 %v8595_v1, %v513_v6  ;;  %v724_v12 = vmul.f32 %v8599_v3, %v695_v7 }
 0x217   :  { %v8669_v13 = vadd.f32 %v726_v5, %v544_v55 }
 0x218   :  { %v8679_v28 = vadd.f32 %v724_v12, %v542_v9 }
 0x21a   :  { %v6934_v31 = vpop.f32.mrb[16].mxu1  ;;  %v6966_v32 = vpop.f32.mrb[32].mxu0 }
 0x21b   :  { %v911_v33 = vmul.f32 %v6934_v31, %v8673_v14  ;;  %v842_v38 = vpop.f32.mrb[17].mxu1  ;;  %v1109_v1 = vmul.f32 %v6966_v32, %v8677_v15  ;;  %v1040_v3 = vpop.f32.mrb[33].mxu0 }
 0x21c   :  { %v909_v41 = vmul.f32 %v8673_v14, %v842_v38  ;;  %v6935_v45 = vpop.f32.mrb[18].mxu1  ;;  %v1107_v46 = vmul.f32 %v8677_v15, %v1040_v3  ;;  %v6967_v47 = vpop.f32.mrb[34].mxu0 }
 0x21d   :  { %v927_v48 = vadd.f32 %v911_v33, %v8605_v27  ;;  %v912_v2 = vmul.f32 %v6935_v45, %v8673_v14  ;;  %v845_v10 = vpop.f32.mrb[19].mxu1  ;;  %v1110_v43 = vmul.f32 %v6967_v47, %v8677_v15  ;;  %v1043_v51 = vpop.f32.mrb[35].mxu0 }
 0x21e   :  { %v925_v52 = vadd.f32 %v909_v41, %v8609_v34  ;;  %v910_v11 = vmul.f32 %v8673_v14, %v845_v10  ;;  %v1108_v55 = vmul.f32 %v8677_v15, %v1043_v51 }
 0x21f   :  { %v928_v5 = vadd.f32 %v912_v2, %v8613_v39  ;;  %v8692_v6 = vadd.f32 %v1109_v1, %v927_v48 }
 0x220   :  { %v926_v7 = vadd.f32 %v910_v11, %v8615_v40  ;;  %v8695_v9 = vadd.f32 %v1107_v46, %v925_v52  ;;  %v7844_v11 = vld [vmem:[%s10119_s1 + $0x40] sm:$0xff]  }
 0x221   :  { %v8697_v27 = vadd.f32 %v1110_v43, %v928_v5  ;;  %7161 = vmatpush3.bf16.msra.mxu1 %v7844_v11 }
 0x222   :  { %v8699_v12 = vadd.f32 %v1108_v55, %v926_v7  ;;  %v6938_v31 = vpop.f32.mrb[20].mxu1  ;;  %v6970_v32 = vpop.f32.mrb[36].mxu0  ;;  %7162 = vmatprep.subr.bf16.mxu1 %v10134_v25 }
 0x223   :  { %v915_v34 = vmul.f32 %v6938_v31, %v8673_v14  ;;  %v858_v33 = vpop.f32.mrb[21].mxu1  ;;  %v1113_v38 = vmul.f32 %v6970_v32, %v8677_v15  ;;  %v1056_v3 = vpop.f32.mrb[37].mxu0 }
 0x224   :  { %v913_v39 = vmul.f32 %v8673_v14, %v858_v33  ;;  %v6939_v1 = vpop.f32.mrb[22].mxu1  ;;  %v1111_v41 = vmul.f32 %v8677_v15, %v1056_v3  ;;  %v6971_v40 = vpop.f32.mrb[38].mxu0 }
 0x225   :  { %v931_v45 = vadd.f32 %v915_v34, %v8621_v50  ;;  %v916_v46 = vmul.f32 %v6939_v1, %v8673_v14  ;;  %v861_v47 = vpop.f32.mrb[23].mxu1  ;;  %v1114_v48 = vmul.f32 %v6971_v40, %v8677_v15  ;;  %v1059_v2 = vpop.f32.mrb[39].mxu0 }
 0x226   :  { %v929_v10 = vadd.f32 %v913_v39, %v8625_v22  ;;  %v914_v43 = vmul.f32 %v8673_v14, %v861_v47  ;;  %v1112_v51 = vmul.f32 %v8677_v15, %v1059_v2  ;;  %v7845_v22 = vld [vmem:[%s10119_s1 + $0x48] sm:$0xff]   ;;  %v7846_v2 = vld [vmem:[%s10119_s1 + $0x50] sm:$0xff]  }
 0x227   :  { %v932_v50 = vadd.f32 %v916_v46, %v8629_v24  ;;  %v8716_v52 = vadd.f32 %v1113_v38, %v931_v45  ;;  %7163 = vmatpush3.bf16.msra.mxu1 %v7845_v22 }
 0x228   :  { %v930_v55 = vadd.f32 %v914_v43, %v8633_v54  ;;  %v8722_v5 = vadd.f32 %v1111_v41, %v929_v10  ;;  %7164 = vmatprep.subr.bf16.mxu1 %v10134_v25 }
 0x229   :  { %v8724_v7 = vadd.f32 %v1114_v48, %v932_v50 }
 0x22a   :  { %v8729_v31 = vadd.f32 %v1112_v51, %v930_v55  ;;  %v6942_v24 = vpop.f32.mrb[24].mxu1  ;;  %v6974_v32 = vpop.f32.mrb[40].mxu0 }
 0x22b   :  { %v919_v34 = vmul.f32 %v6942_v24, %v8673_v14  ;;  %v874_v33 = vpop.f32.mrb[25].mxu1  ;;  %v1117_v54 = vmul.f32 %v6974_v32, %v8677_v15  ;;  %v1072_v38 = vpop.f32.mrb[41].mxu0  ;;  %7165 = vmatpush3.bf16.msra.mxu1 %v7846_v2 }
 0x22c   :  { %v917_v3 = vmul.f32 %v8673_v14, %v874_v33  ;;  %v6943_v39 = vpop.f32.mrb[26].mxu1  ;;  %v1115_v1 = vmul.f32 %v8677_v15, %v1072_v38  ;;  %v6975_v41 = vpop.f32.mrb[42].mxu0  ;;  %7166 = vmatprep.subr.bf16.mxu1 %v10134_v25  ;;  %v8763_v38 = vsub.s32 4, %v8140_v19 }
 0x22d   :  { %v935_v40 = vadd.f32 %v919_v34, %v8639_v16  ;;  %v920_v45 = vmul.f32 %v6943_v39, %v8673_v14  ;;  %v877_v46 = vpop.f32.mrb[27].mxu1  ;;  %v1118_v47 = vmul.f32 %v6975_v41, %v8677_v15  ;;  %v1075_v48 = vpop.f32.mrb[43].mxu0 }
 0x22e   :  { %v933_v10 = vadd.f32 %v917_v3, %v8643_v37  ;;  %v918_v43 = vmul.f32 %v8673_v14, %v877_v46  ;;  %v1116_v51 = vmul.f32 %v8677_v15, %v1075_v48  ;;  %v7847_v37 = vld [vmem:[%s10119_s1 + $0x58] sm:$0xff]   ;;  %v8766_v3 = vsub.s32 5, %v8140_v19 }
 0x22f   :  { %v936_v16 = vadd.f32 %v920_v45, %v8647_v42  ;;  %v8747_v50 = vadd.f32 %v1117_v54, %v935_v40  ;;  %7167 = vmatpush3.bf16.msra.mxu1 %v7847_v37 }
 0x230   :  { %v934_v11 = vadd.f32 %v918_v43, %v8649_v44  ;;  %v8750_v55 = vadd.f32 %v1115_v1, %v933_v10  ;;  %v7848_v10 = vld [vmem:[%s10119_s1 + $0x60] sm:$0xff]   ;;  %7168 = vmatprep.subr.bf16.mxu1 %v10134_v25  ;;  %v8789_v37 = vrot.slane %v8591_v59, %v8766_v3 }
 0x231   :  { %v8752_v22 = vadd.f32 %v1118_v47, %v936_v16 }
 0x232   :  { %v8757_v24 = vadd.f32 %v1116_v51, %v934_v11  ;;  %v6946_v32 = vpop.f32.mrb[28].mxu1  ;;  %v6978_v34 = vpop.f32.mrb[44].mxu0 }
 0x233   :  { %v923_v42 = vmul.f32 %v6946_v32, %v8673_v14  ;;  %v890_v33 = vpop.f32.mrb[29].mxu1  ;;  %v1121_v44 = vmul.f32 %v6978_v34, %v8677_v15  ;;  %v1088_v54 = vpop.f32.mrb[45].mxu0  ;;  %v8785_v32 = vrot.slane %v8591_v59, %v8763_v38  ;;  %7169 = vmatpush3.bf16.msra.mxu1 %v7848_v10 }
 0x234   :  { %v921_v39 = vmul.f32 %v8673_v14, %v890_v33  ;;  %v6947_v1 = vpop.f32.mrb[30].mxu1  ;;  %v1119_v41 = vmul.f32 %v8677_v15, %v1088_v54  ;;  %v6979_v40 = vpop.f32.mrb[46].mxu0  ;;  %7170 = vmatprep.subr.bf16.mxu1 %v10134_v25 }
 0x235   :  { %v939_v45 = vadd.f32 %v923_v42, %v8661_v53  ;;  %v924_v46 = vmul.f32 %v6947_v1, %v8673_v14  ;;  %v893_v47 = vpop.f32.mrb[31].mxu1  ;;  %v1122_v48 = vmul.f32 %v6979_v40, %v8677_v15  ;;  %v1091_v2 = vpop.f32.mrb[47].mxu0 }
 0x236   :  { %v937_v43 = vadd.f32 %v921_v39, %v8665_v8  ;;  %v922_v51 = vmul.f32 %v8673_v14, %v893_v47  ;;  %v1120_v16 = vmul.f32 %v8677_v15, %v1091_v2 }
 0x237   :  { %v940_v53 = vadd.f32 %v924_v46, %v8669_v13  ;;  %v8781_v11 = vadd.f32 %v1121_v44, %v939_v45  ;;  %v7849_v13 = vld [vmem:[%s10119_s1 + $0x68] sm:$0xff]  }
 0x238   :  { %v938_v8 = vadd.f32 %v922_v51, %v8679_v28  ;;  %v8792_v34 = vadd.f32 %v1119_v41, %v937_v43  ;;  %7171 = vmatpush3.bf16.msra.mxu1 %v7849_v13  ;;  %v7850_v43 = vld [vmem:[%s10119_s1 + $0x70] sm:$0xff]  }
 0x239   :  { %v8794_v14 = vadd.f32 %v1122_v48, %v940_v53  ;;  %7172 = vmatprep.subr.bf16.mxu1 %v10134_v25 }
 0x23a   :  { %v8799_v15 = vadd.f32 %v1120_v16, %v938_v8  ;;  %v6998_v42 = vpop.f32.mrb[32].mxu1  ;;  %v7030_v33 = vpop.f32.mrb[48].mxu0 }
 0x23b   :  { %v1307_v44 = vmul.f32 %v6998_v42, %v8785_v32  ;;  %v1238_v54 = vpop.f32.mrb[33].mxu1  ;;  %v1505_v28 = vmul.f32 %v7030_v33, %v8789_v37  ;;  %v1436_v39 = vpop.f32.mrb[49].mxu0 }
 0x23c   :  { %v1305_v1 = vmul.f32 %v8785_v32, %v1238_v54  ;;  %v6999_v41 = vpop.f32.mrb[34].mxu1  ;;  %v1503_v40 = vmul.f32 %v8789_v37, %v1436_v39  ;;  %v7031_v45 = vpop.f32.mrb[50].mxu0  ;;  %7173 = vmatpush3.bf16.msra.mxu1 %v7850_v43 }
 0x23d   :  { %v1323_v46 = vadd.f32 %v1307_v44, %v8692_v6  ;;  %v1308_v47 = vmul.f32 %v6999_v41, %v8785_v32  ;;  %v1241_v48 = vpop.f32.mrb[35].mxu1  ;;  %v1506_v2 = vmul.f32 %v7031_v45, %v8789_v37  ;;  %v1439_v10 = vpop.f32.mrb[51].mxu0  ;;  %7174 = vmatprep.subr.bf16.mxu1 %v10134_v25 }
 0x23e   :  { %v1321_v51 = vadd.f32 %v1305_v1, %v8695_v9  ;;  %v1306_v16 = vmul.f32 %v8785_v32, %v1241_v48  ;;  %v1504_v53 = vmul.f32 %v8789_v37, %v1439_v10 }
 0x23f   :  { %v1324_v6 = vadd.f32 %v1308_v47, %v8697_v27  ;;  %v8817_v8 = vadd.f32 %v1505_v28, %v1323_v46 }
 0x240   :  { %v1322_v42 = vadd.f32 %v1306_v16, %v8699_v12  ;;  %v8820_v33 = vadd.f32 %v1503_v40, %v1321_v51 }
 0x241   :  { %v8822_v13 = vadd.f32 %v1506_v2, %v1324_v6 }
 0x242   :  { %v8824_v44 = vadd.f32 %v1504_v53, %v1322_v42  ;;  %v7002_v9 = vpop.f32.mrb[36].mxu1  ;;  %v7034_v54 = vpop.f32.mrb[52].mxu0 }
 0x243   :  { %v1311_v39 = vmul.f32 %v7002_v9, %v8785_v32  ;;  %v1254_v1 = vpop.f32.mrb[37].mxu1  ;;  %v1509_v27 = vmul.f32 %v7034_v54, %v8789_v37  ;;  %v1452_v28 = vpop.f32.mrb[53].mxu0 }
 0x244   :  { %v1309_v41 = vmul.f32 %v8785_v32, %v1254_v1  ;;  %v7003_v12 = vpop.f32.mrb[38].mxu1  ;;  %v1507_v40 = vmul.f32 %v8789_v37, %v1452_v28  ;;  %v7035_v45 = vpop.f32.mrb[54].mxu0 }
 0x245   :  { %v1327_v46 = vadd.f32 %v1311_v39, %v8716_v52  ;;  %v1312_v47 = vmul.f32 %v7003_v12, %v8785_v32  ;;  %v1257_v48 = vpop.f32.mrb[39].mxu1  ;;  %v1510_v2 = vmul.f32 %v7035_v45, %v8789_v37  ;;  %v1455_v10 = vpop.f32.mrb[55].mxu0 }
 0x246   :  { %v1325_v43 = vadd.f32 %v1309_v41, %v8722_v5  ;;  %v1310_v51 = vmul.f32 %v8785_v32, %v1257_v48  ;;  %v1508_v16 = vmul.f32 %v8789_v37, %v1455_v10 }
 0x247   :  { %v1328_v53 = vadd.f32 %v1312_v47, %v8724_v7  ;;  %v8838_v6 = vadd.f32 %v1509_v27, %v1327_v46 }
 0x248   :  { %v1326_v42 = vadd.f32 %v1310_v51, %v8729_v31  ;;  %v8841_v9 = vadd.f32 %v1507_v40, %v1325_v43 }
 0x249   :  { %v8843_v52 = vadd.f32 %v1510_v2, %v1328_v53 }
 0x24a   :  { %v8845_v54 = vadd.f32 %v1508_v16, %v1326_v42  ;;  %v7006_v39 = vpop.f32.mrb[40].mxu1  ;;  %v7038_v1 = vpop.f32.mrb[56].mxu0 }
 0x24b   :  { %v1315_v5 = vmul.f32 %v7006_v39, %v8785_v32  ;;  %v1270_v28 = vpop.f32.mrb[41].mxu1  ;;  %v1513_v41 = vmul.f32 %v7038_v1, %v8789_v37  ;;  %v1468_v12 = vpop.f32.mrb[57].mxu0 }
 0x24c   :  { %v1313_v7 = vmul.f32 %v8785_v32, %v1270_v28  ;;  %v7007_v27 = vpop.f32.mrb[42].mxu1  ;;  %v1511_v45 = vmul.f32 %v8789_v37, %v1468_v12  ;;  %v7039_v31 = vpop.f32.mrb[58].mxu0 }
 0x24d   :  { %v1331_v40 = vadd.f32 %v1315_v5, %v8747_v50  ;;  %v1316_v46 = vmul.f32 %v7007_v27, %v8785_v32  ;;  %v1273_v47 = vpop.f32.mrb[43].mxu1  ;;  %v1514_v48 = vmul.f32 %v7039_v31, %v8789_v37  ;;  %v1471_v2 = vpop.f32.mrb[59].mxu0 }
 0x24e   :  { %v1329_v10 = vadd.f32 %v1313_v7, %v8750_v55  ;;  %v1314_v43 = vmul.f32 %v8785_v32, %v1273_v47  ;;  %v1512_v51 = vmul.f32 %v8789_v37, %v1471_v2 }
 0x24f   :  { %v1332_v16 = vadd.f32 %v1316_v46, %v8752_v22  ;;  %v8858_v53 = vadd.f32 %v1513_v41, %v1331_v40  ;;  %v8870_v22 = vsub.s32 6, %v8140_v19  ;;  %v8873_v41 = vsub.s32 7, %v8140_v19 }
 0x250   :  { %v1330_v42 = vadd.f32 %v1314_v43, %v8757_v24  ;;  %v8861_v39 = vadd.f32 %v1511_v45, %v1329_v10 }
 0x251   :  { %v8863_v50 = vadd.f32 %v1514_v48, %v1332_v16 }
 0x252   :  { %v8865_v1 = vadd.f32 %v1512_v51, %v1330_v42  ;;  %v7010_v5 = vpop.f32.mrb[44].mxu1  ;;  %v7042_v28 = vpop.f32.mrb[60].mxu0 }
 0x253   :  { %v1319_v55 = vmul.f32 %v7010_v5, %v8785_v32  ;;  %v1286_v12 = vpop.f32.mrb[45].mxu1  ;;  %v1517_v7 = vmul.f32 %v7042_v28, %v8789_v37  ;;  %v1484_v27 = vpop.f32.mrb[61].mxu0  ;;  %v8888_v5 = vrot.slane %v8591_v59, %v8870_v22 }
 0x254   :  { %v1317_v24 = vmul.f32 %v8785_v32, %v1286_v12  ;;  %v7011_v45 = vpop.f32.mrb[46].mxu1  ;;  %v1515_v31 = vmul.f32 %v8789_v37, %v1484_v27  ;;  %v7043_v40 = vpop.f32.mrb[62].mxu0 }
 0x255   :  { %v1335_v46 = vadd.f32 %v1319_v55, %v8781_v11  ;;  %v1320_v47 = vmul.f32 %v7011_v45, %v8785_v32  ;;  %v1289_v48 = vpop.f32.mrb[47].mxu1  ;;  %v1518_v2 = vmul.f32 %v7043_v40, %v8789_v37  ;;  %v1487_v10 = vpop.f32.mrb[63].mxu0  ;;  %v8892_v11 = vrot.slane %v8591_v59, %v8873_v41 }
 0x256   :  { %v1333_v43 = vadd.f32 %v1317_v24, %v8792_v34  ;;  %v1318_v51 = vmul.f32 %v8785_v32, %v1289_v48  ;;  %v1516_v19 = vmul.f32 %v8789_v37, %v1487_v10 }
 0x257   :  { %v1336_v16 = vadd.f32 %v1320_v47, %v8794_v14  ;;  %v8884_v42 = vadd.f32 %v1517_v7, %v1335_v46 }
 0x258   :  { %v1334_v28 = vadd.f32 %v1318_v51, %v8799_v15  ;;  %v8895_v55 = vadd.f32 %v1515_v31, %v1333_v43 }
 0x259   :  { %v8897_v34 = vadd.f32 %v1518_v2, %v1336_v16 }
 0x25a   :  { %v8899_v32 = vadd.f32 %v1516_v19, %v1334_v28  ;;  %v7062_v37 = vpop.f32.mrb[48].mxu1  ;;  %v7094_v14 = vpop.f32.mrb[64].mxu0 }
 0x25b   :  { %v1703_v12 = vmul.f32 %v7062_v37, %v8888_v5  ;;  %v1634_v7 = vpop.f32.mrb[49].mxu1  ;;  %v1901_v27 = vmul.f32 %v7094_v14, %v8892_v11  ;;  %v1832_v24 = vpop.f32.mrb[65].mxu0 }
 0x25c   :  { %v1701_v45 = vmul.f32 %v8888_v5, %v1634_v7  ;;  %v7063_v59 = vpop.f32.mrb[50].mxu1  ;;  %v1899_v40 = vmul.f32 %v8892_v11, %v1832_v24  ;;  %v7095_v15 = vpop.f32.mrb[66].mxu0 }
 0x25d   :  { %v1719_v31 = vadd.f32 %v1703_v12, %v8817_v8  ;;  %v1704_v46 = vmul.f32 %v7063_v59, %v8888_v5  ;;  %v1637_v47 = vpop.f32.mrb[51].mxu1  ;;  %v1902_v48 = vmul.f32 %v7095_v15, %v8892_v11  ;;  %v1835_v2 = vpop.f32.mrb[67].mxu0 }
 0x25e   :  { %v1717_v10 = vadd.f32 %v1701_v45, %v8820_v33  ;;  %v1702_v43 = vmul.f32 %v8888_v5, %v1637_v47  ;;  %v1900_v51 = vmul.f32 %v8892_v11, %v1835_v2 }
 0x25f   :  { %v1720_v19 = vadd.f32 %v1704_v46, %v8822_v13  ;;  %v8912_v16 = vadd.f32 %v1901_v27, %v1719_v31 }
 0x260   :  { %v1718_v28 = vadd.f32 %v1702_v43, %v8824_v44  ;;  %v8915_v37 = vadd.f32 %v1899_v40, %v1717_v10 }
 0x261   :  { %v8917_v8 = vadd.f32 %v1902_v48, %v1720_v19 }
 0x262   :  { %v8919_v14 = vadd.f32 %v1900_v51, %v1718_v28  ;;  %v7066_v12 = vpop.f32.mrb[52].mxu1  ;;  %v7098_v7 = vpop.f32.mrb[68].mxu0 }
 0x263   :  { %v1707_v33 = vmul.f32 %v7066_v12, %v8888_v5  ;;  %v1650_v24 = vpop.f32.mrb[53].mxu1  ;;  %v1905_v45 = vmul.f32 %v7098_v7, %v8892_v11  ;;  %v1848_v59 = vpop.f32.mrb[69].mxu0 }
 0x264   :  { %v1705_v13 = vmul.f32 %v8888_v5, %v1650_v24  ;;  %v7067_v27 = vpop.f32.mrb[54].mxu1  ;;  %v1903_v15 = vmul.f32 %v8892_v11, %v1848_v59  ;;  %v7099_v44 = vpop.f32.mrb[70].mxu0 }
 0x265   :  { %v1723_v40 = vadd.f32 %v1707_v33, %v8838_v6  ;;  %v1708_v31 = vmul.f32 %v7067_v27, %v8888_v5  ;;  %v1653_v46 = vpop.f32.mrb[55].mxu1  ;;  %v1906_v47 = vmul.f32 %v7099_v44, %v8892_v11  ;;  %v1851_v48 = vpop.f32.mrb[71].mxu0 }
 0x266   :  { %v1721_v2 = vadd.f32 %v1705_v13, %v8841_v9  ;;  %v1706_v10 = vmul.f32 %v8888_v5, %v1653_v46  ;;  %v1904_v43 = vmul.f32 %v8892_v11, %v1851_v48 }
 0x267   :  { %v1724_v51 = vadd.f32 %v1708_v31, %v8843_v52  ;;  %v8932_v19 = vadd.f32 %v1905_v45, %v1723_v40 }
 0x268   :  { %v1722_v28 = vadd.f32 %v1706_v10, %v8845_v54  ;;  %v8935_v12 = vadd.f32 %v1903_v15, %v1721_v2 }
 0x269   :  { %v8937_v6 = vadd.f32 %v1906_v47, %v1724_v51 }
 0x26a   :  { %v8939_v7 = vadd.f32 %v1904_v43, %v1722_v28  ;;  %v7070_v33 = vpop.f32.mrb[56].mxu1  ;;  %v7102_v24 = vpop.f32.mrb[72].mxu0 }
 0x26b   :  { %v1711_v9 = vmul.f32 %v7070_v33, %v8888_v5  ;;  %v1666_v59 = vpop.f32.mrb[57].mxu1  ;;  %v1909_v13 = vmul.f32 %v7102_v24, %v8892_v11  ;;  %v1864_v27 = vpop.f32.mrb[73].mxu0 }
 0x26c   :  { %v1709_v52 = vmul.f32 %v8888_v5, %v1666_v59  ;;  %v7071_v45 = vpop.f32.mrb[58].mxu1  ;;  %v1907_v44 = vmul.f32 %v8892_v11, %v1864_v27  ;;  %v7103_v54 = vpop.f32.mrb[74].mxu0 }
 0x26d   :  { %v1727_v15 = vadd.f32 %v1711_v9, %v8858_v53  ;;  %v1712_v40 = vmul.f32 %v7071_v45, %v8888_v5  ;;  %v1669_v31 = vpop.f32.mrb[59].mxu1  ;;  %v1910_v46 = vmul.f32 %v7103_v54, %v8892_v11  ;;  %v1867_v47 = vpop.f32.mrb[75].mxu0 }
 0x26e   :  { %v1725_v48 = vadd.f32 %v1709_v52, %v8861_v39  ;;  %v1710_v2 = vmul.f32 %v8888_v5, %v1669_v31  ;;  %v1908_v10 = vmul.f32 %v8892_v11, %v1867_v47 }
 0x26f   :  { %v1728_v43 = vadd.f32 %v1712_v40, %v8863_v50  ;;  %v8952_v51 = vadd.f32 %v1909_v13, %v1727_v15 }
 0x270   :  { %v1726_v28 = vadd.f32 %v1710_v2, %v8865_v1  ;;  %v8955_v33 = vadd.f32 %v1907_v44, %v1725_v48  ;;  %v44_v44 = vld [vmem:[%s10120_s2 + $0x8] sm:$0xff] }
 0x271   :  { %v8957_v53 = vadd.f32 %v1910_v46, %v1728_v43 }
 0x272   :  { %v8959_v24 = vadd.f32 %v1908_v10, %v1726_v28  ;;  %v7074_v9 = vpop.f32.mrb[60].mxu1  ;;  %v7106_v59 = vpop.f32.mrb[76].mxu0 }
 0x273   :  { %v1715_v39 = vmul.f32 %v7074_v9, %v8888_v5  ;;  %v1682_v27 = vpop.f32.mrb[61].mxu1  ;;  %v1913_v52 = vmul.f32 %v7106_v59, %v8892_v11  ;;  %v1880_v45 = vpop.f32.mrb[77].mxu0  ;;  %v8978_v9 = vrot.slane %v44_v44, %v8143_v20 }
 0x274   :  { %v1713_v50 = vmul.f32 %v8888_v5, %v1682_v27  ;;  %v7075_v13 = vpop.f32.mrb[62].mxu1  ;;  %v1911_v54 = vmul.f32 %v8892_v11, %v1880_v45  ;;  %v7107_v1 = vpop.f32.mrb[78].mxu0 }
 0x275   :  { %v1731_v15 = vadd.f32 %v1715_v39, %v8884_v42  ;;  %v1716_v40 = vmul.f32 %v7075_v13, %v8888_v5  ;;  %v1685_v31 = vpop.f32.mrb[63].mxu1  ;;  %v1914_v46 = vmul.f32 %v7107_v1, %v8892_v11  ;;  %v1883_v47 = vpop.f32.mrb[79].mxu0 }
 0x276   :  { %v1729_v48 = vadd.f32 %v1713_v50, %v8895_v55  ;;  %v1714_v2 = vmul.f32 %v8888_v5, %v1685_v31  ;;  %v1912_v10 = vmul.f32 %v8892_v11, %v1883_v47  ;;  %v8991_v11 = vld [vmem:[%s10121_s3] sm:$0xff] }
 0x277   :  { %v1732_v43 = vadd.f32 %v1716_v40, %v8897_v34  ;;  %v8975_v28 = vadd.f32 %v1913_v52, %v1731_v15  ;;  %v8995_v34 = vrot.slane %v8991_v11, %v8586_v58 }
 0x278   :  { %v1730_v42 = vadd.f32 %v1714_v2, %v8899_v32  ;;  %v8981_v59 = vadd.f32 %v1911_v54, %v1729_v48 }
 0x279   :  { %v8983_v39 = vadd.f32 %v1914_v46, %v1732_v43 }
 0x27a   :  { %v8985_v27 = vadd.f32 %v1912_v10, %v1730_v42  ;;  %v7126_v55 = vpop.f32.mrb[64].mxu1 }
 0x27b   :  { %v2099_v5 = vmul.f32 %v7126_v55, %v8978_v9  ;;  %v2030_v45 = vpop.f32.mrb[65].mxu1 }
 0x27c   :  { %v2097_v32 = vmul.f32 %v8978_v9, %v2030_v45  ;;  %v7127_v52 = vpop.f32.mrb[66].mxu1 }
 0x27d   :  { %v2115_v50 = vadd.f32 %v2099_v5, %v8912_v16  ;;  %v2100_v13 = vmul.f32 %v7127_v52, %v8978_v9  ;;  %v2033_v54 = vpop.f32.mrb[67].mxu1 }
 0x27e   :  { %v2113_v1 = vadd.f32 %v2097_v32, %v8915_v37  ;;  %v2098_v44 = vmul.f32 %v8978_v9, %v2033_v54 }
 0x27f   :  { %v2116_v15 = vadd.f32 %v2100_v13, %v8917_v8  ;;  %v9015_v37 = vadd.f32 %v8995_v34, %v2115_v50 }
 0x280   :  { %v9004_v40 = vadd.f32 %v8995_v34, %v2113_v1  ;;  %v2114_v31 = vadd.f32 %v2098_v44, %v8919_v14 }
 0x281   :  { %v9008_v46 = vadd.f32 %v8995_v34, %v2116_v15  ;;  %v2151_v54 = vmax.f32 %v9015_v37, 0.0 }
 0x282   :  { %v9011_v47 = vadd.f32 %v8995_v34, %v2114_v31  ;;  %v7130_v16 = vpop.f32.mrb[68].mxu1  ;;  %v2149_v8 = vmax.f32 %v9004_v40, 0.0 }
 0x283   :  { %v2103_v48 = vmul.f32 %v7130_v16, %v8978_v9  ;;  %v2046_v2 = vpop.f32.mrb[69].mxu1  ;;  %v2152_v45 = vmax.f32 %v9008_v46, 0.0 }
 0x284   :  { %v2150_v10 = vmax.f32 %v9011_v47, 0.0  ;;  %v2101_v43 = vmul.f32 %v8978_v9, %v2046_v2  ;;  %v7131_v14 = vpop.f32.mrb[70].mxu1 }
 0x285   :  { %v2119_v42 = vadd.f32 %v2103_v48, %v8932_v19  ;;  %v2104_v55 = vmul.f32 %v7131_v14, %v8978_v9  ;;  %v2049_v5 = vpop.f32.mrb[71].mxu1  ;;  %v2166_v44 = vpack.c.bf16 %v2152_v45, %v2151_v54 }
 0x286   :  { %v2165_v32 = vpack.c.bf16 %v2150_v10, %v2149_v8  ;;  %v2117_v52 = vadd.f32 %v2101_v43, %v8935_v12  ;;  %v2102_v50 = vmul.f32 %v8978_v9, %v2049_v5 }
 0x287   :  { %v2120_v13 = vadd.f32 %v2104_v55, %v8937_v6 }
 0x288   :  { %v9032_v19 = vadd.f32 %v8995_v34, %v2117_v52  ;;  %v2118_v1 = vadd.f32 %v2102_v50, %v8939_v7  ;;  %7141 = vmatpush3.bf16.msra.mxu0 %v2165_v32  ;;  %v9048_v7 = vadd.f32 %v8995_v34, %v2119_v42 }
 0x289   :  { %7142 = vmatprep.subr.bf16.mxu0 %v10134_v25  ;;  %v9041_v12 = vadd.f32 %v8995_v34, %v2120_v13 }
 0x28a   :  { %v9044_v6 = vadd.f32 %v8995_v34, %v2118_v1  ;;  %v7134_v15 = vpop.f32.mrb[72].mxu1  ;;  %v2153_v48 = vmax.f32 %v9032_v19, 0.0 }
 0x28b   :  { %v2107_v31 = vmul.f32 %v7134_v15, %v8978_v9  ;;  %v2062_v16 = vpop.f32.mrb[73].mxu1  ;;  %v2156_v52 = vmax.f32 %v9041_v12, 0.0 }
 0x28c   :  { %v10130_v2 = vmax.f32 %v9044_v6, 0.0  ;;  %v2105_v43 = vmul.f32 %v8978_v9, %v2062_v16  ;;  %v7135_v14 = vpop.f32.mrb[74].mxu1  ;;  %7143 = vmatpush3.bf16.msra.mxu0 %v2166_v44  ;;  %v10138_v47 = vmax.f32 %v9044_v6, 0.0 }
 0x28d   :  { %v2123_v55 = vadd.f32 %v2107_v31, %v8952_v51  ;;  %v2108_v5 = vmul.f32 %v7135_v14, %v8978_v9  ;;  %v2065_v32 = vpop.f32.mrb[75].mxu1  ;;  %7144 = vmatprep.subr.bf16.mxu0 %v10134_v25  ;;  %v2155_v51 = vmax.f32 %v9048_v7, 0.0 }
 0x28e   :  { %v2167_v42 = vpack.c.bf16 %v10130_v2, %v2153_v48  ;;  %v2121_v50 = vadd.f32 %v2105_v43, %v8955_v33  ;;  %v2106_v13 = vmul.f32 %v8978_v9, %v2065_v32 }
 0x28f   :  { %v2124_v1 = vadd.f32 %v2108_v5, %v8957_v53  ;;  %v2168_v31 = vpack.c.bf16 %v2156_v52, %v2155_v51 }
 0x290   :  { %v9066_v44 = vadd.f32 %v8995_v34, %v2121_v50  ;;  %v2122_v15 = vadd.f32 %v2106_v13, %v8959_v24  ;;  %7145 = vmatpush3.bf16.msra.mxu0 %v2167_v42  ;;  %v9082_v24 = vadd.f32 %v8995_v34, %v2123_v55 }
 0x291   :  { %7146 = vmatprep.subr.bf16.mxu0 %v10134_v25  ;;  %v9075_v33 = vadd.f32 %v8995_v34, %v2124_v1 }
 0x292   :  { %v9078_v53 = vadd.f32 %v8995_v34, %v2122_v15  ;;  %v7138_v16 = vpop.f32.mrb[76].mxu1  ;;  %v2157_v5 = vmax.f32 %v9066_v44, 0.0 }
 0x293   :  { %v2111_v43 = vmul.f32 %v7138_v16, %v8978_v9  ;;  %v2078_v14 = vpop.f32.mrb[77].mxu1  ;;  %v2160_v16 = vmax.f32 %v9075_v33, 0.0 }
 0x294   :  { %v10131_v32 = vmax.f32 %v9078_v53, 0.0  ;;  %v2109_v42 = vmul.f32 %v8978_v9, %v2078_v14  ;;  %v7139_v50 = vpop.f32.mrb[78].mxu1  ;;  %7147 = vmatpush3.bf16.msra.mxu0 %v2168_v31  ;;  %v10139_v6 = vmax.f32 %v9078_v53, 0.0 }
 0x295   :  { %v2127_v13 = vadd.f32 %v2111_v43, %v8975_v28  ;;  %v2112_v1 = vmul.f32 %v7139_v50, %v8978_v9  ;;  %v2081_v15 = vpop.f32.mrb[79].mxu1  ;;  %7148 = vmatprep.subr.bf16.mxu0 %v10134_v25  ;;  %v2159_v28 = vmax.f32 %v9082_v24, 0.0 }
 0x296   :  { %v2169_v55 = vpack.c.bf16 %v10131_v32, %v2157_v5  ;;  %v2125_v2 = vadd.f32 %v2109_v42, %v8981_v59  ;;  %v2110_v14 = vmul.f32 %v8978_v9, %v2081_v15 }
 0x297   :  { %v2128_v31 = vadd.f32 %v2112_v1, %v8983_v39  ;;  %v2170_v32 = vpack.c.bf16 %v2160_v16, %v2159_v28  ;;  %v9115_v39 = vadd.f32 %v8995_v34, %v2127_v13  ;;  %v7851_v13 = vld [vmem:[%s10119_s1 + $0x78] sm:$0xff]  }
 0x298   :  { %v9100_v43 = vadd.f32 %v8995_v34, %v2125_v2  ;;  %v2126_v50 = vadd.f32 %v2110_v14, %v8985_v27  ;;  %7149 = vmatpush3.bf16.msra.mxu0 %v2169_v55  ;;  %7175 = vmatpush3.bf16.msra.mxu1 %v7851_v13  ;;  %v7852_v55 = vld [vmem:[%s10119_s1 + $0x80] sm:$0xff]   ;;  %v7853_v14 = vld [vmem:[%s10119_s1 + $0x88] sm:$0xff]  }
 0x299   :  { %7150 = vmatprep.subr.bf16.mxu0 %v10134_v25  ;;  %v9109_v59 = vadd.f32 %v8995_v34, %v2128_v31  ;;  %v10137_v15 = vmax.f32 %v9115_v39, 0.0  ;;  %v7854_v31 = vld [vmem:[%s10119_s1 + $0x90] sm:$0xff]   ;;  %v10140_v24 = vmax.f32 %v9115_v39, 0.0 }
 0x29a   :  { %v9112_v9 = vadd.f32 %v8995_v34, %v2126_v50  ;;  %v10133_v2 = vmax.f32 %v9100_v43, 0.0  ;;  %v7855_v50 = vld [vmem:[%s10119_s1 + $0x98] sm:$0xff]   ;;  %v10142_v44 = vmax.f32 %v9100_v43, 0.0  ;;  %v2663_v43 = vrot.slane %v8991_v11, %v8763_v38 }
 0x29b   :  { %v10136_v42 = vmax.f32 %v9109_v59, 0.0  ;;  %v10141_v33 = vmax.f32 %v9109_v59, 0.0  ;;  %v7883_v59 = vld [vmem:[%s10119_s1 + $0x138] sm:$0xff]  }
 0x29c   :  { %v10132_v27 = vmax.f32 %v9112_v9, 0.0  ;;  %7151 = vmatpush3.bf16.msra.mxu0 %v2170_v32  ;;  %v2173_v32 = vld [vmem:[%s10125_s7] sm:$0x1]  ;;  %v10143_v53 = vmax.f32 %v9112_v9, 0.0 }
 0x29d   :  { %7152 = vmatprep.subr.bf16.mxu0 %v10134_v25  ;;  %v2172_v34 = vpack.c.bf16 %v10136_v42, %v10137_v15 }
 0x29e   :  { %v2171_v1 = vpack.c.bf16 %v10132_v27, %v10133_v2 }
 0x2a0   :  { %7153 = vmatpush3.bf16.msra.mxu0 %v2171_v1  ;;  %v7856_v1 = vld [vmem:[%s10119_s1 + $0xa0] sm:$0xff]  }
 0x2a1   :  { %7154 = vmatprep.subr.bf16.mxu0 %v10134_v25 }
 0x2a4   :  { %7155 = vmatpush3.bf16.msra.mxu0 %v2172_v34  ;;  %v7857_v34 = vld [vmem:[%s10119_s1 + $0xa8] sm:$0xff]  }
 0x2a5   :  { %7180 = vmatprep.subr.bf16.mxu0 %v10134_v25 }
 0x2a7   :  { %7157 = vmatmul.mubr.bf16.vlgmr.msra.gmra.mrb[80].mxu0 %v2173_v32 }
 0x2a8   :  { %7196 = vmatprep.mubr.msk.bf16.mxu0 %vm8024_vm0, %v10134_v25  ;;  %7181 = vmatpush3.bf16.msra.mxu0 %v7852_v55 }
 0x2a9   :  { %7182 = vmatprep.subr.bf16.mxu0 %v10134_v25 }
 0x2ac   :  { %7183 = vmatpush3.bf16.msra.mxu0 %v7853_v14 }
 0x2ad   :  { %7184 = vmatprep.subr.bf16.mxu0 %v10134_v25 }
 0x2b0   :  { %7185 = vmatpush3.bf16.msra.mxu0 %v7854_v31 }
 0x2b1   :  { %7186 = vmatprep.subr.bf16.mxu0 %v10134_v25 }
 0x2b4   :  { %7187 = vmatpush3.bf16.msra.mxu0 %v7855_v50  ;;  %v7858_v50 = vld [vmem:[%s10119_s1 + $0xb0] sm:$0xff]  }
 0x2b5   :  { %7188 = vmatprep.subr.bf16.mxu0 %v10134_v25 }
 0x2b8   :  { %7189 = vmatpush3.bf16.msra.mxu0 %v7856_v1  ;;  %v7859_v1 = vld [vmem:[%s10119_s1 + $0xb8] sm:$0xff]  }
 0x2b9   :  { %7190 = vmatprep.subr.bf16.mxu0 %v10134_v25 }
 0x2bc   :  { %7191 = vmatpush3.bf16.msra.mxu0 %v7857_v34  ;;  %v2234_v34 = vrot.slane %v8991_v11, %v8654_v49 }
 0x2bd   :  { %7192 = vmatprep.subr.bf16.mxu0 %v10134_v25 }
 0x2c0   :  { %7193 = vmatpush3.bf16.msra.mxu0 %v7858_v50  ;;  %v7860_v50 = vld [vmem:[%s10126_s8] sm:$0xff]  }
 0x2c1   :  { %7194 = vmatprep.subr.bf16.mxu0 %v10134_v25 }
 0x2c4   :  { %7195 = vmatpush3.bf16.msra.mxu0 %v7859_v1  ;;  %v2344_v1 = vrot.slane %v8991_v11, %v8657_v36 }
 0x37a   :  { %v2208_v32 = vpop.f32.mrb[80].mxu0 }
 0x37b   :  { %v2214_v13 = vpack.c.bf16 %v2208_v32, %v2208_v32  ;;  %v7158_v55 = vpop.f32.mrb[81].mxu0 }
 0x37c   :  { %v2211_v14 = vpop.f32.mrb[82].mxu0 }
 0x37d   :  { %v7159_v31 = vpop.f32.mrb[83].mxu0  ;;  %7177 = vmatmul.mubr.bf16.vlgmr.msra.gmra.mrb[80].mxu1 %v2214_v13 }
 0x37e   :  { %7202 = vmatprep.mubr.msk.bf16.mxu1 %vm2494_vm1, %v7860_v50 }
 0x450   :  { %v2317_v32 = vpop.f32.mrb[80].mxu1 }
 0x451   :  { %v2318_v55 = vadd.f32 %v2317_v32, %v2234_v34  ;;  %v7178_v14 = vpop.f32.mrb[81].mxu1 }
 0x452   :  { %v2320_v31 = vpop.f32.mrb[82].mxu1 }
 0x453   :  { %v2323_v13 = vmax.f32 %v2318_v55, 0.0  ;;  %v7179_v27 = vpop.f32.mrb[83].mxu1 }
 0x455   :  { %v2324_v2 = vpack.c.bf16 %v2323_v13, %v2323_v13  ;;  %v7868_v13 = vld [vmem:[%s10119_s1 + $0xc0] sm:$0xff]  }
 0x457   :  { %7197 = vmatmul.mubr.bf16.vlgmr.msra.gmra.mrb[84].mxu0 %v2324_v2 }
 0x52a   :  { %v2427_v25 = vpop.f32.mrb[84].mxu0 }
 0x52b   :  { %v2428_v42 = vadd.f32 %v2427_v25, %v2344_v1  ;;  %v7198_v15 = vpop.f32.mrb[85].mxu0  ;;  %v7861_v25 = vld [vmem:[%s10126_s8 + $0x8] sm:$0xff]   ;;  %v7870_v1 = vld [vmem:[%s10119_s1 + $0xd0] sm:$0xff]  }
 0x52c   :  { %v2430_v34 = vpop.f32.mrb[86].mxu0  ;;  %v7869_v15 = vld [vmem:[%s10119_s1 + $0xc8] sm:$0xff]  }
 0x52d   :  { %v2433_v32 = vadd.f32 3.0, %v2428_v42  ;;  %v7199_v14 = vpop.f32.mrb[87].mxu0  ;;  %v7862_v42 = vld [vmem:[%s10126_s8 + $0x10] sm:$0xff]   ;;  %v7863_v34 = vld [vmem:[%s10126_s8 + $0x18] sm:$0xff]  }
 0x52e   :  { %v7871_v14 = vld [vmem:[%s10119_s1 + $0xd8] sm:$0xff]  }
 0x52f   :  { %v2434_v55 = vmax.f32 %v2433_v32, 0.0  ;;  %v7864_v32 = vld [vmem:[%s10126_s8 + $0x20] sm:$0xff]  }
 0x531   :  { %v2435_v27 = vmin.f32 %v2434_v55, 6.0  ;;  %v7872_v55 = vld [vmem:[%s10119_s1 + $0xe0] sm:$0xff]  }
 0x533   :  { %v2436_v31 = vmul.f32 0.16666667, %v2435_v27  ;;  %v7865_v27 = vld [vmem:[%s10126_s8 + $0x28] sm:$0xff]  }
 0x535   :  { %v2453_v2 = vpack.c.bf16 %v2436_v31, %v2436_v31  ;;  %v7866_v31 = vld [vmem:[%s10126_s8 + $0x30] sm:$0xff]  }
 0x537   :  { %7750 = vmatprep.subr.msk.bf16.mxu1 %vm2519_vm2, %v2453_v2  ;;  %v2521_v50 = vsel %vm2519_vm2, %v2453_v2, 0  ;;  %v7873_v2 = vld [vmem:[%s10119_s1 + $0xe8] sm:$0xff]  }
 0x538   :  { %7201 = vmatpush3.bf16.msra.mxu1 %v2521_v50  ;;  %v7874_v50 = vld [vmem:[%s10119_s1 + $0xf0] sm:$0xff]  }
 0x539   :  { %7218 = vmatprep.subr.bf16.mxu1 %v7868_v13 }
 0x53b   :  { %7203 = vmatmul.mubr.msk.bf16.vlgmr.msra.gmra.mrb[84].mxu1 %vm2494_vm1, %v7861_v25  ;;  %v7875_v25 = vld [vmem:[%s10119_s1 + $0xf8] sm:$0xff]  }
 0x53c   :  { %7206 = vmatprep.mubr.msk.bf16.mxu1 %vm2494_vm1, %v7862_v42  ;;  %7219 = vmatpush3.bf16.msra.mxu1 %v7868_v13  ;;  %v7867_v13 = vld [vmem:[%s10126_s8 + $0x38] sm:$0xff]   ;;  %v7876_v42 = vld [vmem:[%s10119_s1 + $0x100] sm:$0xff]  }
 0x53d   :  { %7220 = vmatprep.subr.bf16.mxu1 %v7869_v15  ;;  %7250 = vmatprep.subr.bf16.mxu0 %v7876_v42 }
 0x53e   :  { %7251 = vmatpush3.bf16.msra.mxu0 %v7876_v42 }
 0x540   :  { %7221 = vmatpush3.bf16.msra.mxu1 %v7869_v15  ;;  %v7877_v15 = vld [vmem:[%s10119_s1 + $0x108] sm:$0xff]  }
 0x541   :  { %7222 = vmatprep.subr.bf16.mxu1 %v7870_v1  ;;  %7252 = vmatprep.subr.bf16.mxu0 %v7877_v15 }
 0x542   :  { %7253 = vmatpush3.bf16.msra.mxu0 %v7877_v15 }
 0x543   :  { %7207 = vmatmul.mubr.msk.bf16.gmra.mrb[88].mxu1 %vm2494_vm1, %v7863_v34  ;;  %v7879_v34 = vld [vmem:[%s10119_s1 + $0x118] sm:$0xff]  }
 0x544   :  { %7210 = vmatprep.mubr.msk.bf16.mxu1 %vm2494_vm1, %v7864_v32  ;;  %7223 = vmatpush3.bf16.msra.mxu1 %v7870_v1  ;;  %v7878_v1 = vld [vmem:[%s10119_s1 + $0x110] sm:$0xff]   ;;  %v7880_v32 = vld [vmem:[%s10119_s1 + $0x120] sm:$0xff]  }
 0x545   :  { %7224 = vmatprep.subr.bf16.mxu1 %v7871_v14  ;;  %7254 = vmatprep.subr.bf16.mxu0 %v7878_v1 }
 0x546   :  { %7255 = vmatpush3.bf16.msra.mxu0 %v7878_v1 }
 0x547   :  { %7256 = vmatprep.subr.bf16.mxu0 %v7879_v34 }
 0x548   :  { %7225 = vmatpush3.bf16.msra.mxu1 %v7871_v14  ;;  %v7881_v14 = vld [vmem:[%s10119_s1 + $0x128] sm:$0xff]  }
 0x549   :  { %7226 = vmatprep.subr.bf16.mxu1 %v7872_v55 }
 0x54a   :  { %7257 = vmatpush3.bf16.msra.mxu0 %v7879_v34 }
 0x54b   :  { %7211 = vmatmul.mubr.msk.bf16.gmra.mrb[92].mxu1 %vm2494_vm1, %v7865_v27  ;;  %7258 = vmatprep.subr.bf16.mxu0 %v7880_v32 }
 0x54c   :  { %7214 = vmatprep.mubr.msk.bf16.mxu1 %vm2494_vm1, %v7866_v31  ;;  %7227 = vmatpush3.bf16.msra.mxu1 %v7872_v55 }
 0x54d   :  { %7228 = vmatprep.subr.bf16.mxu1 %v7873_v2 }
 0x54e   :  { %7259 = vmatpush3.bf16.msra.mxu0 %v7880_v32 }
 0x54f   :  { %7260 = vmatprep.subr.bf16.mxu0 %v7881_v14 }
 0x550   :  { %7229 = vmatpush3.bf16.msra.mxu1 %v7873_v2 }
 0x551   :  { %7230 = vmatprep.subr.bf16.mxu1 %v7874_v50 }
 0x552   :  { %7261 = vmatpush3.bf16.msra.mxu0 %v7881_v14 }
 0x553   :  { %7215 = vmatmul.mubr.msk.bf16.gmra.mrb[96].mxu1 %vm2494_vm1, %v7867_v13 }
 0x554   :  { %7231 = vmatpush3.bf16.msra.mxu1 %v7874_v50 }
 0x555   :  { %7232 = vmatprep.subr.bf16.mxu1 %v7875_v25 }
 0x558   :  { %7233 = vmatpush3.bf16.msra.mxu1 %v7875_v25 }
 0x60e   :  { %v7204_v55 = vpop.f32.mrb[84].mxu1 }
 0x60f   :  { %v2557_v27 = vpop.f32.mrb[85].mxu1  ;;  %v2622_v2 = vmul.f32 %v7204_v55, %v2151_v54 }
 0x610   :  { %v7205_v31 = vpop.f32.mrb[86].mxu1  ;;  %v2620_v25 = vmul.f32 %v2557_v27, %v2149_v8 }
 0x611   :  { %v2623_v13 = vmul.f32 %v7205_v31, %v2152_v45  ;;  %v2560_v50 = vpop.f32.mrb[87].mxu1 }
 0x612   :  { %v2621_v42 = vmul.f32 %v2560_v50, %v2150_v10 }
 0x613   :  { %v2637_v15 = vpack.c.bf16 %v2623_v13, %v2622_v2 }
 0x614   :  { %v2636_v1 = vpack.c.bf16 %v2621_v42, %v2620_v25 }
 0x616   :  { %v7208_v34 = vpop.f32.mrb[88].mxu1  ;;  %7234 = vmatprep.mubr.bf16.mxu1 %v2636_v1 }
 0x617   :  { %v2573_v32 = vpop.f32.mrb[89].mxu1  ;;  %7235 = vmatmul.mubr.bf16.vlgmr.msra.gmra.mrb[100].mxu1 %v2637_v15  ;;  %v2626_v37 = vmul.f32 %v7208_v34, %v2155_v51 }
 0x618   :  { %v7209_v14 = vpop.f32.mrb[90].mxu1  ;;  %v2624_v40 = vmul.f32 %v2573_v32, %v2153_v48  ;;  %v7882_v32 = vld [vmem:[%s10119_s1 + $0x130] sm:$0xff]  }
 0x619   :  { %v2627_v46 = vmul.f32 %v7209_v14, %v2156_v52  ;;  %v2576_v45 = vpop.f32.mrb[91].mxu1  ;;  %7262 = vmatprep.subr.bf16.mxu0 %v7882_v32 }
 0x61a   :  { %v2625_v8 = vmul.f32 %v2576_v45, %v10138_v47  ;;  %7263 = vmatpush3.bf16.msra.mxu0 %v7882_v32 }
 0x61b   :  { %v2639_v10 = vpack.c.bf16 %v2627_v46, %v2626_v37  ;;  %7264 = vmatprep.subr.bf16.mxu0 %v7883_v59 }
 0x61c   :  { %v2638_v54 = vpack.c.bf16 %v2625_v8, %v2624_v40 }
 0x61e   :  { %v7212_v55 = vpop.f32.mrb[92].mxu1  ;;  %7238 = vmatprep.mubr.bf16.mxu1 %v2638_v54  ;;  %7265 = vmatpush3.bf16.msra.mxu0 %v7883_v59 }
 0x61f   :  { %v2589_v27 = vpop.f32.mrb[93].mxu1  ;;  %7239 = vmatmul.mubr.bf16.gmra.mrb[104].mxu1 %v2639_v10  ;;  %v2630_v7 = vmul.f32 %v7212_v55, %v2159_v28 }
 0x620   :  { %v7213_v31 = vpop.f32.mrb[94].mxu1  ;;  %v2628_v19 = vmul.f32 %v2589_v27, %v2157_v5 }
 0x621   :  { %v2631_v12 = vmul.f32 %v7213_v31, %v2160_v16  ;;  %v2592_v52 = vpop.f32.mrb[95].mxu1 }
 0x622   :  { %v2629_v48 = vmul.f32 %v2592_v52, %v10139_v6 }
 0x623   :  { %v2641_v51 = vpack.c.bf16 %v2631_v12, %v2630_v7 }
 0x624   :  { %v2640_v2 = vpack.c.bf16 %v2629_v48, %v2628_v19 }
 0x626   :  { %v7216_v13 = vpop.f32.mrb[96].mxu1  ;;  %7242 = vmatprep.mubr.bf16.mxu1 %v2640_v2 }
 0x627   :  { %v2605_v50 = vpop.f32.mrb[97].mxu1  ;;  %7243 = vmatmul.mubr.bf16.gmra.mrb[108].mxu1 %v2641_v51  ;;  %v2634_v28 = vmul.f32 %v7216_v13, %v10140_v24 }
 0x628   :  { %v7217_v25 = vpop.f32.mrb[98].mxu1  ;;  %v2632_v5 = vmul.f32 %v2605_v50, %v10142_v44 }
 0x629   :  { %v2635_v16 = vmul.f32 %v7217_v25, %v10141_v33  ;;  %v2608_v42 = vpop.f32.mrb[99].mxu1 }
 0x62a   :  { %v2633_v15 = vmul.f32 %v2608_v42, %v10143_v53 }
 0x62b   :  { %v2643_v1 = vpack.c.bf16 %v2635_v16, %v2634_v28 }
 0x62c   :  { %v2642_v34 = vpack.c.bf16 %v2633_v15, %v2632_v5 }
 0x62e   :  { %7246 = vmatprep.mubr.bf16.mxu1 %v2642_v34 }
 0x62f   :  { %7247 = vmatmul.mubr.bf16.gmra.mrb[112].mxu1 %v2643_v1 }
 0x6ea   :  { %v7236_v9 = vpop.f32.mrb[100].mxu1 }
 0x6eb   :  { %v2755_v39 = vadd.f32 %v7236_v9, %v2663_v43  ;;  %v2746_v14 = vpop.f32.mrb[101].mxu1 }
 0x6ec   :  { %v2747_v37 = vadd.f32 %v2746_v14, %v2663_v43  ;;  %v7237_v46 = vpop.f32.mrb[102].mxu1 }
 0x6ed   :  { %v2758_v45 = vadd.f32 %v7237_v46, %v2663_v43  ;;  %v2749_v40 = vpop.f32.mrb[103].mxu1  ;;  %v2811_v8 = vadd.f32 %v2755_v39, %v8165_v0 }
 0x6ee   :  { %v2750_v47 = vadd.f32 %v2749_v40, %v2663_v43  ;;  %v2809_v54 = vadd.f32 %v2747_v37, %v8159_v57  ;;  %v7884_v40 = vld [vmem:[%s10123_s5] sm:$0xff]  }
 0x6ef   :  { %v2812_v10 = vadd.f32 %v2758_v45, %v8161_v60  ;;  %7298 = vmatprep.mubr.bf16.mxu1 %v7884_v40 }
 0x6f0   :  { %v2810_v55 = vadd.f32 %v2750_v47, %v8163_v61 }
 0x6f1   :  { %v2826_v27 = vpack.c.bf16 %v2812_v10, %v2811_v8 }
 0x6f2   :  { %v7240_v31 = vpop.f32.mrb[104].mxu1  ;;  %v2825_v7 = vpack.c.bf16 %v2810_v55, %v2809_v54 }
 0x6f3   :  { %v2771_v12 = vadd.f32 %v7240_v31, %v2663_v43  ;;  %v2762_v52 = vpop.f32.mrb[105].mxu1 }
 0x6f4   :  { %v2763_v19 = vadd.f32 %v2762_v52, %v2663_v43  ;;  %v7241_v6 = vpop.f32.mrb[106].mxu1  ;;  %7266 = vmatprep.mubr.bf16.mxu0 %v2825_v7 }
 0x6f5   :  { %v2774_v48 = vadd.f32 %v7241_v6, %v2663_v43  ;;  %v2765_v51 = vpop.f32.mrb[107].mxu1  ;;  %7267 = vmatmul.mubr.bf16.vlgmr.msra.gmra.mrb[88].mxu0 %v2826_v27  ;;  %v2815_v0 = vadd.f32 %v2771_v12, %v8193_v35 }
 0x6f6   :  { %v2766_v2 = vadd.f32 %v2765_v51, %v2663_v43  ;;  %v2813_v57 = vadd.f32 %v2763_v19, %v8185_v26 }
 0x6f7   :  { %v2816_v60 = vadd.f32 %v2774_v48, %v8187_v29 }
 0x6f8   :  { %v2814_v61 = vadd.f32 %v2766_v2, %v8189_v30 }
 0x6f9   :  { %v2828_v13 = vpack.c.bf16 %v2816_v60, %v2815_v0 }
 0x6fa   :  { %v7244_v50 = vpop.f32.mrb[108].mxu1  ;;  %v2827_v25 = vpack.c.bf16 %v2814_v61, %v2813_v57 }
 0x6fb   :  { %v2787_v24 = vadd.f32 %v7244_v50, %v2663_v43  ;;  %v2778_v28 = vpop.f32.mrb[109].mxu1 }
 0x6fc   :  { %v2779_v33 = vadd.f32 %v2778_v28, %v2663_v43  ;;  %v7245_v16 = vpop.f32.mrb[110].mxu1  ;;  %7270 = vmatprep.mubr.bf16.mxu0 %v2827_v25 }
 0x6fd   :  { %v2790_v42 = vadd.f32 %v7245_v16, %v2663_v43  ;;  %v2781_v44 = vpop.f32.mrb[111].mxu1  ;;  %7271 = vmatmul.mubr.bf16.gmra.mrb[92].mxu0 %v2828_v13  ;;  %v2819_v35 = vadd.f32 %v2787_v24, %v8219_v4 }
 0x6fe   :  { %v2782_v5 = vadd.f32 %v2781_v44, %v2663_v43  ;;  %v2817_v26 = vadd.f32 %v2779_v33, %v8213_v56 }
 0x6ff   :  { %v2820_v29 = vadd.f32 %v2790_v42, %v8215_v62 }
 0x700   :  { %v2818_v30 = vadd.f32 %v2782_v5, %v8217_v63 }
 0x701   :  { %v2830_v53 = vpack.c.bf16 %v2820_v29, %v2819_v35 }
 0x702   :  { %v7248_v15 = vpop.f32.mrb[112].mxu1  ;;  %v2829_v1 = vpack.c.bf16 %v2818_v30, %v2817_v26 }
 0x703   :  { %v2803_v34 = vadd.f32 %v7248_v15, %v2663_v43  ;;  %v2794_v32 = vpop.f32.mrb[113].mxu1 }
 0x704   :  { %v2795_v59 = vadd.f32 %v2794_v32, %v2663_v43  ;;  %v7249_v9 = vpop.f32.mrb[114].mxu1  ;;  %7274 = vmatprep.mubr.bf16.mxu0 %v2829_v1 }
 0x705   :  { %v2806_v39 = vadd.f32 %v7249_v9, %v2663_v43  ;;  %v2797_v14 = vpop.f32.mrb[115].mxu1  ;;  %7275 = vmatmul.mubr.bf16.gmra.mrb[96].mxu0 %v2830_v53  ;;  %v2823_v4 = vadd.f32 %v2803_v34, %v8245_v23 }
 0x706   :  { %v2798_v37 = vadd.f32 %v2797_v14, %v2663_v43  ;;  %v2821_v56 = vadd.f32 %v2795_v59, %v8237_v17  ;;  %v7885_v43 = vld [vmem:[%s10123_s5 + $0x10] sm:$0xff]  }
 0x707   :  { %v2824_v62 = vadd.f32 %v2806_v39, %v8239_v18  ;;  %v9315_v18 = vrot.slane %v8991_v11, %v8766_v3 }
 0x708   :  { %v2822_v63 = vadd.f32 %v2798_v37, %v8241_v21 }
 0x709   :  { %v2832_v46 = vpack.c.bf16 %v2824_v62, %v2823_v4 }
 0x70a   :  { %v2831_v45 = vpack.c.bf16 %v2822_v63, %v2821_v56 }
 0x70c   :  { %7278 = vmatprep.mubr.bf16.mxu0 %v2831_v45 }
 0x70d   :  { %7279 = vmatmul.mubr.bf16.gmra.mrb[100].mxu0 %v2832_v46 }
 0x70e   :  { %7318 = vmatprep.mubr.bf16.mxu0 %v7885_v43 }
 0x7c8   :  { %v7268_v17 = vpop.f32.mrb[88].mxu0 }
 0x7c9   :  { %v2944_v21 = vadd.f32 %v7268_v17, %v9315_v18  ;;  %v2935_v23 = vpop.f32.mrb[89].mxu0 }
 0x7ca   :  { %v2936_v47 = vadd.f32 %v2935_v23, %v9315_v18  ;;  %v7269_v8 = vpop.f32.mrb[90].mxu0 }
 0x7cb   :  { %v3000_v10 = vadd.f32 3.0, %v2944_v21  ;;  %v2947_v54 = vadd.f32 %v7269_v8, %v9315_v18  ;;  %v2938_v55 = vpop.f32.mrb[91].mxu0 }
 0x7cc   :  { %v2998_v27 = vadd.f32 3.0, %v2936_v47  ;;  %v2939_v31 = vadd.f32 %v2938_v55, %v9315_v18 }
 0x7cd   :  { %v3016_v7 = vmax.f32 %v3000_v10, 0.0  ;;  %v3001_v12 = vadd.f32 3.0, %v2947_v54 }
 0x7ce   :  { %v3014_v52 = vmax.f32 %v2998_v27, 0.0  ;;  %v2999_v19 = vadd.f32 3.0, %v2939_v31 }
 0x7cf   :  { %v3032_v11 = vmin.f32 %v3016_v7, 6.0  ;;  %v3017_v6 = vmax.f32 %v3001_v12, 0.0 }
 0x7d0   :  { %v3030_v48 = vmin.f32 %v3014_v52, 6.0  ;;  %v3015_v51 = vmax.f32 %v2999_v19, 0.0  ;;  %v7272_v2 = vpop.f32.mrb[92].mxu0 }
 0x7d1   :  { %v3048_v0 = vmul.f32 %v3032_v11, %v2944_v21  ;;  %v3033_v60 = vmin.f32 %v3017_v6, 6.0  ;;  %v2960_v57 = vadd.f32 %v7272_v2, %v9315_v18  ;;  %v2951_v61 = vpop.f32.mrb[93].mxu0 }
 0x7d2   :  { %v3046_v13 = vmul.f32 %v3030_v48, %v2936_v47  ;;  %v3031_v50 = vmin.f32 %v3015_v51, 6.0  ;;  %v2952_v25 = vadd.f32 %v2951_v61, %v9315_v18  ;;  %v7273_v24 = vpop.f32.mrb[94].mxu0 }
 0x7d3   :  { %v3049_v28 = vmul.f32 %v3033_v60, %v2947_v54  ;;  %v3004_v33 = vadd.f32 3.0, %v2960_v57  ;;  %v2963_v16 = vadd.f32 %v7273_v24, %v9315_v18  ;;  %v2954_v42 = vpop.f32.mrb[95].mxu0  ;;  %v3064_v29 = vmul.f32 0.16666667, %v3048_v0 }
 0x7d4   :  { %v3047_v44 = vmul.f32 %v3031_v50, %v2939_v31  ;;  %v3002_v5 = vadd.f32 3.0, %v2952_v25  ;;  %v2955_v35 = vadd.f32 %v2954_v42, %v9315_v18  ;;  %v3062_v15 = vmul.f32 0.16666667, %v3046_v13 }
 0x7d5   :  { %v3065_v26 = vmul.f32 0.16666667, %v3049_v28  ;;  %v3020_v30 = vmax.f32 %v3004_v33, 0.0  ;;  %v3005_v53 = vadd.f32 3.0, %v2963_v16 }
 0x7d6   :  { %v3063_v1 = vmul.f32 0.16666667, %v3047_v44  ;;  %v3018_v34 = vmax.f32 %v3002_v5, 0.0  ;;  %v3003_v32 = vadd.f32 3.0, %v2955_v35 }
 0x7d7   :  { %v9325_v59 = vpack.c.bf16 %v3065_v26, %v3064_v29  ;;  %v3036_v9 = vmin.f32 %v3020_v30, 6.0  ;;  %v3021_v39 = vmax.f32 %v3005_v53, 0.0 }
 0x7d8   :  { %v9327_v14 = vpack.c.bf16 %v3063_v1, %v3062_v15  ;;  %v3034_v37 = vmin.f32 %v3018_v34, 6.0  ;;  %v3019_v4 = vmax.f32 %v3003_v32, 0.0  ;;  %v7276_v62 = vpop.f32.mrb[96].mxu0 }
 0x7d9   :  { %v3052_v56 = vmul.f32 %v3036_v9, %v2960_v57  ;;  %v3037_v63 = vmin.f32 %v3021_v39, 6.0  ;;  %v2976_v46 = vadd.f32 %v7276_v62, %v9315_v18  ;;  %v2967_v45 = vpop.f32.mrb[97].mxu0 }
 0x7da   :  { %v3050_v40 = vmul.f32 %v3034_v37, %v2952_v25  ;;  %v3035_v43 = vmin.f32 %v3019_v4, 6.0  ;;  %v2968_v17 = vadd.f32 %v2967_v45, %v9315_v18  ;;  %v7277_v21 = vpop.f32.mrb[98].mxu0  ;;  %7282 = vmatprep.subr.bf16.mxu1 %v9327_v14  ;;  %7302 = vmatprep.subr.bf16.mxu0 %v9327_v14 }
 0x7db   :  { %v3053_v23 = vmul.f32 %v3037_v63, %v2963_v16  ;;  %v3008_v47 = vadd.f32 3.0, %v2976_v46  ;;  %v2979_v8 = vadd.f32 %v7277_v21, %v9315_v18  ;;  %v2970_v10 = vpop.f32.mrb[99].mxu0  ;;  %7283 = vmatpush3.bf16.msra.mxu1 %v9327_v14  ;;  %7303 = vmatpush3.bf16.msra.mxu0 %v9327_v14  ;;  %v3068_v31 = vmul.f32 0.16666667, %v3052_v56 }
 0x7dc   :  { %v3051_v54 = vmul.f32 %v3035_v43, %v2955_v35  ;;  %v3006_v55 = vadd.f32 3.0, %v2968_v17  ;;  %v2971_v27 = vadd.f32 %v2970_v10, %v9315_v18  ;;  %7284 = vmatprep.subr.bf16.mxu1 %v9325_v59  ;;  %7304 = vmatprep.subr.bf16.mxu0 %v9325_v59  ;;  %v3066_v19 = vmul.f32 0.16666667, %v3050_v40 }
 0x7dd   :  { %v3069_v7 = vmul.f32 0.16666667, %v3053_v23  ;;  %v3024_v12 = vmax.f32 %v3008_v47, 0.0  ;;  %v3009_v52 = vadd.f32 3.0, %v2979_v8 }
 0x7de   :  { %v3067_v11 = vmul.f32 0.16666667, %v3051_v54  ;;  %v3022_v6 = vmax.f32 %v3006_v55, 0.0  ;;  %v3007_v48 = vadd.f32 3.0, %v2971_v27 }
 0x7df   :  { %v9339_v51 = vpack.c.bf16 %v3069_v7, %v3068_v31  ;;  %v3040_v2 = vmin.f32 %v3024_v12, 6.0  ;;  %v3025_v0 = vmax.f32 %v3009_v52, 0.0  ;;  %7285 = vmatpush3.bf16.msra.mxu1 %v9325_v59  ;;  %7305 = vmatpush3.bf16.msra.mxu0 %v9325_v59  ;;  %v7886_v12 = vld [vmem:[%s10123_s5 + $0x8] sm:$0xff]   ;;  %v7887_v52 = vld [vmem:[%s10123_s5 + $0x18] sm:$0xff]  }
 0x7e0   :  { %v9343_v60 = vpack.c.bf16 %v3067_v11, %v3066_v19  ;;  %v3038_v57 = vmin.f32 %v3022_v6, 6.0  ;;  %v3023_v61 = vmax.f32 %v3007_v48, 0.0  ;;  %v7280_v13 = vpop.f32.mrb[100].mxu0  ;;  %v7888_v19 = vld [vmem:[%s10123_s5 + $0x20] sm:$0xff]   ;;  %v7890_v11 = vld [vmem:[%s10123_s5 + $0x30] sm:$0xff]   ;;  %v7889_v6 = vld [vmem:[%s10123_s5 + $0x28] sm:$0xff]  }
 0x7e1   :  { %v3056_v50 = vmul.f32 %v3040_v2, %v2976_v46  ;;  %v3041_v25 = vmin.f32 %v3025_v0, 6.0  ;;  %v2992_v24 = vadd.f32 %v7280_v13, %v9315_v18  ;;  %v2983_v28 = vpop.f32.mrb[101].mxu0  ;;  %v7891_v48 = vld [vmem:[%s10123_s5 + $0x38] sm:$0xff]   ;;  %v7892_v2 = vld [vmem:[%s10123_s5 + $0x40] sm:$0xff]   ;;  %v7894_v0 = vld [vmem:[%s10123_s5 + $0x50] sm:$0xff]  }
 0x7e2   :  { %v3054_v33 = vmul.f32 %v3038_v57, %v2968_v17  ;;  %v3039_v16 = vmin.f32 %v3023_v61, 6.0  ;;  %v2984_v42 = vadd.f32 %v2983_v28, %v9315_v18  ;;  %v7281_v44 = vpop.f32.mrb[102].mxu0  ;;  %7286 = vmatprep.subr.bf16.mxu1 %v9343_v60  ;;  %7306 = vmatprep.subr.bf16.mxu0 %v9343_v60  ;;  %v7893_v57 = vld [vmem:[%s10123_s5 + $0x48] sm:$0xff]   ;;  %v7895_v61 = vld [vmem:[%s10123_s5 + $0x58] sm:$0xff]   ;;  %v7896_v13 = vld [vmem:[%s10123_s5 + $0x60] sm:$0xff]  }
 0x7e3   :  { %v3057_v5 = vmul.f32 %v3041_v25, %v2979_v8  ;;  %v3012_v35 = vadd.f32 3.0, %v2992_v24  ;;  %v2995_v29 = vadd.f32 %v7281_v44, %v9315_v18  ;;  %v2986_v26 = vpop.f32.mrb[103].mxu0  ;;  %7287 = vmatpush3.bf16.msra.mxu1 %v9343_v60  ;;  %7307 = vmatpush3.bf16.msra.mxu0 %v9343_v60  ;;  %v3072_v1 = vmul.f32 0.16666667, %v3056_v50  ;;  %v7898_v50 = vld [vmem:[%s10123_s5 + $0x70] sm:$0xff]   ;;  %v7897_v25 = vld [vmem:[%s10123_s5 + $0x68] sm:$0xff]  }
 0x7e4   :  { %v3055_v30 = vmul.f32 %v3039_v16, %v2971_v27  ;;  %v3010_v53 = vadd.f32 3.0, %v2984_v42  ;;  %v2987_v15 = vadd.f32 %v2986_v26, %v9315_v18  ;;  %7288 = vmatprep.subr.bf16.mxu1 %v9339_v51  ;;  %7308 = vmatprep.subr.bf16.mxu0 %v9339_v51  ;;  %v3070_v39 = vmul.f32 0.16666667, %v3054_v33  ;;  %v7900_v28 = vld [vmem:[%s10123_s5 + $0x80] sm:$0xff]  }
 0x7e5   :  { %v3073_v34 = vmul.f32 0.16666667, %v3057_v5  ;;  %v3028_v32 = vmax.f32 %v3012_v35, 0.0  ;;  %v3013_v9 = vadd.f32 3.0, %v2995_v29  ;;  %v10144_v33 = vmov 0.0  }
 0x7e6   :  { %v3071_v37 = vmul.f32 0.16666667, %v3055_v30  ;;  %v3026_v4 = vmax.f32 %v3010_v53, 0.0  ;;  %v3011_v62 = vadd.f32 3.0, %v2987_v15 }
 0x7e7   :  { %v9355_v56 = vpack.c.bf16 %v3073_v34, %v3072_v1  ;;  %v3044_v63 = vmin.f32 %v3028_v32, 6.0  ;;  %v3029_v46 = vmax.f32 %v3013_v9, 0.0  ;;  %7289 = vmatpush3.bf16.msra.mxu1 %v9339_v51  ;;  %7309 = vmatpush3.bf16.msra.mxu0 %v9339_v51 }
 0x7e8   :  { %v9359_v18 = vpack.c.bf16 %v3071_v37, %v3070_v39  ;;  %v3042_v45 = vmin.f32 %v3026_v4, 6.0  ;;  %v3027_v40 = vmax.f32 %v3011_v62, 0.0 }
 0x7e9   :  { %v3060_v43 = vmul.f32 %v3044_v63, %v2992_v24  ;;  %v3045_v17 = vmin.f32 %v3029_v46, 6.0  ;;  %v7899_v24 = vld [vmem:[%s10123_s5 + $0x78] sm:$0xff]  }
 0x7ea   :  { %v3058_v21 = vmul.f32 %v3042_v45, %v2984_v42  ;;  %v3043_v23 = vmin.f32 %v3027_v40, 6.0  ;;  %7290 = vmatprep.subr.bf16.mxu1 %v9359_v18  ;;  %7310 = vmatprep.subr.bf16.mxu0 %v9359_v18  ;;  %v7902_v45 = vld [vmem:[%s10119_s1 + $0x140] sm:$0xff]   ;;  %v7903_v40 = vld [vmem:[%s10119_s1 + $0x148] sm:$0xff]  }
 0x7eb   :  { %v3061_v47 = vmul.f32 %v3045_v17, %v2995_v29  ;;  %7291 = vmatpush3.bf16.msra.mxu1 %v9359_v18  ;;  %7311 = vmatpush3.bf16.msra.mxu0 %v9359_v18  ;;  %v3076_v10 = vmul.f32 0.16666667, %v3060_v43 }
 0x7ec   :  { %v3059_v8 = vmul.f32 %v3043_v23, %v2987_v15  ;;  %7292 = vmatprep.subr.bf16.mxu1 %v9355_v56  ;;  %7312 = vmatprep.subr.bf16.mxu0 %v9355_v56  ;;  %v3074_v55 = vmul.f32 0.16666667, %v3058_v21 }
 0x7ed   :  { %v3077_v54 = vmul.f32 0.16666667, %v3061_v47 }
 0x7ee   :  { %v3075_v27 = vmul.f32 0.16666667, %v3059_v8 }
 0x7ef   :  { %v9367_v31 = vpack.c.bf16 %v3077_v54, %v3076_v10  ;;  %7293 = vmatpush3.bf16.msra.mxu1 %v9355_v56  ;;  %7313 = vmatpush3.bf16.msra.mxu0 %v9355_v56 }
 0x7f0   :  { %v9371_v7 = vpack.c.bf16 %v3075_v27, %v3074_v55 }
 0x7f2   :  { %7294 = vmatprep.subr.bf16.mxu1 %v9371_v7  ;;  %7314 = vmatprep.subr.bf16.mxu0 %v9371_v7 }
 0x7f3   :  { %7295 = vmatpush3.bf16.msra.mxu1 %v9371_v7  ;;  %7315 = vmatpush3.bf16.msra.mxu0 %v9371_v7 }
 0x7f4   :  { %7296 = vmatprep.subr.bf16.mxu1 %v9367_v31  ;;  %7316 = vmatprep.subr.bf16.mxu0 %v9367_v31 }
 0x7f7   :  { %7297 = vmatpush3.bf16.msra.mxu1 %v9367_v31  ;;  %7317 = vmatpush3.bf16.msra.mxu0 %v9367_v31 }
 0x7f8   :  { %7322 = vmatprep.subr.bf16.mxu1 %v9327_v14  ;;  %7342 = vmatprep.subr.bf16.mxu0 %v9327_v14 }
 0x7fa   :  { %7299 = vmatmul.mubr.bf16.vlgmr.msra.gmra.mrb[116].mxu1 %v7886_v12  ;;  %7319 = vmatmul.mubr.bf16.vlgmr.msra.gmra.mrb[104].mxu0 %v7887_v52 }
 0x7fb   :  { %7323 = vmatpush3.bf16.msra.mxu1 %v9327_v14  ;;  %7343 = vmatpush3.bf16.msra.mxu0 %v9327_v14 }
 0x7fc   :  { %7324 = vmatprep.subr.bf16.mxu1 %v9325_v59  ;;  %7344 = vmatprep.subr.bf16.mxu0 %v9325_v59 }
 0x7fd   :  { %7338 = vmatprep.mubr.bf16.mxu1 %v7888_v19  ;;  %7358 = vmatprep.mubr.bf16.mxu0 %v7890_v11  ;;  %v7904_v11 = vld [vmem:[%s10119_s1 + $0x150] sm:$0xff]  }
 0x7ff   :  { %7325 = vmatpush3.bf16.msra.mxu1 %v9325_v59  ;;  %7345 = vmatpush3.bf16.msra.mxu0 %v9325_v59 }
 0x800   :  { %7326 = vmatprep.subr.bf16.mxu1 %v9343_v60  ;;  %7346 = vmatprep.subr.bf16.mxu0 %v9343_v60 }
 0x803   :  { %7327 = vmatpush3.bf16.msra.mxu1 %v9343_v60  ;;  %7347 = vmatpush3.bf16.msra.mxu0 %v9343_v60 }
 0x804   :  { %7328 = vmatprep.subr.bf16.mxu1 %v9339_v51  ;;  %7348 = vmatprep.subr.bf16.mxu0 %v9339_v51 }
 0x807   :  { %7329 = vmatpush3.bf16.msra.mxu1 %v9339_v51  ;;  %7349 = vmatpush3.bf16.msra.mxu0 %v9339_v51 }
 0x808   :  { %7330 = vmatprep.subr.bf16.mxu1 %v9359_v18  ;;  %7350 = vmatprep.subr.bf16.mxu0 %v9359_v18 }
 0x80b   :  { %7331 = vmatpush3.bf16.msra.mxu1 %v9359_v18  ;;  %7351 = vmatpush3.bf16.msra.mxu0 %v9359_v18 }
 0x80c   :  { %7332 = vmatprep.subr.bf16.mxu1 %v9355_v56  ;;  %7352 = vmatprep.subr.bf16.mxu0 %v9355_v56 }
 0x80f   :  { %7333 = vmatpush3.bf16.msra.mxu1 %v9355_v56  ;;  %7353 = vmatpush3.bf16.msra.mxu0 %v9355_v56 }
 0x810   :  { %7334 = vmatprep.subr.bf16.mxu1 %v9371_v7  ;;  %7354 = vmatprep.subr.bf16.mxu0 %v9371_v7 }
 0x813   :  { %7335 = vmatpush3.bf16.msra.mxu1 %v9371_v7  ;;  %7355 = vmatpush3.bf16.msra.mxu0 %v9371_v7 }
 0x814   :  { %7336 = vmatprep.subr.bf16.mxu1 %v9367_v31  ;;  %7356 = vmatprep.subr.bf16.mxu0 %v9367_v31 }
 0x817   :  { %7337 = vmatpush3.bf16.msra.mxu1 %v9367_v31  ;;  %7357 = vmatpush3.bf16.msra.mxu0 %v9367_v31 }
 0x818   :  { %7362 = vmatprep.subr.bf16.mxu1 %v9327_v14  ;;  %7382 = vmatprep.subr.bf16.mxu0 %v9327_v14 }
 0x81a   :  { %7339 = vmatmul.mubr.bf16.vlgmr.msra.gmra.mrb[120].mxu1 %v7889_v6  ;;  %7359 = vmatmul.mubr.bf16.vlgmr.msra.gmra.mrb[108].mxu0 %v7891_v48 }
 0x81b   :  { %7363 = vmatpush3.bf16.msra.mxu1 %v9327_v14  ;;  %7383 = vmatpush3.bf16.msra.mxu0 %v9327_v14 }
 0x81c   :  { %7364 = vmatprep.subr.bf16.mxu1 %v9325_v59  ;;  %7384 = vmatprep.subr.bf16.mxu0 %v9325_v59 }
 0x81d   :  { %7378 = vmatprep.mubr.bf16.mxu1 %v7892_v2  ;;  %7398 = vmatprep.mubr.bf16.mxu0 %v7894_v0 }
 0x81f   :  { %7365 = vmatpush3.bf16.msra.mxu1 %v9325_v59  ;;  %7385 = vmatpush3.bf16.msra.mxu0 %v9325_v59 }
 0x820   :  { %7366 = vmatprep.subr.bf16.mxu1 %v9343_v60  ;;  %7386 = vmatprep.subr.bf16.mxu0 %v9343_v60 }
 0x823   :  { %7367 = vmatpush3.bf16.msra.mxu1 %v9343_v60  ;;  %7387 = vmatpush3.bf16.msra.mxu0 %v9343_v60 }
 0x824   :  { %7368 = vmatprep.subr.bf16.mxu1 %v9339_v51  ;;  %7388 = vmatprep.subr.bf16.mxu0 %v9339_v51 }
 0x827   :  { %7369 = vmatpush3.bf16.msra.mxu1 %v9339_v51  ;;  %7389 = vmatpush3.bf16.msra.mxu0 %v9339_v51 }
 0x828   :  { %7370 = vmatprep.subr.bf16.mxu1 %v9359_v18  ;;  %7390 = vmatprep.subr.bf16.mxu0 %v9359_v18 }
 0x82b   :  { %7371 = vmatpush3.bf16.msra.mxu1 %v9359_v18  ;;  %7391 = vmatpush3.bf16.msra.mxu0 %v9359_v18 }
 0x82c   :  { %7372 = vmatprep.subr.bf16.mxu1 %v9355_v56  ;;  %7392 = vmatprep.subr.bf16.mxu0 %v9355_v56 }
 0x82f   :  { %7373 = vmatpush3.bf16.msra.mxu1 %v9355_v56  ;;  %7393 = vmatpush3.bf16.msra.mxu0 %v9355_v56 }
 0x830   :  { %7374 = vmatprep.subr.bf16.mxu1 %v9371_v7  ;;  %7394 = vmatprep.subr.bf16.mxu0 %v9371_v7 }
 0x833   :  { %7375 = vmatpush3.bf16.msra.mxu1 %v9371_v7  ;;  %7395 = vmatpush3.bf16.msra.mxu0 %v9371_v7 }
 0x834   :  { %7376 = vmatprep.subr.bf16.mxu1 %v9367_v31  ;;  %7396 = vmatprep.subr.bf16.mxu0 %v9367_v31 }
 0x837   :  { %7377 = vmatpush3.bf16.msra.mxu1 %v9367_v31  ;;  %7397 = vmatpush3.bf16.msra.mxu0 %v9367_v31 }
 0x838   :  { %7402 = vmatprep.subr.bf16.mxu1 %v9327_v14  ;;  %7422 = vmatprep.subr.bf16.mxu0 %v9327_v14 }
 0x83a   :  { %7379 = vmatmul.mubr.bf16.vlgmr.msra.gmra.mrb[124].mxu1 %v7893_v57  ;;  %7399 = vmatmul.mubr.bf16.vlgmr.msra.gmra.mrb[112].mxu0 %v7895_v61 }
 0x83b   :  { %7403 = vmatpush3.bf16.msra.mxu1 %v9327_v14  ;;  %7423 = vmatpush3.bf16.msra.mxu0 %v9327_v14 }
 0x83c   :  { %7404 = vmatprep.subr.bf16.mxu1 %v9325_v59  ;;  %7424 = vmatprep.subr.bf16.mxu0 %v9325_v59 }
 0x83d   :  { %7418 = vmatprep.mubr.bf16.mxu1 %v7896_v13  ;;  %7438 = vmatprep.mubr.bf16.mxu0 %v7898_v50 }
 0x83f   :  { %7405 = vmatpush3.bf16.msra.mxu1 %v9325_v59  ;;  %7425 = vmatpush3.bf16.msra.mxu0 %v9325_v59 }
 0x840   :  { %7406 = vmatprep.subr.bf16.mxu1 %v9343_v60  ;;  %7426 = vmatprep.subr.bf16.mxu0 %v9343_v60 }
 0x843   :  { %7407 = vmatpush3.bf16.msra.mxu1 %v9343_v60  ;;  %7427 = vmatpush3.bf16.msra.mxu0 %v9343_v60 }
 0x844   :  { %7408 = vmatprep.subr.bf16.mxu1 %v9339_v51  ;;  %7428 = vmatprep.subr.bf16.mxu0 %v9339_v51 }
 0x847   :  { %7409 = vmatpush3.bf16.msra.mxu1 %v9339_v51  ;;  %7429 = vmatpush3.bf16.msra.mxu0 %v9339_v51 }
 0x848   :  { %7410 = vmatprep.subr.bf16.mxu1 %v9359_v18  ;;  %7430 = vmatprep.subr.bf16.mxu0 %v9359_v18 }
 0x84b   :  { %7411 = vmatpush3.bf16.msra.mxu1 %v9359_v18  ;;  %7431 = vmatpush3.bf16.msra.mxu0 %v9359_v18 }
 0x84c   :  { %7412 = vmatprep.subr.bf16.mxu1 %v9355_v56  ;;  %7432 = vmatprep.subr.bf16.mxu0 %v9355_v56 }
 0x84f   :  { %7413 = vmatpush3.bf16.msra.mxu1 %v9355_v56  ;;  %7433 = vmatpush3.bf16.msra.mxu0 %v9355_v56 }
 0x850   :  { %7414 = vmatprep.subr.bf16.mxu1 %v9371_v7  ;;  %7434 = vmatprep.subr.bf16.mxu0 %v9371_v7 }
 0x853   :  { %7415 = vmatpush3.bf16.msra.mxu1 %v9371_v7  ;;  %7435 = vmatpush3.bf16.msra.mxu0 %v9371_v7 }
 0x854   :  { %7416 = vmatprep.subr.bf16.mxu1 %v9367_v31  ;;  %7436 = vmatprep.subr.bf16.mxu0 %v9367_v31 }
 0x857   :  { %7417 = vmatpush3.bf16.msra.mxu1 %v9367_v31  ;;  %7437 = vmatpush3.bf16.msra.mxu0 %v9367_v31 }
 0x858   :  { %7442 = vmatprep.subr.bf16.mxu1 %v9327_v14  ;;  %7470 = vmatprep.subr.bf16.mxu0 %v10144_v33 }
 0x85a   :  { %7419 = vmatmul.mubr.bf16.vlgmr.msra.gmra.mrb[128].mxu1 %v7897_v25  ;;  %7439 = vmatmul.mubr.bf16.vlgmr.msra.gmra.mrb[116].mxu0 %v7899_v24  ;;  %v7905_v25 = vld [vmem:[%s10119_s1 + $0x158] sm:$0xff]  }
 0x85b   :  { %7443 = vmatpush3.bf16.msra.mxu1 %v9327_v14  ;;  %7458 = vmatprep.mubr.bf16.mxu1 %v7900_v28  ;;  %v9550_v14 = vld [vmem:[%s10120_s2 + $0x8] sm:$0xff]  ;;  %v7906_v28 = vld [vmem:[%s10119_s1 + $0x160] sm:$0xff]  }
 0x85c   :  { %7444 = vmatprep.subr.bf16.mxu1 %v9325_v59  ;;  %7486 = vmatprep.mubr.msk.bf16.mxu0 %vm8024_vm0, %v10144_v33  ;;  %v3306_v46 = vrot.slane %v9550_v14, %v8657_v36 }
 0x85d   :  { %7471 = vmatpush3.bf16.msra.mxu0 %v7902_v45 }
 0x85e   :  { %7472 = vmatprep.subr.bf16.mxu0 %v10144_v33 }
 0x85f   :  { %7445 = vmatpush3.bf16.msra.mxu1 %v9325_v59  ;;  %v7901_v59 = vld [vmem:[%s10123_s5 + $0x88] sm:$0xff]  }
 0x860   :  { %7446 = vmatprep.subr.bf16.mxu1 %v9343_v60 }
 0x861   :  { %7473 = vmatpush3.bf16.msra.mxu0 %v7903_v40 }
 0x862   :  { %7474 = vmatprep.subr.bf16.mxu0 %v10144_v33 }
 0x863   :  { %7447 = vmatpush3.bf16.msra.mxu1 %v9343_v60  ;;  %v3228_v60 = vrot.slane %v9550_v14, %v8654_v49 }
 0x864   :  { %7448 = vmatprep.subr.bf16.mxu1 %v9339_v51 }
 0x865   :  { %7475 = vmatpush3.bf16.msra.mxu0 %v7904_v11 }
 0x866   :  { %7476 = vmatprep.subr.bf16.mxu0 %v10144_v33 }
 0x867   :  { %7449 = vmatpush3.bf16.msra.mxu1 %v9339_v51  ;;  %v3154_v51 = vrot.slane %v9550_v14, %v8586_v58 }
 0x868   :  { %7450 = vmatprep.subr.bf16.mxu1 %v9359_v18 }
 0x869   :  { %7477 = vmatpush3.bf16.msra.mxu0 %v7905_v25 }
 0x86a   :  { %7478 = vmatprep.subr.bf16.mxu0 %v10144_v33 }
 0x86b   :  { %7451 = vmatpush3.bf16.msra.mxu1 %v9359_v18  ;;  %v3384_v18 = vrot.slane %v9550_v14, %v8763_v38 }
 0x86c   :  { %7452 = vmatprep.subr.bf16.mxu1 %v9355_v56 }
 0x86d   :  { %7479 = vmatpush3.bf16.msra.mxu0 %v7906_v28 }
 0x86e   :  { %7480 = vmatprep.subr.bf16.mxu0 %v10144_v33 }
 0x86f   :  { %7453 = vmatpush3.bf16.msra.mxu1 %v9355_v56 }
 0x870   :  { %7454 = vmatprep.subr.bf16.mxu1 %v9371_v7 }
 0x873   :  { %7455 = vmatpush3.bf16.msra.mxu1 %v9371_v7 }
 0x874   :  { %7456 = vmatprep.subr.bf16.mxu1 %v9367_v31 }
 0x877   :  { %7457 = vmatpush3.bf16.msra.mxu1 %v9367_v31 }
 0x878   :  { %7462 = vmatprep.subr.bf16.mxu1 %v10144_v33 }
 0x87a   :  { %7459 = vmatmul.mubr.bf16.vlgmr.msra.gmra.mrb[132].mxu1 %v7901_v59  ;;  %v7907_v59 = vld [vmem:[%s10119_s1 + $0x168] sm:$0xff]  }
 0x87b   :  { %7466 = vmatprep.mubr.msk.bf16.mxu1 %vm8024_vm0, %v10144_v33  ;;  %7481 = vmatpush3.bf16.msra.mxu0 %v7907_v59 }
 0x87c   :  { %7482 = vmatprep.subr.bf16.mxu0 %v10144_v33 }
 0x8cd   :  { %v7300_v16 = vpop.f32.mrb[116].mxu1  ;;  %v7320_v42 = vpop.f32.mrb[104].mxu0 }
 0x8ce   :  { %v3157_v44 = vmul.f32 %v7300_v16, %v3154_v51  ;;  %v3231_v5 = vmul.f32 %v7320_v42, %v3228_v60  ;;  %v3136_v35 = vpop.f32.mrb[117].mxu1  ;;  %v3210_v29 = vpop.f32.mrb[105].mxu0  ;;  %v3540_v16 = vrot.slane %v9550_v14, %v8870_v22 }
 0x8cf   :  { %v3155_v26 = vmul.f32 %v3154_v51, %v3136_v35  ;;  %v3229_v30 = vmul.f32 %v3228_v60, %v3210_v29  ;;  %v7301_v53 = vpop.f32.mrb[118].mxu1  ;;  %v7321_v15 = vpop.f32.mrb[106].mxu0 }
 0x8d0   :  { %v3235_v1 = vadd.f32 %v3231_v5, %v3157_v44  ;;  %v3158_v34 = vmul.f32 %v7301_v53, %v3154_v51  ;;  %v3232_v32 = vmul.f32 %v7321_v15, %v3228_v60  ;;  %v3139_v9 = vpop.f32.mrb[119].mxu1  ;;  %v3213_v39 = vpop.f32.mrb[107].mxu0 }
 0x8d1   :  { %v3233_v37 = vadd.f32 %v3229_v30, %v3155_v26  ;;  %v3156_v4 = vmul.f32 %v3154_v51, %v3139_v9  ;;  %v3230_v62 = vmul.f32 %v3228_v60, %v3213_v39  ;;  %v7908_v51 = vld [vmem:[%s10119_s1 + $0x170] sm:$0xff]   ;;  %v3462_v60 = vrot.slane %v9550_v14, %v8766_v3 }
 0x8d2   :  { %v3236_v56 = vadd.f32 %v3232_v32, %v3158_v34  ;;  %7483 = vmatpush3.bf16.msra.mxu0 %v7908_v51 }
 0x8d3   :  { %v3234_v63 = vadd.f32 %v3230_v62, %v3156_v4  ;;  %7484 = vmatprep.subr.bf16.mxu0 %v10144_v33 }
 0x8ed   :  { %v7340_v43 = vpop.f32.mrb[120].mxu1  ;;  %v7360_v17 = vpop.f32.mrb[108].mxu0 }
 0x8ee   :  { %v3309_v21 = vmul.f32 %v7340_v43, %v3306_v46  ;;  %v3288_v23 = vpop.f32.mrb[121].mxu1  ;;  %v3387_v47 = vmul.f32 %v7360_v17, %v3384_v18  ;;  %v3366_v8 = vpop.f32.mrb[109].mxu0  ;;  %v9595_v17 = vld [vmem:[%s10120_s2 + $0x10] sm:$0xff] }
 0x8ef   :  { %v3307_v10 = vmul.f32 %v3306_v46, %v3288_v23  ;;  %v7341_v54 = vpop.f32.mrb[122].mxu1  ;;  %v3385_v55 = vmul.f32 %v3384_v18, %v3366_v8  ;;  %v7361_v27 = vpop.f32.mrb[110].mxu0  ;;  %v3696_v23 = vrot.slane %v9595_v17, %v8143_v20  ;;  %v3774_v59 = vrot.slane %v9595_v17, %v8586_v58 }
 0x8f0   :  { %v3313_v31 = vadd.f32 %v3309_v21, %v3235_v1  ;;  %v3310_v7 = vmul.f32 %v7341_v54, %v3306_v46  ;;  %v3291_v12 = vpop.f32.mrb[123].mxu1  ;;  %v3388_v52 = vmul.f32 %v7361_v27, %v3384_v18  ;;  %v3369_v19 = vpop.f32.mrb[111].mxu0  ;;  %v3618_v21 = vrot.slane %v9550_v14, %v8873_v41 }
 0x8f1   :  { %v3311_v6 = vadd.f32 %v3307_v10, %v3233_v37  ;;  %v3308_v48 = vmul.f32 %v3306_v46, %v3291_v12  ;;  %v3386_v2 = vmul.f32 %v3384_v18, %v3369_v19 }
 0x8f2   :  { %v3314_v0 = vadd.f32 %v3310_v7, %v3236_v56  ;;  %v3391_v57 = vadd.f32 %v3387_v47, %v3313_v31 }
 0x8f3   :  { %v3312_v61 = vadd.f32 %v3308_v48, %v3234_v63  ;;  %v3389_v13 = vadd.f32 %v3385_v55, %v3311_v6 }
 0x8f4   :  { %v3392_v50 = vadd.f32 %v3388_v52, %v3314_v0 }
 0x8f5   :  { %v3390_v24 = vadd.f32 %v3386_v2, %v3312_v61 }
 0x90d   :  { %v7380_v42 = vpop.f32.mrb[124].mxu1  ;;  %v7400_v44 = vpop.f32.mrb[112].mxu0 }
 0x90e   :  { %v3465_v5 = vmul.f32 %v7380_v42, %v3462_v60  ;;  %v3444_v35 = vpop.f32.mrb[125].mxu1  ;;  %v3543_v29 = vmul.f32 %v7400_v44, %v3540_v16  ;;  %v3522_v26 = vpop.f32.mrb[113].mxu0 }
 0x90f   :  { %v3463_v30 = vmul.f32 %v3462_v60, %v3444_v35  ;;  %v7381_v53 = vpop.f32.mrb[126].mxu1  ;;  %v3541_v15 = vmul.f32 %v3540_v16, %v3522_v26  ;;  %v7401_v1 = vpop.f32.mrb[114].mxu0 }
 0x910   :  { %v3469_v34 = vadd.f32 %v3465_v5, %v3391_v57  ;;  %v3466_v32 = vmul.f32 %v7381_v53, %v3462_v60  ;;  %v3447_v9 = vpop.f32.mrb[127].mxu1  ;;  %v3544_v39 = vmul.f32 %v7401_v1, %v3540_v16  ;;  %v3525_v37 = vpop.f32.mrb[115].mxu0 }
 0x911   :  { %v3467_v4 = vadd.f32 %v3463_v30, %v3389_v13  ;;  %v3464_v62 = vmul.f32 %v3462_v60, %v3447_v9  ;;  %v3542_v56 = vmul.f32 %v3540_v16, %v3525_v37  ;;  %v9606_v16 = vld [vmem:[%s10121_s3] sm:$0xff] }
 0x912   :  { %v3470_v63 = vadd.f32 %v3466_v32, %v3392_v50  ;;  %v3547_v46 = vadd.f32 %v3543_v29, %v3469_v34  ;;  %v3786_v42 = vrot.slane %v9606_v16, %v8870_v22 }
 0x913   :  { %v3468_v18 = vadd.f32 %v3464_v62, %v3390_v24  ;;  %v3545_v45 = vadd.f32 %v3541_v15, %v3467_v4 }
 0x914   :  { %v3548_v40 = vadd.f32 %v3544_v39, %v3470_v63 }
 0x915   :  { %v3546_v43 = vadd.f32 %v3542_v56, %v3468_v18 }
 0x92d   :  { %v7420_v47 = vpop.f32.mrb[128].mxu1  ;;  %v7440_v8 = vpop.f32.mrb[116].mxu0 }
 0x92e   :  { %v3621_v10 = vmul.f32 %v7420_v47, %v3618_v21  ;;  %v3600_v54 = vpop.f32.mrb[129].mxu1  ;;  %v3699_v55 = vmul.f32 %v7440_v8, %v3696_v23  ;;  %v3678_v27 = vpop.f32.mrb[117].mxu0 }
 0x92f   :  { %v3619_v31 = vmul.f32 %v3618_v21, %v3600_v54  ;;  %v7421_v7 = vpop.f32.mrb[130].mxu1  ;;  %v3697_v12 = vmul.f32 %v3696_v23, %v3678_v27  ;;  %v7441_v52 = vpop.f32.mrb[118].mxu0 }
 0x930   :  { %v3625_v19 = vadd.f32 %v3621_v10, %v3547_v46  ;;  %v3622_v11 = vmul.f32 %v7421_v7, %v3618_v21  ;;  %v3603_v6 = vpop.f32.mrb[131].mxu1  ;;  %v3700_v48 = vmul.f32 %v7441_v52, %v3696_v23  ;;  %v3681_v2 = vpop.f32.mrb[119].mxu0 }
 0x931   :  { %v3623_v0 = vadd.f32 %v3619_v31, %v3545_v45  ;;  %v3620_v14 = vmul.f32 %v3618_v21, %v3603_v6  ;;  %v3698_v57 = vmul.f32 %v3696_v23, %v3681_v2  ;;  %v7909_v6 = vld [vmem:[%s10119_s1 + $0x178] sm:$0xff]   ;;  %v7911_v2 = vld [vmem:[%s10119_s1 + $0x188] sm:$0xff]  }
 0x932   :  { %v3626_v61 = vadd.f32 %v3622_v11, %v3548_v40  ;;  %v3703_v13 = vadd.f32 %v3699_v55, %v3625_v19  ;;  %v9626_v11 = vld [vmem:[%s10127_s9] sm:$0x1]  ;;  %7485 = vmatpush3.bf16.msra.mxu0 %v7909_v6 }
 0x933   :  { %v3624_v50 = vadd.f32 %v3620_v14, %v3546_v43  ;;  %v3701_v25 = vadd.f32 %v3697_v12, %v3623_v0  ;;  %v7912_v0 = vld [vmem:[%s10119_s1 + $0x190] sm:$0xff]   ;;  %v7913_v14 = vld [vmem:[%s10119_s1 + $0x198] sm:$0xff]   ;;  %v7932_v6 = vld [vmem:[%s10119_s1 + $0x220] sm:$0xff]  }
 0x934   :  { %v3704_v24 = vadd.f32 %v3700_v48, %v3626_v61  ;;  %v7910_v48 = vld [vmem:[%s10119_s1 + $0x180] sm:$0xff]   ;;  %v7915_v61 = vld [vmem:[%s10119_s1 + $0x1a8] sm:$0xff]  }
 0x935   :  { %v3702_v28 = vadd.f32 %v3698_v57, %v3624_v50  ;;  %v7914_v57 = vld [vmem:[%s10119_s1 + $0x1a0] sm:$0xff]  }
 0x94d   :  { %v7460_v51 = vpop.f32.mrb[132].mxu1 }
 0x94e   :  { %v3777_v60 = vmul.f32 %v7460_v51, %v3774_v59  ;;  %v3756_v44 = vpop.f32.mrb[133].mxu1  ;;  %v7917_v51 = vld [vmem:[%s10119_s1 + $0x1b8] sm:$0xff]  }
 0x94f   :  { %v3775_v5 = vmul.f32 %v3774_v59, %v3756_v44  ;;  %v7461_v35 = vpop.f32.mrb[134].mxu1 }
 0x950   :  { %v3781_v29 = vadd.f32 %v3777_v60, %v3703_v13  ;;  %v3778_v26 = vmul.f32 %v7461_v35, %v3774_v59  ;;  %v3759_v30 = vpop.f32.mrb[135].mxu1  ;;  %v3878_v60 = vrot.slane %v9606_v16, %v8873_v41  ;;  %v7920_v16 = vld [vmem:[%s10119_s1 + $0x1c0] sm:$0xff]  }
 0x951   :  { %v3779_v53 = vadd.f32 %v3775_v5, %v3701_v25  ;;  %v3776_v15 = vmul.f32 %v3774_v59, %v3759_v30  ;;  %v7916_v59 = vld [vmem:[%s10119_s1 + $0x1b0] sm:$0xff]  }
 0x952   :  { %v3789_v1 = vadd.f32 %v3786_v42, %v3781_v29  ;;  %v3782_v34 = vadd.f32 %v3778_v26, %v3704_v24 }
 0x953   :  { %v3787_v32 = vadd.f32 %v3786_v42, %v3779_v53  ;;  %v3780_v9 = vadd.f32 %v3776_v15, %v3702_v28  ;;  %v9672_v53 = vld [vmem:[%s10128_s10] sm:$0xff]   ;;  %v7921_v15 = vld [vmem:[%s10119_s1 + $0x1c8] sm:$0xff]  }
 0x954   :  { %v3793_v39 = vadd.f32 3.0, %v3789_v1  ;;  %v3790_v37 = vadd.f32 %v3786_v42, %v3782_v34  ;;  %v7923_v34 = vld [vmem:[%s10119_s1 + $0x1d8] sm:$0xff]  }
 0x955   :  { %v3791_v4 = vadd.f32 3.0, %v3787_v32  ;;  %v3788_v62 = vadd.f32 %v3786_v42, %v3780_v9  ;;  %v7925_v9 = vld [vmem:[%s10119_s1 + $0x1e8] sm:$0xff]  }
 0x956   :  { %v3794_v56 = vadd.f32 3.0, %v3790_v37  ;;  %v3797_v63 = vmax.f32 %v3793_v39, 0.0  ;;  %v9697_v39 = vld [vmem:[%s10121_s3 + $0x8] sm:$0xff] }
 0x957   :  { %v3795_v46 = vmax.f32 %v3791_v4, 0.0  ;;  %v3792_v18 = vadd.f32 3.0, %v3788_v62 }
 0x958   :  { %v3798_v45 = vmax.f32 %v3794_v56, 0.0  ;;  %v3801_v23 = vmin.f32 %v3797_v63, 6.0 }
 0x959   :  { %v3799_v40 = vmin.f32 %v3795_v46, 6.0  ;;  %v3796_v43 = vmax.f32 %v3792_v18, 0.0 }
 0x95a   :  { %v3802_v21 = vmin.f32 %v3798_v45, 6.0  ;;  %v3805_v55 = vmul.f32 %v3801_v23, %v3789_v1  ;;  %v7922_v1 = vld [vmem:[%s10119_s1 + $0x1d0] sm:$0xff]  }
 0x95b   :  { %v3803_v47 = vmul.f32 %v3799_v40, %v3787_v32  ;;  %v3800_v8 = vmin.f32 %v3796_v43, 6.0  ;;  %v7924_v32 = vld [vmem:[%s10119_s1 + $0x1e0] sm:$0xff]  }
 0x95c   :  { %v3806_v10 = vmul.f32 %v3802_v21, %v3790_v37  ;;  %v9618_v52 = vmul.f32 0.16666667, %v3805_v55  ;;  %v3988_v37 = vrot.slane %v9697_v39, %v8143_v20  ;;  %v7929_v55 = vld [vmem:[%s10119_s1 + $0x208] sm:$0xff]  }
 0x95d   :  { %v3804_v54 = vmul.f32 %v3800_v8, %v3788_v62  ;;  %v9610_v27 = vmul.f32 0.16666667, %v3803_v47  ;;  %v9706_v47 = vld [vmem:[%s10128_s10 + $0x8] sm:$0xff]   ;;  %v7926_v8 = vld [vmem:[%s10119_s1 + $0x1f0] sm:$0xff]  }
 0x95e   :  { %v9614_v7 = vmul.f32 0.16666667, %v3806_v10  ;;  %v7927_v10 = vld [vmem:[%s10119_s1 + $0x1f8] sm:$0xff]  }
 0x95f   :  { %v9612_v31 = vmul.f32 0.16666667, %v3804_v54  ;;  %v7928_v54 = vld [vmem:[%s10119_s1 + $0x200] sm:$0xff]  }
 0x960   :  { %v3812_v19 = vpack.c.bf16 %v9614_v7, %v9618_v52 }
 0x961   :  { %v3811_v12 = vpack.c.bf16 %v9612_v31, %v9610_v27 }
 0x963   :  { %7463 = vmatpush3.bf16.msra.mxu1 %v3811_v12  ;;  %v7930_v12 = vld [vmem:[%s10119_s1 + $0x210] sm:$0xff]  }
 0x964   :  { %7464 = vmatprep.subr.bf16.mxu1 %v10144_v33 }
 0x967   :  { %7465 = vmatpush3.bf16.msra.mxu1 %v3812_v19  ;;  %v7931_v19 = vld [vmem:[%s10119_s1 + $0x218] sm:$0xff]  }
 0x968   :  { %7490 = vmatprep.subr.bf16.mxu1 %v10144_v33 }
 0x96a   :  { %7467 = vmatmul.mubr.msk.bf16.vlgmr.msra.gmra.mrb[136].mxu1 %vm3814_vm3, %v9626_v11 }
 0x96b   :  { %7506 = vmatprep.mubr.msk.bf16.mxu1 %vm8024_vm0, %v10144_v33  ;;  %7491 = vmatpush3.bf16.msra.mxu1 %v7910_v48  ;;  %v7933_v48 = vld [vmem:[%s10119_s1 + $0x228] sm:$0xff]  }
 0x96c   :  { %7492 = vmatprep.subr.bf16.mxu1 %v10144_v33 }
 0x96f   :  { %7493 = vmatpush3.bf16.msra.mxu1 %v7911_v2 }
 0x970   :  { %7494 = vmatprep.subr.bf16.mxu1 %v10144_v33 }
 0x973   :  { %7495 = vmatpush3.bf16.msra.mxu1 %v7912_v0 }
 0x974   :  { %7496 = vmatprep.subr.bf16.mxu1 %v10144_v33 }
 0x977   :  { %7497 = vmatpush3.bf16.msra.mxu1 %v7913_v14 }
 0x978   :  { %7498 = vmatprep.subr.bf16.mxu1 %v10144_v33 }
 0x97b   :  { %7499 = vmatpush3.bf16.msra.mxu1 %v7914_v57 }
 0x97c   :  { %7500 = vmatprep.subr.bf16.mxu1 %v10144_v33 }
 0x97f   :  { %7501 = vmatpush3.bf16.msra.mxu1 %v7915_v61 }
 0x980   :  { %7502 = vmatprep.subr.bf16.mxu1 %v10144_v33 }
 0x983   :  { %7503 = vmatpush3.bf16.msra.mxu1 %v7916_v59  ;;  %v7934_v59 = vld [vmem:[%s10119_s1 + $0x230] sm:$0xff]  }
 0x984   :  { %7504 = vmatprep.subr.bf16.mxu1 %v10144_v33 }
 0x987   :  { %7505 = vmatpush3.bf16.msra.mxu1 %v7917_v51 }
 0x988   :  { %7516 = vmatprep.subr.bf16.mxu1 %v7920_v16 }
 0xa3d   :  { %v3852_v13 = vpop.f32.mrb[136].mxu1 }
 0xa3e   :  { %v3858_v50 = vpack.c.bf16 %v3852_v13, %v3852_v13  ;;  %v7468_v25 = vpop.f32.mrb[137].mxu1 }
 0xa3f   :  { %v3855_v24 = vpop.f32.mrb[138].mxu1 }
 0xa40   :  { %v7469_v28 = vpop.f32.mrb[139].mxu1  ;;  %7487 = vmatmul.mubr.bf16.vlgmr.msra.gmra.mrb[120].mxu0 %v3858_v50 }
 0xa41   :  { %7512 = vmatprep.mubr.msk.bf16.mxu0 %vm2494_vm1, %v9672_v53 }
 0xb13   :  { %v3961_v42 = vpop.f32.mrb[120].mxu0 }
 0xb14   :  { %v3962_v44 = vadd.f32 %v3961_v42, %v3878_v60  ;;  %v7488_v5 = vpop.f32.mrb[121].mxu0 }
 0xb15   :  { %v3964_v35 = vpop.f32.mrb[122].mxu0 }
 0xb16   :  { %v3967_v29 = vmax.f32 %v3962_v44, 0.0  ;;  %v7489_v26 = vpop.f32.mrb[123].mxu0 }
 0xb18   :  { %v3968_v30 = vpack.c.bf16 %v3967_v29, %v3967_v29 }
 0xb1a   :  { %7507 = vmatmul.mubr.bf16.vlgmr.msra.gmra.mrb[140].mxu1 %v3968_v30  ;;  %v7936_v30 = vld [vmem:[%s10124_s6] sm:$0xff]  }
 0xb1b   :  { %7517 = vmatpush3.bf16.msra.mxu1 %v7920_v16  ;;  %v7937_v16 = vld [vmem:[%s10124_s6 + $0x10] sm:$0xff]  }
 0xb1c   :  { %7518 = vmatprep.subr.bf16.mxu1 %v7921_v15 }
 0xb1f   :  { %7519 = vmatpush3.bf16.msra.mxu1 %v7921_v15  ;;  %v4298_v15 = vrot.slane %v9697_v39, %v8654_v49 }
 0xb20   :  { %7520 = vmatprep.subr.bf16.mxu1 %v7922_v1 }
 0xb23   :  { %7521 = vmatpush3.bf16.msra.mxu1 %v7922_v1 }
 0xb24   :  { %7522 = vmatprep.subr.bf16.mxu1 %v7923_v34 }
 0xb27   :  { %7523 = vmatpush3.bf16.msra.mxu1 %v7923_v34 }
 0xb28   :  { %7524 = vmatprep.subr.bf16.mxu1 %v7924_v32 }
 0xb2b   :  { %7525 = vmatpush3.bf16.msra.mxu1 %v7924_v32 }
 0xb2c   :  { %7526 = vmatprep.subr.bf16.mxu1 %v7925_v9 }
 0xb2f   :  { %7527 = vmatpush3.bf16.msra.mxu1 %v7925_v9 }
 0xb30   :  { %7528 = vmatprep.subr.bf16.mxu1 %v7926_v8 }
 0xb33   :  { %7529 = vmatpush3.bf16.msra.mxu1 %v7926_v8 }
 0xb34   :  { %7530 = vmatprep.subr.bf16.mxu1 %v7927_v10 }
 0xb37   :  { %7531 = vmatpush3.bf16.msra.mxu1 %v7927_v10 }
 0xbed   :  { %v4071_v4 = vpop.f32.mrb[140].mxu1 }
 0xbee   :  { %v4072_v62 = vadd.f32 %v4071_v4, %v3988_v37  ;;  %v7508_v56 = vpop.f32.mrb[141].mxu1 }
 0xbef   :  { %v4074_v63 = vpop.f32.mrb[142].mxu1 }
 0xbf0   :  { %v4077_v46 = vadd.f32 3.0, %v4072_v62  ;;  %v7509_v18 = vpop.f32.mrb[143].mxu1 }
 0xbf2   :  { %v4078_v45 = vmax.f32 %v4077_v46, 0.0 }
 0xbf4   :  { %v4079_v40 = vmin.f32 %v4078_v45, 6.0 }
 0xbf6   :  { %v4080_v43 = vmul.f32 0.16666667, %v4079_v40 }
 0xbf8   :  { %v4085_v21 = vpack.c.bf16 %v4080_v43, %v4080_v43 }
 0xbfa   :  { %7751 = vmatprep.subr.msk.bf16.mxu0 %vm2519_vm2, %v4085_v21  ;;  %v4103_v23 = vsel %vm2519_vm2, %v4085_v21, 0 }
 0xbfb   :  { %7511 = vmatpush3.bf16.msra.mxu0 %v4103_v23 }
 0xbfc   :  { %7536 = vmatprep.subr.bf16.mxu0 %v7928_v54 }
 0xbfe   :  { %7513 = vmatmul.mubr.msk.bf16.vlgmr.msra.gmra.mrb[124].mxu0 %vm2494_vm1, %v9706_v47 }
 0xbff   :  { %7537 = vmatpush3.bf16.msra.mxu0 %v7928_v54 }
 0xc00   :  { %7538 = vmatprep.subr.bf16.mxu0 %v7929_v55 }
 0xc03   :  { %7539 = vmatpush3.bf16.msra.mxu0 %v7929_v55 }
 0xc04   :  { %7540 = vmatprep.subr.bf16.mxu0 %v7930_v12 }
 0xc07   :  { %7541 = vmatpush3.bf16.msra.mxu0 %v7930_v12 }
 0xc08   :  { %7542 = vmatprep.subr.bf16.mxu0 %v7931_v19 }
 0xc0b   :  { %7543 = vmatpush3.bf16.msra.mxu0 %v7931_v19 }
 0xc0c   :  { %7544 = vmatprep.subr.bf16.mxu0 %v7932_v6 }
 0xc0f   :  { %7545 = vmatpush3.bf16.msra.mxu0 %v7932_v6 }
 0xc10   :  { %7546 = vmatprep.subr.bf16.mxu0 %v7933_v48 }
 0xc13   :  { %7547 = vmatpush3.bf16.msra.mxu0 %v7933_v48 }
 0xc14   :  { %7548 = vmatprep.subr.bf16.mxu0 %v7934_v59 }
 0xc17   :  { %7549 = vmatpush3.bf16.msra.mxu0 %v7934_v59  ;;  %v7941_v59 = vld [vmem:[%s10124_s6 + $0x28] sm:$0xff]  }
 0xcd1   :  { %v7514_v2 = vpop.f32.mrb[124].mxu0 }
 0xcd2   :  { %v4139_v0 = vpop.f32.mrb[125].mxu0  ;;  %v4156_v57 = vmul.f32 %v7514_v2, %v9618_v52  ;;  %v7935_v52 = vld [vmem:[%s10119_s1 + $0x238] sm:$0xff]  }
 0xcd3   :  { %v7515_v14 = vpop.f32.mrb[126].mxu0  ;;  %v4154_v50 = vmul.f32 %v4139_v0, %v9610_v27  ;;  %7550 = vmatprep.subr.bf16.mxu0 %v7935_v52  ;;  %v4179_v27 = vrot.slane %v9697_v39, %v8586_v58 }
 0xcd4   :  { %v4157_v61 = vmul.f32 %v7515_v14, %v9614_v7  ;;  %v4142_v13 = vpop.f32.mrb[127].mxu0  ;;  %7551 = vmatpush3.bf16.msra.mxu0 %v7935_v52  ;;  %v7943_v52 = vld [vmem:[%s10124_s6 + $0x38] sm:$0xff]  }
 0xcd5   :  { %v4155_v25 = vmul.f32 %v4142_v13, %v9612_v31 }
 0xcd6   :  { %v4159_v24 = vpack.c.bf16 %v4157_v61, %v4156_v57 }
 0xcd7   :  { %v4158_v28 = vpack.c.bf16 %v4155_v25, %v4154_v50  ;;  %v7938_v50 = vld [vmem:[%s10124_s6 + $0x8] sm:$0xff]   ;;  %v7939_v25 = vld [vmem:[%s10124_s6 + $0x18] sm:$0xff]  }
 0xcd9   :  { %7532 = vmatprep.mubr.bf16.mxu1 %v4158_v28  ;;  %v7942_v28 = vld [vmem:[%s10124_s6 + $0x30] sm:$0xff]  }
 0xcda   :  { %7533 = vmatmul.mubr.bf16.vlgmr.msra.gmra.mrb[144].mxu1 %v4159_v24  ;;  %v7940_v24 = vld [vmem:[%s10124_s6 + $0x20] sm:$0xff]  }
 0xcdb   :  { %7560 = vmatprep.mubr.msk.bf16.mxu1 %vm3814_vm3, %v7936_v30  ;;  %v7951_v30 = vld [vmem:[%s10124_s6 + $0x78] sm:$0xff]  }
 0xdad   :  { %v7534_v31 = vpop.f32.mrb[144].mxu1 }
 0xdae   :  { %v4262_v7 = vpop.f32.mrb[145].mxu1  ;;  %v9752_v35 = vadd.f32 %v7534_v31, %v4179_v27  ;;  %v7946_v31 = vld [vmem:[%s10124_s6 + $0x50] sm:$0xff]  }
 0xdaf   :  { %v7535_v51 = vpop.f32.mrb[146].mxu1  ;;  %v9748_v44 = vadd.f32 %v4262_v7, %v4179_v27  ;;  %v7945_v7 = vld [vmem:[%s10124_s6 + $0x48] sm:$0xff]  }
 0xdb0   :  { %v9746_v60 = vadd.f32 %v7535_v51, %v4179_v27  ;;  %v4265_v42 = vpop.f32.mrb[147].mxu1  ;;  %v7947_v51 = vld [vmem:[%s10124_s6 + $0x58] sm:$0xff]  }
 0xdb1   :  { %v9750_v5 = vadd.f32 %v4265_v42, %v4179_v27  ;;  %v7944_v27 = vld [vmem:[%s10124_s6 + $0x40] sm:$0xff]  }
 0xdb2   :  { %v4278_v26 = vpack.c.bf16 %v9746_v60, %v9752_v35  ;;  %v7948_v42 = vld [vmem:[%s10124_s6 + $0x60] sm:$0xff]  }
 0xdb3   :  { %v4277_v29 = vpack.c.bf16 %v9750_v5, %v9748_v44 }
 0xdb5   :  { %7552 = vmatprep.mubr.bf16.mxu0 %v4277_v29  ;;  %v7950_v29 = vld [vmem:[%s10124_s6 + $0x70] sm:$0xff]  }
 0xdb6   :  { %7553 = vmatmul.mubr.bf16.vlgmr.msra.gmra.mrb[128].mxu0 %v4278_v26  ;;  %v7949_v26 = vld [vmem:[%s10124_s6 + $0x68] sm:$0xff]  }
 0xdb7   :  { %7568 = vmatprep.mubr.msk.bf16.mxu0 %vm3814_vm3, %v7937_v16  ;;  %v7952_v16 = vld [vmem:[%s10124_s6 + $0x80] sm:$0xff]  }
 0xe89   :  { %v7554_v1 = vpop.f32.mrb[128].mxu0 }
 0xe8a   :  { %v4390_v34 = vadd.f32 %v7554_v1, %v4298_v15  ;;  %v4381_v32 = vpop.f32.mrb[129].mxu0  ;;  %v7954_v1 = vld [vmem:[%s10119_s1 + $0x240] sm:$0xff]  }
 0xe8b   :  { %v4382_v9 = vadd.f32 %v4381_v32, %v4298_v15  ;;  %v7555_v37 = vpop.f32.mrb[130].mxu0  ;;  %v7956_v32 = vld [vmem:[%s10119_s1 + $0x250] sm:$0xff]  }
 0xe8c   :  { %v4398_v4 = vadd.f32 3.0, %v4390_v34  ;;  %v4393_v62 = vadd.f32 %v7555_v37, %v4298_v15  ;;  %v4384_v56 = vpop.f32.mrb[131].mxu0  ;;  %v7958_v37 = vld [vmem:[%s10119_s1 + $0x260] sm:$0xff]  }
 0xe8d   :  { %v4396_v63 = vadd.f32 3.0, %v4382_v9  ;;  %v4385_v46 = vadd.f32 %v4384_v56, %v4298_v15  ;;  %v7953_v15 = vld [vmem:[%s10124_s6 + $0x88] sm:$0xff]   ;;  %v4490_v56 = vrot.slane %v9595_v17, %v8654_v49  ;;  %s8025_s6 = smov [#allocation2]  }
 0xe8e   :  { %v4402_v18 = vmax.f32 %v4398_v4, 0.0  ;;  %v4399_v45 = vadd.f32 3.0, %v4393_v62  ;;  %v7959_v4 = vld [vmem:[%s10119_s1 + $0x268] sm:$0xff]   ;;  %s5896_s22 = sshll.u32 %s8025_s6, 4  ;;  %s5897_s22 = int_to_ptr.vmem [resolvable:$true] %s5896_s22 }
 0xe8f   :  { %v4400_v40 = vmax.f32 %v4396_v63, 0.0  ;;  %v4397_v43 = vadd.f32 3.0, %v4385_v46  ;;  %v4568_v63 = vrot.slane %v9595_v17, %v8657_v36  ;;  %s7999_s8 = scalar_lea.vmem %s5897_s22, 32  ;;  %p8004_p1 = scmp.lt.s32.totalorder %s5897_s22, %s5897_s22 }
 0xe90   :  { %v4406_v21 = vmin.f32 %v4402_v18, 6.0  ;;  %v4403_v23 = vmax.f32 %v4399_v45, 0.0  ;;  %p8000_p0 = scmp.ne.s32.totalorder %s5897_s22, %s7999_s8  ;;  %p8005_p2 = scmp.lt.s32.totalorder %s7999_s8, %s7999_s8 }
 0xe91   :  { %v4404_v8 = vmin.f32 %v4400_v40, 6.0  ;;  %v4401_v10 = vmax.f32 %v4397_v43, 0.0 }
 0xe92   :  { %v4410_v54 = vmul.f32 %v4406_v21, %v4390_v34  ;;  %v4407_v55 = vmin.f32 %v4403_v23, 6.0  ;;  %v7955_v34 = vld [vmem:[%s10119_s1 + $0x248] sm:$0xff]   ;;  %p8006_p3 = por %p8005_p2, %p8004_p1 }
 0xe93   :  { %v4408_v12 = vmul.f32 %v4404_v8, %v4382_v9  ;;  %v4405_v19 = vmin.f32 %v4401_v10, 6.0  ;;  %v7957_v9 = vld [vmem:[%s10119_s1 + $0x258] sm:$0xff]  }
 0xe94   :  { %v4411_v6 = vmul.f32 %v4407_v55, %v4393_v62  ;;  %v4414_v2 = vmul.f32 0.16666667, %v4410_v54  ;;  %v7960_v62 = vld [vmem:[%s10119_s1 + $0x270] sm:$0xff]   ;;  %p8007_p4 = pnand %p8006_p3, %p8000_p0 }
 0xe95   :  { %v4409_v48 = vmul.f32 %v4405_v19, %v4385_v46  ;;  %v4412_v14 = vmul.f32 0.16666667, %v4408_v12 }
 0xe96   :  { %v4415_v0 = vmul.f32 0.16666667, %v4411_v6 }
 0xe97   :  { %v4413_v57 = vmul.f32 0.16666667, %v4409_v48 }
 0xe98   :  { %v9768_v61 = vpack.c.bf16 %v4415_v0, %v4414_v2 }
 0xe99   :  { %v9770_v13 = vpack.c.bf16 %v4413_v57, %v4412_v14 }
 0xe9b   :  { %7556 = vmatprep.subr.bf16.mxu1 %v9770_v13  ;;  %7564 = vmatprep.subr.bf16.mxu0 %v9770_v13 }
 0xe9c   :  { %7557 = vmatpush3.bf16.msra.mxu1 %v9770_v13  ;;  %7565 = vmatpush3.bf16.msra.mxu0 %v9770_v13 }
 0xe9d   :  { %7558 = vmatprep.subr.bf16.mxu1 %v9768_v61  ;;  %7566 = vmatprep.subr.bf16.mxu0 %v9768_v61 }
 0xea0   :  { %7559 = vmatpush3.bf16.msra.mxu1 %v9768_v61  ;;  %7567 = vmatpush3.bf16.msra.mxu0 %v9768_v61 }
 0xea1   :  { %7572 = vmatprep.subr.bf16.mxu1 %v9770_v13  ;;  %7580 = vmatprep.subr.bf16.mxu0 %v9770_v13 }
 0xea3   :  { %7561 = vmatmul.mubr.msk.bf16.vlgmr.msra.gmra.mrb[148].mxu1 %vm3814_vm3, %v7938_v50  ;;  %7569 = vmatmul.mubr.msk.bf16.vlgmr.msra.gmra.mrb[132].mxu0 %vm3814_vm3, %v7939_v25 }
 0xea4   :  { %7573 = vmatpush3.bf16.msra.mxu1 %v9770_v13  ;;  %7581 = vmatpush3.bf16.msra.mxu0 %v9770_v13 }
 0xea5   :  { %7574 = vmatprep.subr.bf16.mxu1 %v9768_v61  ;;  %7582 = vmatprep.subr.bf16.mxu0 %v9768_v61 }
 0xea6   :  { %7576 = vmatprep.mubr.msk.bf16.mxu1 %vm3814_vm3, %v7940_v24  ;;  %7584 = vmatprep.mubr.msk.bf16.mxu0 %vm3814_vm3, %v7942_v28 }
 0xea8   :  { %7575 = vmatpush3.bf16.msra.mxu1 %v9768_v61  ;;  %7583 = vmatpush3.bf16.msra.mxu0 %v9768_v61 }
 0xea9   :  { %7588 = vmatprep.subr.bf16.mxu1 %v9770_v13  ;;  %7596 = vmatprep.subr.bf16.mxu0 %v9770_v13 }
 0xeab   :  { %7577 = vmatmul.mubr.msk.bf16.vlgmr.msra.gmra.mrb[152].mxu1 %vm3814_vm3, %v7941_v59  ;;  %7585 = vmatmul.mubr.msk.bf16.vlgmr.msra.gmra.mrb[136].mxu0 %vm3814_vm3, %v7943_v52 }
 0xeac   :  { %7589 = vmatpush3.bf16.msra.mxu1 %v9770_v13  ;;  %7597 = vmatpush3.bf16.msra.mxu0 %v9770_v13 }
 0xead   :  { %7590 = vmatprep.subr.bf16.mxu1 %v9768_v61  ;;  %7598 = vmatprep.subr.bf16.mxu0 %v9768_v61 }
 0xeae   :  { %7592 = vmatprep.mubr.msk.bf16.mxu1 %vm3814_vm3, %v7944_v27  ;;  %7600 = vmatprep.mubr.msk.bf16.mxu0 %vm3814_vm3, %v7946_v31 }
 0xeb0   :  { %7591 = vmatpush3.bf16.msra.mxu1 %v9768_v61  ;;  %7599 = vmatpush3.bf16.msra.mxu0 %v9768_v61 }
 0xeb1   :  { %7604 = vmatprep.subr.bf16.mxu1 %v9770_v13  ;;  %7612 = vmatprep.subr.bf16.mxu0 %v9770_v13 }
 0xeb3   :  { %7593 = vmatmul.mubr.msk.bf16.vlgmr.msra.gmra.mrb[156].mxu1 %vm3814_vm3, %v7945_v7  ;;  %7601 = vmatmul.mubr.msk.bf16.vlgmr.msra.gmra.mrb[140].mxu0 %vm3814_vm3, %v7947_v51 }
 0xeb4   :  { %7605 = vmatpush3.bf16.msra.mxu1 %v9770_v13  ;;  %7613 = vmatpush3.bf16.msra.mxu0 %v9770_v13 }
 0xeb5   :  { %7606 = vmatprep.subr.bf16.mxu1 %v9768_v61  ;;  %7614 = vmatprep.subr.bf16.mxu0 %v9768_v61 }
 0xeb6   :  { %7608 = vmatprep.mubr.msk.bf16.mxu1 %vm3814_vm3, %v7948_v42  ;;  %7616 = vmatprep.mubr.msk.bf16.mxu0 %vm3814_vm3, %v7950_v29 }
 0xeb8   :  { %7607 = vmatpush3.bf16.msra.mxu1 %v9768_v61  ;;  %7615 = vmatpush3.bf16.msra.mxu0 %v9768_v61 }
 0xeb9   :  { %7620 = vmatprep.subr.bf16.mxu1 %v9770_v13  ;;  %7628 = vmatprep.subr.bf16.mxu0 %v10144_v33 }
 0xebb   :  { %7609 = vmatmul.mubr.msk.bf16.vlgmr.msra.gmra.mrb[160].mxu1 %vm3814_vm3, %v7949_v26  ;;  %7617 = vmatmul.mubr.msk.bf16.vlgmr.msra.gmra.mrb[144].mxu0 %vm3814_vm3, %v7951_v30 }
 0xebc   :  { %7621 = vmatpush3.bf16.msra.mxu1 %v9770_v13  ;;  %7624 = vmatprep.mubr.msk.bf16.mxu1 %vm3814_vm3, %v7952_v16  ;;  %v4732_v13 = vrot.slane %v9595_v17, %v8766_v3 }
 0xebd   :  { %7622 = vmatprep.subr.bf16.mxu1 %v9768_v61  ;;  %7632 = vmatprep.mubr.msk.bf16.mxu0 %vm8024_vm0, %v10144_v33 }
 0xec0   :  { %7623 = vmatpush3.bf16.msra.mxu1 %v9768_v61  ;;  %v4650_v61 = vrot.slane %v9595_v17, %v8763_v38 }
 0xec1   :  { %7636 = vmatprep.subr.bf16.mxu1 %v10144_v33 }
 0xec3   :  { %7625 = vmatmul.mubr.msk.bf16.vlgmr.msra.gmra.mrb[164].mxu1 %vm3814_vm3, %v7953_v15 }
 0xec4   :  { %7652 = vmatprep.mubr.msk.bf16.mxu1 %vm8024_vm0, %v10144_v33  ;;  %7637 = vmatpush3.bf16.msra.mxu1 %v7954_v1 }
 0xec5   :  { %7638 = vmatprep.subr.bf16.mxu1 %v10144_v33 }
 0xec8   :  { %7639 = vmatpush3.bf16.msra.mxu1 %v7955_v34 }
 0xec9   :  { %7640 = vmatprep.subr.bf16.mxu1 %v10144_v33 }
 0xecc   :  { %7641 = vmatpush3.bf16.msra.mxu1 %v7956_v32 }
 0xecd   :  { %7642 = vmatprep.subr.bf16.mxu1 %v10144_v33 }
 0xed0   :  { %7643 = vmatpush3.bf16.msra.mxu1 %v7957_v9 }
 0xed1   :  { %7644 = vmatprep.subr.bf16.mxu1 %v10144_v33 }
 0xed4   :  { %7645 = vmatpush3.bf16.msra.mxu1 %v7958_v37 }
 0xed5   :  { %7646 = vmatprep.subr.bf16.mxu1 %v10144_v33 }
 0xed8   :  { %7647 = vmatpush3.bf16.msra.mxu1 %v7959_v4  ;;  %v4814_v4 = vrot.slane %v9595_v17, %v8870_v22 }
 0xed9   :  { %7648 = vmatprep.subr.bf16.mxu1 %v10144_v33 }
 0xedc   :  { %7649 = vmatpush3.bf16.msra.mxu1 %v7960_v62  ;;  %v4896_v62 = vrot.slane %v9595_v17, %v8873_v41 }
 0xedd   :  { %7650 = vmatprep.subr.bf16.mxu1 %v10144_v33 }
 0xf76   :  { %v7562_v46 = vpop.f32.mrb[148].mxu1  ;;  %v7570_v18 = vpop.f32.mrb[132].mxu0 }
 0xf77   :  { %v4493_v45 = vmul.f32 %v7562_v46, %v4490_v56  ;;  %v4571_v40 = vmul.f32 %v7570_v18, %v4568_v63  ;;  %v4472_v43 = vpop.f32.mrb[149].mxu1  ;;  %v4550_v21 = vpop.f32.mrb[133].mxu0 }
 0xf78   :  { %v4491_v23 = vmul.f32 %v4490_v56, %v4472_v43  ;;  %v4569_v8 = vmul.f32 %v4568_v63, %v4550_v21  ;;  %v7563_v10 = vpop.f32.mrb[150].mxu1  ;;  %v7571_v54 = vpop.f32.mrb[134].mxu0 }
 0xf79   :  { %v4575_v55 = vadd.f32 %v4571_v40, %v4493_v45  ;;  %v4494_v12 = vmul.f32 %v7563_v10, %v4490_v56  ;;  %v4572_v19 = vmul.f32 %v7571_v54, %v4568_v63  ;;  %v4475_v6 = vpop.f32.mrb[151].mxu1  ;;  %v4553_v48 = vpop.f32.mrb[135].mxu0 }
 0xf7a   :  { %v4573_v2 = vadd.f32 %v4569_v8, %v4491_v23  ;;  %v4492_v0 = vmul.f32 %v4490_v56, %v4475_v6  ;;  %v4570_v14 = vmul.f32 %v4568_v63, %v4553_v48 }
 0xf7b   :  { %v4576_v57 = vadd.f32 %v4572_v19, %v4494_v12  ;;  %v46_v19 = vld [vmem:[%s10120_s2 + $0x18] sm:$0xff] }
 0xf7c   :  { %v4574_v50 = vadd.f32 %v4570_v14, %v4492_v0 }
 0xf7e   :  { %v7578_v25 = vpop.f32.mrb[152].mxu1  ;;  %v7586_v24 = vpop.f32.mrb[136].mxu0 }
 0xf7f   :  { %v4653_v28 = vmul.f32 %v7578_v25, %v4650_v61  ;;  %v4632_v59 = vpop.f32.mrb[153].mxu1  ;;  %v4735_v52 = vmul.f32 %v7586_v24, %v4732_v13  ;;  %v4714_v27 = vpop.f32.mrb[137].mxu0  ;;  %v4978_v25 = vrot.slane %v46_v19, %v8143_v20  ;;  %v5060_v24 = vrot.slane %v46_v19, %v8586_v58 }
 0xf80   :  { %v4651_v31 = vmul.f32 %v4650_v61, %v4632_v59  ;;  %v7579_v7 = vpop.f32.mrb[154].mxu1  ;;  %v4733_v51 = vmul.f32 %v4732_v13, %v4714_v27  ;;  %v7587_v42 = vpop.f32.mrb[138].mxu0 }
 0xf81   :  { %v4657_v29 = vadd.f32 %v4653_v28, %v4575_v55  ;;  %v4654_v26 = vmul.f32 %v7579_v7, %v4650_v61  ;;  %v4635_v30 = vpop.f32.mrb[155].mxu1  ;;  %v4736_v16 = vmul.f32 %v7587_v42, %v4732_v13  ;;  %v4717_v15 = vpop.f32.mrb[139].mxu0 }
 0xf82   :  { %v4655_v1 = vadd.f32 %v4651_v31, %v4573_v2  ;;  %v4652_v34 = vmul.f32 %v4650_v61, %v4635_v30  ;;  %v4734_v32 = vmul.f32 %v4732_v13, %v4717_v15 }
 0xf83   :  { %v4658_v9 = vadd.f32 %v4654_v26, %v4576_v57  ;;  %v4739_v37 = vadd.f32 %v4735_v52, %v4657_v29 }
 0xf84   :  { %v4656_v56 = vadd.f32 %v4652_v34, %v4574_v50  ;;  %v4737_v63 = vadd.f32 %v4733_v51, %v4655_v1 }
 0xf85   :  { %v4740_v46 = vadd.f32 %v4736_v16, %v4658_v9 }
 0xf86   :  { %v4738_v18 = vadd.f32 %v4734_v32, %v4656_v56  ;;  %v7594_v45 = vpop.f32.mrb[156].mxu1  ;;  %v7602_v40 = vpop.f32.mrb[140].mxu0 }
 0xf87   :  { %v4817_v43 = vmul.f32 %v7594_v45, %v4814_v4  ;;  %v4796_v21 = vpop.f32.mrb[157].mxu1  ;;  %v4899_v23 = vmul.f32 %v7602_v40, %v4896_v62  ;;  %v4878_v8 = vpop.f32.mrb[141].mxu0 }
 0xf88   :  { %v4815_v10 = vmul.f32 %v4814_v4, %v4796_v21  ;;  %v7595_v54 = vpop.f32.mrb[158].mxu1  ;;  %v4897_v55 = vmul.f32 %v4896_v62, %v4878_v8  ;;  %v7603_v12 = vpop.f32.mrb[142].mxu0 }
 0xf89   :  { %v4821_v6 = vadd.f32 %v4817_v43, %v4739_v37  ;;  %v4818_v17 = vmul.f32 %v7595_v54, %v4814_v4  ;;  %v4799_v48 = vpop.f32.mrb[159].mxu1  ;;  %v4900_v2 = vmul.f32 %v7603_v12, %v4896_v62  ;;  %v4881_v0 = vpop.f32.mrb[143].mxu0 }
 0xf8a   :  { %v4819_v14 = vadd.f32 %v4815_v10, %v4737_v63  ;;  %v4816_v57 = vmul.f32 %v4814_v4, %v4799_v48  ;;  %v4898_v61 = vmul.f32 %v4896_v62, %v4881_v0  ;;  %v5154_v10 = vrot.slane %v9697_v39, %v8657_v36 }
 0xf8b   :  { %v4822_v13 = vadd.f32 %v4818_v17, %v4740_v46  ;;  %v4903_v50 = vadd.f32 %v4899_v23, %v4821_v6 }
 0xf8c   :  { %v4820_v28 = vadd.f32 %v4816_v57, %v4738_v18  ;;  %v4901_v59 = vadd.f32 %v4897_v55, %v4819_v14  ;;  %v5142_v18 = vrot.slane %v46_v19, %v8654_v49 }
 0xf8d   :  { %v4904_v52 = vadd.f32 %v4900_v2, %v4822_v13 }
 0xf8e   :  { %v4902_v27 = vadd.f32 %v4898_v61, %v4820_v28  ;;  %v7610_v31 = vpop.f32.mrb[160].mxu1  ;;  %v7618_v7 = vpop.f32.mrb[144].mxu0 }
 0xf8f   :  { %v4981_v51 = vmul.f32 %v7610_v31, %v4978_v25  ;;  %v4960_v42 = vpop.f32.mrb[161].mxu1  ;;  %v5063_v29 = vmul.f32 %v7618_v7, %v5060_v24  ;;  %v5042_v26 = vpop.f32.mrb[145].mxu0 }
 0xf90   :  { %v4979_v30 = vmul.f32 %v4978_v25, %v4960_v42  ;;  %v7611_v16 = vpop.f32.mrb[162].mxu1  ;;  %v5061_v15 = vmul.f32 %v5060_v24, %v5042_v26  ;;  %v7619_v1 = vpop.f32.mrb[146].mxu0 }
 0xf91   :  { %v4985_v34 = vadd.f32 %v4981_v51, %v4903_v50  ;;  %v4982_v32 = vmul.f32 %v7611_v16, %v4978_v25  ;;  %v4963_v9 = vpop.f32.mrb[163].mxu1  ;;  %v5064_v37 = vmul.f32 %v7619_v1, %v5060_v24  ;;  %v5045_v4 = vpop.f32.mrb[147].mxu0 }
 0xf92   :  { %v4983_v58 = vadd.f32 %v4979_v30, %v4901_v59  ;;  %v4980_v62 = vmul.f32 %v4978_v25, %v4963_v9  ;;  %v5062_v56 = vmul.f32 %v5060_v24, %v5045_v4  ;;  %v7961_v4 = vld [vmem:[%s10119_s1 + $0x278] sm:$0xff]  }
 0xf93   :  { %v4986_v63 = vadd.f32 %v4982_v32, %v4904_v52  ;;  %v5067_v46 = vadd.f32 %v5063_v29, %v4985_v34  ;;  %7651 = vmatpush3.bf16.msra.mxu1 %v7961_v4 }
 0xf94   :  { %v4984_v45 = vadd.f32 %v4980_v62, %v4902_v27  ;;  %v5065_v40 = vadd.f32 %v5061_v15, %v4983_v58  ;;  %v7962_v58 = vld [vmem:[%s10119_s1 + $0x280] sm:$0xff]   ;;  %v7963_v62 = vld [vmem:[%s10119_s1 + $0x288] sm:$0xff]  }
 0xf95   :  { %v5068_v43 = vadd.f32 %v5064_v37, %v4986_v63  ;;  %v7966_v63 = vld [vmem:[%s10119_s1 + $0x2a0] sm:$0xff]  }
 0xf96   :  { %v5066_v21 = vadd.f32 %v5062_v56, %v4984_v45  ;;  %v7626_v23 = vpop.f32.mrb[164].mxu1  ;;  %v7965_v56 = vld [vmem:[%s10119_s1 + $0x298] sm:$0xff]  }
 0xf97   :  { %v5145_v8 = vmul.f32 %v7626_v23, %v5142_v18  ;;  %v5124_v54 = vpop.f32.mrb[165].mxu1  ;;  %v7968_v23 = vld [vmem:[%s10119_s1 + $0x2b0] sm:$0xff]  }
 0xf98   :  { %v5143_v55 = vmul.f32 %v5142_v18, %v5124_v54  ;;  %v7627_v12 = vpop.f32.mrb[166].mxu1 }
 0xf99   :  { %v5149_v6 = vadd.f32 %v5145_v8, %v5067_v46  ;;  %v5146_v17 = vmul.f32 %v7627_v12, %v5142_v18  ;;  %v5127_v48 = vpop.f32.mrb[167].mxu1  ;;  %v7967_v46 = vld [vmem:[%s10119_s1 + $0x2a8] sm:$0xff]   ;;  %v7969_v8 = vld [vmem:[%s10119_s1 + $0x2b8] sm:$0xff]  }
 0xf9a   :  { %v5147_v2 = vadd.f32 %v5143_v55, %v5065_v40  ;;  %v5144_v0 = vmul.f32 %v5142_v18, %v5127_v48 }
 0xf9b   :  { %v5157_v14 = vadd.f32 %v5154_v10, %v5149_v6  ;;  %v5150_v57 = vadd.f32 %v5146_v17, %v5068_v43 }
 0xf9c   :  { %v5155_v49 = vadd.f32 %v5154_v10, %v5147_v2  ;;  %v5148_v19 = vadd.f32 %v5144_v0, %v5066_v21  ;;  %v7970_v2 = vld [vmem:[%s10119_s1 + $0x2c0] sm:$0xff]   ;;  %v7971_v0 = vld [vmem:[%s10119_s1 + $0x2c8] sm:$0xff]  }
 0xf9d   :  { %v5161_v61 = vadd.f32 3.0, %v5157_v14  ;;  %v5158_v13 = vadd.f32 %v5154_v10, %v5150_v57  ;;  %v7974_v57 = vld [vmem:[%s10119_s1 + $0x2e0] sm:$0xff]  }
 0xf9e   :  { %v5159_v50 = vadd.f32 3.0, %v5155_v49  ;;  %v5156_v25 = vadd.f32 %v5154_v10, %v5148_v19  ;;  %v5241_v10 = vrot.slane %v9697_v39, %v8763_v38  ;;  %v7972_v38 = vld [vmem:[%s10119_s1 + $0x2d0] sm:$0xff]   ;;  %v5351_v19 = vrot.slane %v9697_v39, %v8766_v3 }
 0xf9f   :  { %v5162_v24 = vadd.f32 3.0, %v5158_v13  ;;  %v5165_v28 = vmax.f32 %v5161_v61, 0.0  ;;  %v7976_v3 = vld [vmem:[%s10119_s1 + $0x2f0] sm:$0xff]  }
 0xfa0   :  { %v5163_v59 = vmax.f32 %v5159_v50, 0.0  ;;  %v5160_v36 = vadd.f32 3.0, %v5156_v25 }
 0xfa1   :  { %v5166_v52 = vmax.f32 %v5162_v24, 0.0  ;;  %v5169_v51 = vmin.f32 %v5165_v28, 6.0 }
 0xfa2   :  { %v5167_v27 = vmin.f32 %v5163_v59, 6.0  ;;  %v5164_v31 = vmax.f32 %v5160_v36, 0.0 }
 0xfa3   :  { %v5170_v7 = vmin.f32 %v5166_v52, 6.0  ;;  %v5173_v16 = vmul.f32 %v5169_v51, %v5157_v14  ;;  %v7973_v14 = vld [vmem:[%s10119_s1 + $0x2d8] sm:$0xff]  }
 0xfa4   :  { %v5171_v42 = vmul.f32 %v5167_v27, %v5155_v49  ;;  %v5168_v29 = vmin.f32 %v5164_v31, 6.0  ;;  %v7975_v49 = vld [vmem:[%s10119_s1 + $0x2e8] sm:$0xff]  }
 0xfa5   :  { %v5174_v26 = vmul.f32 %v5170_v7, %v5158_v13  ;;  %v9934_v9 = vmul.f32 0.16666667, %v5173_v16  ;;  %v7977_v7 = vld [vmem:[%s10119_s1 + $0x2f8] sm:$0xff]  }
 0xfa6   :  { %v5172_v30 = vmul.f32 %v5168_v29, %v5156_v25  ;;  %v9926_v15 = vmul.f32 0.16666667, %v5171_v42 }
 0xfa7   :  { %v9930_v34 = vmul.f32 0.16666667, %v5174_v26 }
 0xfa8   :  { %v9928_v1 = vmul.f32 0.16666667, %v5172_v30 }
 0xfa9   :  { %v5180_v37 = vpack.c.bf16 %v9930_v34, %v9934_v9 }
 0xfaa   :  { %v5179_v32 = vpack.c.bf16 %v9928_v1, %v9926_v15 }
 0xfac   :  { %7629 = vmatpush3.bf16.msra.mxu0 %v5179_v32 }
 0xfad   :  { %7630 = vmatprep.subr.bf16.mxu0 %v10144_v33 }
 0xfb0   :  { %7631 = vmatpush3.bf16.msra.mxu0 %v5180_v37 }
 0xfb1   :  { %7656 = vmatprep.subr.bf16.mxu0 %v10144_v33 }
 0xfb3   :  { %7633 = vmatmul.mubr.msk.bf16.vlgmr.msra.gmra.mrb[148].mxu0 %vm3814_vm3, %v9626_v11  ;;  %v7964_v11 = vld [vmem:[%s10119_s1 + $0x290] sm:$0xff]  }
 0xfb4   :  { %7672 = vmatprep.mubr.msk.bf16.mxu0 %vm8024_vm0, %v10144_v33  ;;  %7657 = vmatpush3.bf16.msra.mxu0 %v7962_v58  ;;  %v5522_v58 = vrot.slane %v9697_v39, %v8870_v22  ;;  %v7978_v22 = vld [vmem:[%s10119_s1 + $0x300] sm:$0xff]  }
 0xfb5   :  { %7658 = vmatprep.subr.bf16.mxu0 %v10144_v33  ;;  %v7997_v39 = vld [vmem:[%s10127_s9] sm:$0x1] }
 0xfb8   :  { %7659 = vmatpush3.bf16.msra.mxu0 %v7963_v62 }
 0xfb9   :  { %7660 = vmatprep.subr.bf16.mxu0 %v10144_v33 }
 0xfbc   :  { %7661 = vmatpush3.bf16.msra.mxu0 %v7964_v11 }
 0xfbd   :  { %7662 = vmatprep.subr.bf16.mxu0 %v10144_v33 }
 0xfc0   :  { %7663 = vmatpush3.bf16.msra.mxu0 %v7965_v56 }
 0xfc1   :  { %7664 = vmatprep.subr.bf16.mxu0 %v10144_v33 }
 0xfc4   :  { %7665 = vmatpush3.bf16.msra.mxu0 %v7966_v63 }
 0xfc5   :  { %7666 = vmatprep.subr.bf16.mxu0 %v10144_v33 }
 0xfc8   :  { %7667 = vmatpush3.bf16.msra.mxu0 %v7967_v46 }
 0xfc9   :  { %7668 = vmatprep.subr.bf16.mxu0 %v10144_v33 }
 0xfcc   :  { %7669 = vmatpush3.bf16.msra.mxu0 %v7968_v23  ;;  %v7983_v23 = vld [vmem:[%s10119_s1 + $0x328] sm:$0xff]  }
 0xfcd   :  { %7670 = vmatprep.subr.bf16.mxu0 %v10144_v33 }
 0xfd0   :  { %7671 = vmatpush3.bf16.msra.mxu0 %v7969_v8  ;;  %v7984_v8 = vld [vmem:[%s10119_s1 + $0x330] sm:$0xff]  }
 0xfd1   :  { %7682 = vmatprep.subr.bf16.mxu0 %v7970_v2 }
0x1086   :  { %v5215_v18 = vpop.f32.mrb[148].mxu0 }
0x1087   :  { %v5221_v45 = vpack.c.bf16 %v5215_v18, %v5215_v18  ;;  %v7634_v40 = vpop.f32.mrb[149].mxu0 }
0x1088   :  { %v5218_v43 = vpop.f32.mrb[150].mxu0 }
0x1089   :  { %v7635_v21 = vpop.f32.mrb[151].mxu0  ;;  %7653 = vmatmul.mubr.bf16.vlgmr.msra.gmra.mrb[168].mxu1 %v5221_v45 }
0x108a   :  { %7678 = vmatprep.mubr.msk.bf16.mxu1 %vm2494_vm1, %v9672_v53 }
0x115c   :  { %v5324_v54 = vpop.f32.mrb[168].mxu1 }
0x115d   :  { %v5325_v55 = vadd.f32 %v5324_v54, %v5241_v10  ;;  %v7654_v12 = vpop.f32.mrb[169].mxu1  ;;  %v7985_v10 = vld [vmem:[%s10119_s1 + $0x338] sm:$0xff]   ;;  %v7986_v54 = vld [vmem:[%s10119_s1 + $0x340] sm:$0xff]  }
0x115e   :  { %v5327_v6 = vpop.f32.mrb[170].mxu1  ;;  %v7988_v12 = vld [vmem:[%s10119_s1 + $0x350] sm:$0xff]  }
0x115f   :  { %v5330_v53 = vmax.f32 %v5325_v55, 0.0  ;;  %v7655_v17 = vpop.f32.mrb[171].mxu1  ;;  %v7987_v55 = vld [vmem:[%s10119_s1 + $0x348] sm:$0xff]   ;;  %v7989_v6 = vld [vmem:[%s10119_s1 + $0x358] sm:$0xff]  }
0x1161   :  { %v5331_v48 = vpack.c.bf16 %v5330_v53, %v5330_v53 }
0x1163   :  { %7673 = vmatmul.mubr.bf16.vlgmr.msra.gmra.mrb[152].mxu0 %v5331_v48 }
0x1164   :  { %7683 = vmatpush3.bf16.msra.mxu0 %v7970_v2 }
0x1165   :  { %7684 = vmatprep.subr.bf16.mxu0 %v7971_v0 }
0x1168   :  { %7685 = vmatpush3.bf16.msra.mxu0 %v7971_v0 }
0x1169   :  { %7686 = vmatprep.subr.bf16.mxu0 %v7972_v38 }
0x116c   :  { %7687 = vmatpush3.bf16.msra.mxu0 %v7972_v38  ;;  %v7990_v38 = vld [vmem:[%s10119_s1 + $0x360] sm:$0xff]  }
0x116d   :  { %7688 = vmatprep.subr.bf16.mxu0 %v7973_v14 }
0x1170   :  { %7689 = vmatpush3.bf16.msra.mxu0 %v7973_v14  ;;  %v7991_v14 = vld [vmem:[%s10119_s1 + $0x368] sm:$0xff]  }
0x1171   :  { %7690 = vmatprep.subr.bf16.mxu0 %v7974_v57 }
0x1174   :  { %7691 = vmatpush3.bf16.msra.mxu0 %v7974_v57  ;;  %v7992_v57 = vld [vmem:[%s10119_s1 + $0x370] sm:$0xff]  }
0x1175   :  { %7692 = vmatprep.subr.bf16.mxu0 %v7975_v49 }
0x1178   :  { %7693 = vmatpush3.bf16.msra.mxu0 %v7975_v49  ;;  %v7993_v49 = vld [vmem:[%s10119_s1 + $0x378] sm:$0xff]  }
0x1179   :  { %7694 = vmatprep.subr.bf16.mxu0 %v7976_v3 }
0x117c   :  { %7695 = vmatpush3.bf16.msra.mxu0 %v7976_v3  ;;  %v42_v3 = vld [vmem:[%s10121_s3 + $0x10] sm:$0xff] }
0x117d   :  { %7696 = vmatprep.subr.bf16.mxu0 %v7977_v7 }
0x1180   :  { %7697 = vmatpush3.bf16.msra.mxu0 %v7977_v7  ;;  %v5800_v7 = vrot.slane %v42_v3, %v8143_v20 }
0x1181   :  { %7730 = vmatprep.subr.bf16.mxu0 %v10144_v33 }
0x1236   :  { %v5434_v61 = vpop.f32.mrb[152].mxu0 }
0x1237   :  { %v5435_v13 = vadd.f32 %v5434_v61, %v5351_v19  ;;  %v7674_v50 = vpop.f32.mrb[153].mxu0  ;;  %v7998_v19 = vld [vmem:[%s10121_s3 + $0x8] sm:$0xff] }
0x1238   :  { %v5437_v25 = vpop.f32.mrb[154].mxu0  ;;  %v5686_v61 = vrot.slane %v7998_v19, %v8873_v41 }
0x1239   :  { %v5440_v24 = vadd.f32 3.0, %v5435_v13  ;;  %v7675_v28 = vpop.f32.mrb[155].mxu0 }
0x123b   :  { %v5441_v59 = vmax.f32 %v5440_v24, 0.0 }
0x123d   :  { %v5442_v36 = vmin.f32 %v5441_v59, 6.0 }
0x123f   :  { %v5443_v52 = vmul.f32 0.16666667, %v5442_v36 }
0x1241   :  { %v5444_v27 = vpack.c.bf16 %v5443_v52, %v5443_v52 }
0x1243   :  { %7752 = vmatprep.subr.msk.bf16.mxu1 %vm2519_vm2, %v5444_v27  ;;  %v5446_v31 = vsel %vm2519_vm2, %v5444_v27, 0 }
0x1244   :  { %7677 = vmatpush3.bf16.msra.mxu1 %v5446_v31 }
0x1245   :  { %7702 = vmatprep.subr.bf16.mxu1 %v10144_v33 }
0x1247   :  { %7679 = vmatmul.mubr.msk.bf16.vlgmr.msra.gmra.mrb[172].mxu1 %vm2494_vm1, %v9706_v47 }
0x1248   :  { %7706 = vmatprep.mubr.msk.bf16.mxu1 %vm8024_vm0, %v10144_v33 }
0x131a   :  { %v7680_v51 = vpop.f32.mrb[172].mxu1 }
0x131b   :  { %v5482_v42 = vpop.f32.mrb[173].mxu1  ;;  %v5499_v29 = vmul.f32 %v7680_v51, %v9934_v9 }
0x131c   :  { %v7681_v47 = vpop.f32.mrb[174].mxu1  ;;  %v5497_v16 = vmul.f32 %v5482_v42, %v9926_v15 }
0x131d   :  { %v5500_v26 = vmul.f32 %v7681_v47, %v9930_v34  ;;  %v5485_v30 = vpop.f32.mrb[175].mxu1 }
0x131e   :  { %v5498_v32 = vmul.f32 %v5485_v30, %v9928_v1 }
0x131f   :  { %v5502_v37 = vpack.c.bf16 %v5500_v26, %v5499_v29 }
0x1320   :  { %v5501_v4 = vpack.c.bf16 %v5498_v32, %v5497_v16 }
0x1322   :  { %7698 = vmatprep.mubr.bf16.mxu0 %v5501_v4 }
0x1323   :  { %7699 = vmatmul.mubr.bf16.vlgmr.msra.gmra.mrb[156].mxu0 %v5502_v37 }
0x1324   :  { %7746 = vmatprep.mubr.msk.bf16.mxu0 %vm8024_vm0, %v10144_v33  ;;  %7731 = vmatpush3.bf16.msra.mxu0 %v7986_v54 }
0x1325   :  { %7732 = vmatprep.subr.bf16.mxu0 %v10144_v33 }
0x1328   :  { %7733 = vmatpush3.bf16.msra.mxu0 %v7987_v55 }
0x1329   :  { %7734 = vmatprep.subr.bf16.mxu0 %v10144_v33 }
0x132c   :  { %7735 = vmatpush3.bf16.msra.mxu0 %v7988_v12 }
0x132d   :  { %7736 = vmatprep.subr.bf16.mxu0 %v10144_v33 }
0x1330   :  { %7737 = vmatpush3.bf16.msra.mxu0 %v7989_v6 }
0x1331   :  { %7738 = vmatprep.subr.bf16.mxu0 %v10144_v33 }
0x1334   :  { %7739 = vmatpush3.bf16.msra.mxu0 %v7990_v38 }
0x1335   :  { %7740 = vmatprep.subr.bf16.mxu0 %v10144_v33 }
0x1338   :  { %7741 = vmatpush3.bf16.msra.mxu0 %v7991_v14 }
0x1339   :  { %7742 = vmatprep.subr.bf16.mxu0 %v10144_v33 }
0x133c   :  { %7743 = vmatpush3.bf16.msra.mxu0 %v7992_v57 }
0x133d   :  { %7744 = vmatprep.subr.bf16.mxu0 %v10144_v33 }
0x1340   :  { %7745 = vmatpush3.bf16.msra.mxu0 %v7993_v49 }
0x13f6   :  { %v7700_v62 = vpop.f32.mrb[156].mxu0 }
0x13f7   :  { %v5614_v11 = vadd.f32 %v7700_v62, %v5522_v58  ;;  %v5605_v9 = vpop.f32.mrb[157].mxu0 }
0x13f8   :  { %v5606_v56 = vadd.f32 %v5605_v9, %v5522_v58  ;;  %v7701_v34 = vpop.f32.mrb[158].mxu0 }
0x13f9   :  { %v5617_v63 = vadd.f32 %v7701_v34, %v5522_v58  ;;  %v5608_v46 = vpop.f32.mrb[159].mxu0  ;;  %v5622_v1 = vadd.f32 %v5614_v11, %v9752_v35  ;;  %v7982_v35 = vld [vmem:[%s10119_s1 + $0x320] sm:$0xff]  }
0x13fa   :  { %v5609_v15 = vadd.f32 %v5608_v46, %v5522_v58  ;;  %v5620_v45 = vadd.f32 %v5606_v56, %v9748_v44  ;;  %v7980_v44 = vld [vmem:[%s10119_s1 + $0x310] sm:$0xff]  }
0x13fb   :  { %v5623_v18 = vadd.f32 %v5617_v63, %v9746_v60  ;;  %v7979_v60 = vld [vmem:[%s10119_s1 + $0x308] sm:$0xff]  }
0x13fc   :  { %v5621_v40 = vadd.f32 %v5609_v15, %v9750_v5  ;;  %v7981_v5 = vld [vmem:[%s10119_s1 + $0x318] sm:$0xff]  }
0x13fd   :  { %v5625_v43 = vpack.c.bf16 %v5623_v18, %v5622_v1 }
0x13fe   :  { %v5624_v21 = vpack.c.bf16 %v5621_v40, %v5620_v45 }
0x1400   :  { %7703 = vmatpush3.bf16.msra.mxu1 %v5624_v21 }
0x1401   :  { %7704 = vmatprep.subr.bf16.mxu1 %v10144_v33 }
0x1404   :  { %7705 = vmatpush3.bf16.msra.mxu1 %v5625_v43 }
0x1405   :  { %7710 = vmatprep.subr.bf16.mxu1 %v10144_v33 }
0x1407   :  { %7707 = vmatmul.mubr.msk.bf16.vlgmr.msra.gmra.mrb[176].mxu1 %vm3814_vm3, %v7997_v39 }
0x1408   :  { %7711 = vmatpush3.bf16.msra.mxu1 %v7978_v22  ;;  %7726 = vmatprep.mubr.msk.bf16.mxu1 %vm8024_vm0, %v10144_v33 }
0x1409   :  { %7712 = vmatprep.subr.bf16.mxu1 %v10144_v33 }
0x140c   :  { %7713 = vmatpush3.bf16.msra.mxu1 %v7979_v60 }
0x140d   :  { %7714 = vmatprep.subr.bf16.mxu1 %v10144_v33 }
0x1410   :  { %7715 = vmatpush3.bf16.msra.mxu1 %v7980_v44 }
0x1411   :  { %7716 = vmatprep.subr.bf16.mxu1 %v10144_v33 }
0x1414   :  { %7717 = vmatpush3.bf16.msra.mxu1 %v7981_v5 }
0x1415   :  { %7718 = vmatprep.subr.bf16.mxu1 %v10144_v33 }
0x1418   :  { %7719 = vmatpush3.bf16.msra.mxu1 %v7982_v35 }
0x1419   :  { %7720 = vmatprep.subr.bf16.mxu1 %v10144_v33 }
0x141c   :  { %7721 = vmatpush3.bf16.msra.mxu1 %v7983_v23 }
0x141d   :  { %7722 = vmatprep.subr.bf16.mxu1 %v10144_v33 }
0x1420   :  { %7723 = vmatpush3.bf16.msra.mxu1 %v7984_v8 }
0x1421   :  { %7724 = vmatprep.subr.bf16.mxu1 %v10144_v33 }
0x1424   :  { %7725 = vmatpush3.bf16.msra.mxu1 %v7985_v10 }
0x14da   :  { %v5660_v53 = vpop.f32.mrb[176].mxu1 }
0x14db   :  { %v5666_v17 = vpack.c.bf16 %v5660_v53, %v5660_v53  ;;  %v7708_v48 = vpop.f32.mrb[177].mxu1 }
0x14dc   :  { %v5663_v2 = vpop.f32.mrb[178].mxu1 }
0x14dd   :  { %7727 = vmatmul.mubr.bf16.vlgmr.msra.gmra.mrb[180].mxu1 %v5666_v17  ;;  %v7709_v0 = vpop.f32.mrb[179].mxu1 }
0x15b0   :  { %v5769_v13 = vpop.f32.mrb[180].mxu1 }
0x15b1   :  { %v5770_v50 = vadd.f32 %v5769_v13, %v5686_v61  ;;  %v7728_v25 = vpop.f32.mrb[181].mxu1 }
0x15b2   :  { %v5772_v24 = vpop.f32.mrb[182].mxu1 }
0x15b3   :  { %v5775_v28 = vadd.f32 3.0, %v5770_v50  ;;  %v7729_v59 = vpop.f32.mrb[183].mxu1 }
0x15b5   :  { %v5776_v36 = vmax.f32 %v5775_v28, 0.0 }
0x15b7   :  { %v5777_v52 = vmin.f32 %v5776_v36, 6.0 }
0x15b9   :  { %v5778_v33 = vmul.f32 %v5777_v52, %v5770_v50 }
0x15bb   :  { %v5779_v27 = vmul.f32 0.16666667, %v5778_v33 }
0x15bd   :  { %v5780_v31 = vpack.c.bf16 %v5779_v27, %v5779_v27 }
0x15bf   :  { %7747 = vmatmul.mubr.bf16.vlgmr.msra.gmra.mrb[160].mxu0 %v5780_v31 }
0x1692   :  { %v5883_v41 = vpop.f32.mrb[160].mxu0 }
0x1693   :  { %v5884_v51 = vadd.f32 %v5883_v41, %v5800_v7  ;;  %v7748_v42 = vpop.f32.mrb[161].mxu0 }
0x1694   :  { %v5886_v47 = vpop.f32.mrb[162].mxu0 }
0x1695   :  { %5889 = vst [vmem:[#allocation2] sm:$0x3] %v5884_v51  ;;  %v7749_v29 = vpop.f32.mrb[163].mxu0 }
0x1696   :  { %8010 = shalt.err (!%p8007_p4)
}
0x1697   :  { %s8011_s24 = scalar_lea.hbm %s10129_s11, 32 }
0x1698   :  { %p8012_p5 = scmp.ne.s32.totalorder %s10129_s11, %s8011_s24  ;;  %p8015_p6 = scmp.lt.u32.totalorder %s8011_s24, %s10129_s11 }
0x169a   :  { %p8017_p7 = pnand %p8015_p6, %p8012_p5 }
0x169c   :  { %8020 = shalt.err (!%p8017_p7)
}
0x169d   :  { %5899 = dma.vmem_to_hbm [thread:$0]  %s5897_s22, 32, %s10129_s11, [#allocation3]  }
0x169e   :  { %8021 = dma.done.wait [#allocation3], 32  }
0x169f   :  { %8022 = vsyncadd [#allocation3], 4294967264 }
0x16a0   :  { %5903 = vsyncpa [#allocation3], 1 }

</bundles_post_ra>
